<compile_context>
chip_gen: v7x
topology: tpu7x:2x2x1
jax: 0.10.0
libtpu: 0.0.40
codegen_flags: <defaults>
</compile_context>

<pallas_src>
import jax
import jax.numpy as jnp
import numpy as np
from jax import lax
from jax.experimental import pallas as pl
from jax.experimental.pallas import tpu as pltpu

LANE = 128


def _round_up(x, m):
    return (x + m - 1) // m * m


# --------------------------------------------------------------------------- #
# Kernel
# --------------------------------------------------------------------------- #
def bottleneck_kernel(x_ref, w1_ref, b1_ref, w2_ref, b2_ref, w3_ref, b3_ref,
                      o_ref, stk_ref):
    """One grid step = (image n, row-tile h).

    x_ref:  (H, W, Cin)  whole image, channels on lanes (batch dim squeezed)
    o_ref:  (TH, W, Cout) row tile of the output
    stk_ref: (TH+2, W, 3P) bf16 dx-stacked conv2 staging scratch
    """
    H, W, Cin = x_ref.shape
    TH, _, Cout = o_ref.shape
    P = w1_ref.shape[1]

    h = pl.program_id(1)
    r0 = pl.multiple_of(h * TH, TH)

    def conv1_rows(x_rows):
        """(R, W, Cin) f32 -> (R, W, P) f32; BN scale is folded into w1."""
        R = x_rows.shape[0]
        y = jnp.dot(x_rows.reshape(R * W, Cin).astype(jnp.bfloat16), w1_ref[...],
                    preferred_element_type=jnp.float32)
        return jnp.maximum(y + b1_ref[...], 0.0).reshape(R, W, P)

    def stage(rows_f32, lo, R):
        """Write R rows of h1 into stk_ref[lo:lo+R] as three dx-shifted channel
        blocks (zero padding columns folded into the writes) so every conv2 tap
        below is a free leading-dim slice."""
        rows = rows_f32.astype(jnp.bfloat16)
        zcol = jnp.zeros((R, P), jnp.bfloat16)
        stk_ref[lo:lo + R, :, P:2 * P] = rows                         # dx = 1
        stk_ref[lo:lo + R, 1:W, 0:P] = rows[:, 0:W - 1, :]            # dx = 0
        stk_ref[lo:lo + R, 0, 0:P] = zcol
        stk_ref[lo:lo + R, 0:W - 1, 2 * P:3 * P] = rows[:, 1:W, :]    # dx = 2
        stk_ref[lo:lo + R, W - 1, 2 * P:3 * P] = zcol

    # ---- conv1 (1x1) + bias + relu, staged for conv2 ----------------------
    stage(conv1_rows(x_ref[pl.ds(r0, TH), :, :]), 1, TH)
    # 1-row halos: recomputed from the resident input block (conv1 is 1x1),
    # masked to zero at the image border (== conv2's zero padding of h1).
    top_mask = (h > 0).astype(jnp.float32)
    top = conv1_rows(x_ref[pl.ds(jnp.maximum(r0 - 1, 0), 1), :, :])
    stage(top * top_mask, 0, 1)
    bot_mask = (r0 + TH < H).astype(jnp.float32)
    bot = conv1_rows(x_ref[pl.ds(jnp.minimum(r0 + TH, H - 1), 1), :, :])
    stage(bot * bot_mask, TH + 1, 1)

    # ---- conv2 (3x3, pad=1): three fat K=3P matmuls, one per dy tap --------
    def tap(dy):
        patch = stk_ref[dy:dy + TH, :, :]               # (TH, W, 3P) free slice
        return jnp.dot(patch.reshape(TH * W, 3 * P), w2_ref[dy, :, :],
                       preferred_element_type=jnp.float32)

    h2 = jnp.maximum(tap(0) + tap(1) + tap(2) + b2_ref[...], 0.0)    # (THW, P)

    # ---- conv3 (1x1, expansion) + bias -------------------------------------
    h3 = jnp.dot(h2.astype(jnp.bfloat16), w3_ref[...],
                 preferred_element_type=jnp.float32) + b3_ref[...]   # (THW, Cout)

    # ---- residual add + final relu (residual re-read late) -----------------
    resid = x_ref[pl.ds(r0, TH), :, :].reshape(TH * W, Cout)
    o_ref[...] = jnp.maximum(h3 + resid, 0.0).reshape(TH, W, Cout)


# --------------------------------------------------------------------------- #
# Wrapper / parameter preparation
# --------------------------------------------------------------------------- #
def fold_bn(gamma, beta, mean, var, eps=1e-5):
    scale = gamma / jnp.sqrt(var + eps)
    bias = beta - mean * scale
    return scale, bias


def prepare_params(params):
    """Fold BN scales into conv weights (exact in f32), pad channels to lane
    multiples, cast weights to bf16.  Done once; reuse across calls/blocks."""
    (w1, s1, b1, w2, s2, b2, w3, s3, b3) = params
    Cin, P = w1.shape
    Cout = w3.shape[1]
    Cin_p, P_p, Cout_p = (_round_up(c, LANE) for c in (Cin, P, Cout))

    w1f = w1 * s1[None, :]
    w2f = w2 * s2                      # (3, 3, ci, co) * (co,)
    w3f = w3 * s3[None, :]

    w1p = jnp.pad(w1f, ((0, Cin_p - Cin), (0, P_p - P))).astype(jnp.bfloat16)
    w3p = jnp.pad(w3f, ((0, P_p - P), (0, Cout_p - Cout))).astype(jnp.bfloat16)
    # 3x3 weight (dy, dx, ci, co) -> per-dy, dx-stacked K matrix (3, 3*P_p, P_p)
    w2p = jnp.pad(w2f, ((0, 0), (0, 0), (0, P_p - P), (0, P_p - P)))
    w2r = w2p.reshape(3, 3 * P_p, P_p).astype(jnp.bfloat16)

    pad_vec = lambda v, c: jnp.pad(v.reshape(1, -1), ((0, 0), (0, c - v.size)))
    return dict(w1=w1p, b1=pad_vec(b1, P_p),
                w2=w2r, b2=pad_vec(b2, P_p),
                w3=w3p, b3=pad_vec(b3, Cout_p),
                dims=(Cin, P, Cout, Cin_p, P_p, Cout_p))


def _vmem_limit_bytes():
    try:
        cap = int(pltpu.get_tpu_info().vmem_capacity_bytes)
    except Exception:
        cap = 64 * 1024 * 1024          # conservative (v7x-sized) fallback
    return max(32 * 1024 * 1024, min(int(cap * 0.75), 100 * 1024 * 1024))


def _pick_block_h(H, W, Cin_p, P_p, Cout_p):
    """Largest divisor of H that keeps per-step temporaries ~<= 6 MiB while
    keeping the matmul M dim >= 256 rows*cols where possible."""
    per_row = W * (4 * Cin_p + 2 * 3 * P_p + 4 * 2 * P_p + 4 * 2 * Cout_p)
    target = max(1, (6 << 20) // max(per_row, 1))
    min_rows = pl.cdiv(256, W)
    want = min(H, max(min_rows, target))
    divisors = [d for d in range(1, H + 1) if H % d == 0 and d <= want]
    return divisors[-1] if divisors else H


def bottleneck_forward_nhwc(x, prepped, block_h=None):
    """Hot-path entry: x is (N, H, W, Cin_p) f32, NHWC with channels already
    padded to a lane multiple.  Returns (N, H, W, Cout_p) f32 (padded channels
    are exact zeros).  No layout plumbing inside."""
    Cin, P, Cout, Cin_p, P_p, Cout_p = prepped["dims"]
    assert Cout == Cin and Cout_p == Cin_p, \
        "downsample=None requires inplanes == planes * 4"
    N, H, W, Cpad = x.shape
    assert Cpad == Cin_p
    # NOTE: W % 8 == 0 keeps the in-kernel (TH, W, C)->(TH*W, C) reshapes copy-free.

    TH = _pick_block_h(H, W, Cin_p, P_p, Cout_p) if block_h is None else block_h
    assert H % TH == 0, "block_h must divide H"

    flops = 2 * N * H * W * (Cin_p * P_p + 9 * P_p * P_p + P_p * Cout_p)
    bytes_accessed = (4 * N * H * W * (Cin_p + Cout_p)
                      + 2 * (prepped["w1"].size + prepped["w2"].size
                             + prepped["w3"].size)
                      + 4 * (prepped["b1"].size + prepped["b2"].size
                             + prepped["b3"].size))

    def build(single_buffer_weights):
        def wspec(shape):
            zero = (0,) * len(shape)
            kwargs = {}
            if single_buffer_weights:
                kwargs["pipeline_mode"] = pl.Buffered(1)
            return pl.BlockSpec(shape, lambda n, h: zero, **kwargs)

        grid_spec = pltpu.PrefetchScalarGridSpec(
            num_scalar_prefetch=0,
            grid=(N, H // TH),
            in_specs=[
                # whole image per n (not re-fetched across the h axis); halo rows
                # for conv2 are recomputed from this resident block.
                pl.BlockSpec((None, H, W, Cin_p), lambda n, h: (n, 0, 0, 0)),
                wspec((Cin_p, P_p)), wspec((1, P_p)),
                wspec((3, 3 * P_p, P_p)), wspec((1, P_p)),
                wspec((P_p, Cout_p)), wspec((1, Cout_p)),
            ],
            out_specs=pl.BlockSpec((None, TH, W, Cout_p),
                                   lambda n, h: (n, h, 0, 0)),
            scratch_shapes=[pltpu.VMEM((TH + 2, W, 3 * P_p), jnp.bfloat16)],
        )
        return pl.pallas_call(
            bottleneck_kernel,
            out_shape=jax.ShapeDtypeStruct((N, H, W, Cout_p), jnp.float32),
            grid_spec=grid_spec,
            compiler_params=pltpu.CompilerParams(
                dimension_semantics=("parallel", "parallel"),
                vmem_limit_bytes=_vmem_limit_bytes()),
            cost_estimate=pl.CostEstimate(flops=flops, transcendentals=0,
                                          bytes_accessed=bytes_accessed),
        )(x, prepped["w1"], prepped["b1"], prepped["w2"], prepped["b2"],
          prepped["w3"], prepped["b3"])

    try:
        # Grid-invariant weights single-buffered (saves one full weight copy of
        # VMEM, decisive at production channel counts on v7x).
        return build(True)
    except Exception:
        # TODO(synk): installed Pallas rejected pipeline_mode=pl.Buffered(1);
        # fall back to default double buffering of the weight blocks.
        return build(False)


def bottleneck_forward(x_nchw, params, block_h=None):
    """Convenience NCHW wrapper matching the PyTorch module interface.  When
    chaining blocks, keep activations NHWC/channel-padded and call
    bottleneck_forward_nhwc directly to avoid these extra HBM passes."""
    prepped = prepare_params(params)
    Cin, P, Cout, Cin_p, P_p, Cout_p = prepped["dims"]
    N, _, H, W = x_nchw.shape
    x = jnp.transpose(x_nchw, (0, 2, 3, 1))
    x = jnp.pad(x, ((0, 0), (0, 0), (0, 0), (0, Cin_p - Cin)))
    out = bottleneck_forward_nhwc(x, prepped, block_h=block_h)
    return jnp.transpose(out[..., :Cout], (0, 3, 1, 2))


# --------------------------------------------------------------------------- #
# Reference + test
# --------------------------------------------------------------------------- #
def make_params(key, inplanes, planes):
    expansion = 4
    kw1, kw2, kw3, k1, k2, k3 = jax.random.split(key, 6)
    # conv weights in matmul-friendly layouts: 1x1 -> (Cin, Cout); 3x3 -> HWIO.
    w1 = jax.random.normal(kw1, (inplanes, planes), jnp.float32) * 0.1
    w2 = jax.random.normal(kw2, (3, 3, planes, planes), jnp.float32) * 0.1
    w3 = jax.random.normal(kw3, (planes, planes * expansion), jnp.float32) * 0.1

    def bn(k, c):
        kg, kb, km, kv = jax.random.split(k, 4)
        gamma = 0.5 + jax.random.uniform(kg, (c,), jnp.float32)
        beta = 0.1 * jax.random.normal(kb, (c,), jnp.float32)
        mean = 0.1 * jax.random.normal(km, (c,), jnp.float32)
        var = 0.5 + jax.random.uniform(kv, (c,), jnp.float32)
        return fold_bn(gamma, beta, mean, var)

    s1, b1 = bn(k1, planes)
    s2, b2 = bn(k2, planes)
    s3, b3 = bn(k3, planes * expansion)
    return (w1, s1, b1, w2, s2, b2, w3, s3, b3)


def reference_forward(x_nchw, params):
    """Pure-JAX reference with the same precision policy (BN scale folded into
    the weight in f32, bf16 conv inputs, f32 accumulation)."""
    (w1, s1, b1, w2, s2, b2, w3, s3, b3) = params
    Cin, P = w1.shape
    Cout = w3.shape[1]
    w1f = (w1 * s1[None, :]).astype(jnp.bfloat16)
    w2f = (w2 * s2).astype(jnp.bfloat16)
    w3f = (w3 * s3[None, :]).astype(jnp.bfloat16)

    x = jnp.transpose(x_nchw, (0, 2, 3, 1))
    dn = ("NHWC", "HWIO", "NHWC")

    def conv(inp, w, padding):
        return lax.conv_general_dilated(
            inp.astype(jnp.bfloat16), w, (1, 1), padding,
            dimension_numbers=dn, preferred_element_type=jnp.float32)

    out = jnp.maximum(conv(x, w1f.reshape(1, 1, Cin, P), "VALID") + b1, 0.0)
    out = jnp.maximum(conv(out, w2f, ((1, 1), (1, 1))) + b2, 0.0)
    out = conv(out, w3f.reshape(1, 1, P, Cout), "VALID") + b3
    out = jnp.maximum(out + x, 0.0)
    return jnp.transpose(out, (0, 3, 1, 2))


if __name__ == "__main__":
    # Small shapes: batch=2, planes=8 -> inplanes = planes*4 = 32, spatial 16x16.
    N, planes, H, W = 2, 8, 16, 16
    inplanes = planes * 4

    key = jax.random.PRNGKey(0)
    kx, kp = jax.random.split(key)
    x = jax.random.normal(kx, (N, inplanes, H, W), jnp.float32)   # NCHW input
    params = make_params(kp, inplanes, planes)

    ref = reference_forward(x, params)

    # H-tiled path: 2 row-tiles per image -> exercises the 1-row halo logic.
    out_tiled = jax.block_until_ready(bottleneck_forward(x, params, block_h=8))
    np.testing.assert_allclose(np.asarray(out_tiled), np.asarray(ref),
                               rtol=1e-2, atol=1e-2)

    # Default (heuristic) blocking.
    out_auto = jax.block_until_ready(bottleneck_forward(x, params))
    np.testing.assert_allclose(np.asarray(out_auto), np.asarray(ref),
                               rtol=1e-2, atol=1e-2)

    assert out_tiled.shape == (N, inplanes, H, W)
    print("KERNEL_OK")
</pallas_src>

<mosaic_0001>
module attributes {stable_mosaic.version = 11 : i64} {
  func.func @bottleneck_kernel(%arg0: i32, %arg1: i32, %arg2: memref<1x16x16x128xf32, #tpu.memory_space<vmem>>, %arg3: memref<128x128xbf16, #tpu.memory_space<vmem>>, %arg4: memref<1x128xf32, #tpu.memory_space<vmem>>, %arg5: memref<3x384x128xbf16, #tpu.memory_space<vmem>>, %arg6: memref<1x128xf32, #tpu.memory_space<vmem>>, %arg7: memref<128x128xbf16, #tpu.memory_space<vmem>>, %arg8: memref<1x128xf32, #tpu.memory_space<vmem>>, %arg9: memref<1x8x16x128xf32, #tpu.memory_space<vmem>>, %arg10: memref<10x16x384xbf16, #tpu.memory_space<vmem>>) attributes {dimension_semantics = [#tpu.dimension_semantics<parallel>, #tpu.dimension_semantics<parallel>], iteration_bounds = array<i64: 2, 2>, scalar_prefetch = 0 : i64, scratch_operands = 1 : i64, tpu.core_type = #tpu.core_type<tc>, window_params = [{transform_indices = @transform_0, window_bounds = array<i64: 1, 16, 16, 128>}, {pipeline_mode = #tpu.pipeline_mode<synchronous>, transform_indices = @transform_1, window_bounds = array<i64: 128, 128>}, {pipeline_mode = #tpu.pipeline_mode<synchronous>, transform_indices = @transform_2, window_bounds = array<i64: 1, 128>}, {pipeline_mode = #tpu.pipeline_mode<synchronous>, transform_indices = @transform_3, window_bounds = array<i64: 3, 384, 128>}, {pipeline_mode = #tpu.pipeline_mode<synchronous>, transform_indices = @transform_4, window_bounds = array<i64: 1, 128>}, {pipeline_mode = #tpu.pipeline_mode<synchronous>, transform_indices = @transform_5, window_bounds = array<i64: 128, 128>}, {pipeline_mode = #tpu.pipeline_mode<synchronous>, transform_indices = @transform_6, window_bounds = array<i64: 1, 128>}, {transform_indices = @transform_7, window_bounds = array<i64: 1, 8, 16, 128>}]} {
    %c8_i32 = arith.constant 8 : i32
    %0 = arith.muli %arg1, %c8_i32 : i32
    %1 = tpu.assume_multiple %0, 8 : i32
    %c0 = arith.constant 0 : index
    %2 = arith.index_cast %1 : i32 to index
    %c0_0 = arith.constant 0 : index
    %c0_1 = arith.constant 0 : index
    %3 = vector.load %arg2[%c0, %2, %c0_0, %c0_1] : memref<1x16x16x128xf32, #tpu.memory_space<vmem>>, vector<1x8x16x128xf32>
    %4 = vector.shape_cast %3 : vector<1x8x16x128xf32> to vector<8x16x128xf32>
    %5 = vector.shape_cast %4 : vector<8x16x128xf32> to vector<128x128xf32>
    %6 = arith.truncf %5 : vector<128x128xf32> to vector<128x128xbf16>
    %c0_2 = arith.constant 0 : index
    %c0_3 = arith.constant 0 : index
    %7 = vector.load %arg3[%c0_2, %c0_3] : memref<128x128xbf16, #tpu.memory_space<vmem>>, vector<128x128xbf16>
    %cst = arith.constant dense<0.000000e+00> : vector<128x128xf32>
    %8 = tpu.matmul %6, %7, %cst {dimension_numbers = #tpu.dot_dimension_numbers<[1], [0], [0], [1], [0, 0, 1, 1], [], []>} : vector<128x128xbf16>, vector<128x128xbf16>, vector<128x128xf32> -> vector<128x128xf32>
    %c0_4 = arith.constant 0 : index
    %c0_5 = arith.constant 0 : index
    %9 = vector.load %arg4[%c0_4, %c0_5] : memref<1x128xf32, #tpu.memory_space<vmem>>, vector<1x128xf32>
    %10 = vector.broadcast %9 : vector<1x128xf32> to vector<128x128xf32>
    %11 = arith.addf %8, %10 : vector<128x128xf32>
    %cst_6 = arith.constant 0.000000e+00 : f32
    %12 = vector.broadcast %cst_6 : f32 to vector<128x128xf32>
    %13 = arith.maximumf %11, %12 : vector<128x128xf32>
    %14 = vector.shape_cast %13 : vector<128x128xf32> to vector<8x16x128xf32>
    %15 = arith.truncf %14 : vector<8x16x128xf32> to vector<8x16x128xbf16>
    %cst_7 = arith.constant 0.000000e+00 : bf16
    %16 = vector.broadcast %cst_7 : bf16 to vector<8x128xbf16>
    %c1 = arith.constant 1 : index
    %c0_8 = arith.constant 0 : index
    %c128 = arith.constant 128 : index
    %17 = vector.load %arg10[%c1, %c0_8, %c128] : memref<10x16x384xbf16, #tpu.memory_space<vmem>>, vector<8x16x128xbf16>
    tpu.vector_store %arg10[%c1, %c0_8, %c128], %15 {strides = array<i32>} : memref<10x16x384xbf16, #tpu.memory_space<vmem>>, vector<8x16x128xbf16>,
    %18 = vector.extract_strided_slice %15 {offsets = [0, 0, 0], sizes = [8, 15, 128], strides = [1, 1, 1]} : vector<8x16x128xbf16> to vector<8x15x128xbf16>
    %c1_9 = arith.constant 1 : index
    %c1_10 = arith.constant 1 : index
    %c0_11 = arith.constant 0 : index
    %19 = vector.load %arg10[%c1_9, %c1_10, %c0_11] : memref<10x16x384xbf16, #tpu.memory_space<vmem>>, vector<8x15x128xbf16>
    tpu.vector_store %arg10[%c1_9, %c1_10, %c0_11], %18 {strides = array<i32>} : memref<10x16x384xbf16, #tpu.memory_space<vmem>>, vector<8x15x128xbf16>,
    %c1_12 = arith.constant 1 : index
    %c0_13 = arith.constant 0 : index
    %c0_14 = arith.constant 0 : index
    %20 = vector.load %arg10[%c1_12, %c0_13, %c0_14] : memref<10x16x384xbf16, #tpu.memory_space<vmem>>, vector<8x1x128xbf16>
    %21 = vector.shape_cast %20 : vector<8x1x128xbf16> to vector<8x128xbf16>
    %22 = vector.shape_cast %16 : vector<8x128xbf16> to vector<8x1x128xbf16>
    tpu.vector_store %arg10[%c1_12, %c0_13, %c0_14], %22 {strides = array<i32>} : memref<10x16x384xbf16, #tpu.memory_space<vmem>>, vector<8x1x128xbf16>,
    %23 = vector.extract_strided_slice %15 {offsets = [0, 1, 0], sizes = [8, 15, 128], strides = [1, 1, 1]} : vector<8x16x128xbf16> to vector<8x15x128xbf16>
    %c1_15 = arith.constant 1 : index
    %c0_16 = arith.constant 0 : index
    %c256 = arith.constant 256 : index
    %24 = vector.load %arg10[%c1_15, %c0_16, %c256] : memref<10x16x384xbf16, #tpu.memory_space<vmem>>, vector<8x15x128xbf16>
    tpu.vector_store %arg10[%c1_15, %c0_16, %c256], %23 {strides = array<i32>} : memref<10x16x384xbf16, #tpu.memory_space<vmem>>, vector<8x15x128xbf16>,
    %c1_17 = arith.constant 1 : index
    %c15 = arith.constant 15 : index
    %c256_18 = arith.constant 256 : index
    %25 = vector.load %arg10[%c1_17, %c15, %c256_18] : memref<10x16x384xbf16, #tpu.memory_space<vmem>>, vector<8x1x128xbf16>
    %26 = vector.shape_cast %25 : vector<8x1x128xbf16> to vector<8x128xbf16>
    %27 = vector.shape_cast %16 : vector<8x128xbf16> to vector<8x1x128xbf16>
    tpu.vector_store %arg10[%c1_17, %c15, %c256_18], %27 {strides = array<i32>} : memref<10x16x384xbf16, #tpu.memory_space<vmem>>, vector<8x1x128xbf16>,
    %c0_i32 = arith.constant 0 : i32
    %28 = arith.cmpi sgt, %arg1, %c0_i32 : i32
    %29 = arith.extui %28 : i1 to i32
    %30 = arith.sitofp %29 : i32 to f32
    %c1_i32 = arith.constant 1 : i32
    %31 = arith.subi %1, %c1_i32 : i32
    %c0_i32_19 = arith.constant 0 : i32
    %32 = arith.maxsi %31, %c0_i32_19 : i32
    %c0_20 = arith.constant 0 : index
    %33 = arith.index_cast %32 : i32 to index
    %c0_21 = arith.constant 0 : index
    %c0_22 = arith.constant 0 : index
    %34 = vector.load %arg2[%c0_20, %33, %c0_21, %c0_22] : memref<1x16x16x128xf32, #tpu.memory_space<vmem>>, vector<1x1x16x128xf32>
    %35 = vector.shape_cast %34 : vector<1x1x16x128xf32> to vector<1x16x128xf32>
    %36 = vector.shape_cast %35 : vector<1x16x128xf32> to vector<16x128xf32>
    %37 = arith.truncf %36 : vector<16x128xf32> to vector<16x128xbf16>
    %c0_23 = arith.constant 0 : index
    %c0_24 = arith.constant 0 : index
    %38 = vector.load %arg3[%c0_23, %c0_24] : memref<128x128xbf16, #tpu.memory_space<vmem>>, vector<128x128xbf16>
    %cst_25 = arith.constant dense<0.000000e+00> : vector<16x128xf32>
    %39 = tpu.matmul %37, %38, %cst_25 {dimension_numbers = #tpu.dot_dimension_numbers<[1], [0], [0], [1], [0, 0, 1, 1], [], []>} : vector<16x128xbf16>, vector<128x128xbf16>, vector<16x128xf32> -> vector<16x128xf32>
    %c0_26 = arith.constant 0 : index
    %c0_27 = arith.constant 0 : index
    %40 = vector.load %arg4[%c0_26, %c0_27] : memref<1x128xf32, #tpu.memory_space<vmem>>, vector<1x128xf32>
    %41 = vector.broadcast %40 : vector<1x128xf32> to vector<16x128xf32>
    %42 = arith.addf %39, %41 : vector<16x128xf32>
    %cst_28 = arith.constant 0.000000e+00 : f32
    %43 = vector.broadcast %cst_28 : f32 to vector<16x128xf32>
    %44 = arith.maximumf %42, %43 : vector<16x128xf32>
    %45 = vector.shape_cast %44 : vector<16x128xf32> to vector<1x16x128xf32>
    %46 = vector.broadcast %30 : f32 to vector<1x16x128xf32>
    %47 = arith.mulf %45, %46 : vector<1x16x128xf32>
    %48 = arith.truncf %47 : vector<1x16x128xf32> to vector<1x16x128xbf16>
    %cst_29 = arith.constant 0.000000e+00 : bf16
    %49 = vector.broadcast %cst_29 : bf16 to vector<1x128xbf16>
    %c0_30 = arith.constant 0 : index
    %c0_31 = arith.constant 0 : index
    %c128_32 = arith.constant 128 : index
    %50 = vector.load %arg10[%c0_30, %c0_31, %c128_32] : memref<10x16x384xbf16, #tpu.memory_space<vmem>>, vector<1x16x128xbf16>
    tpu.vector_store %arg10[%c0_30, %c0_31, %c128_32], %48 {strides = array<i32>} : memref<10x16x384xbf16, #tpu.memory_space<vmem>>, vector<1x16x128xbf16>,
    %51 = vector.extract_strided_slice %48 {offsets = [0, 0, 0], sizes = [1, 15, 128], strides = [1, 1, 1]} : vector<1x16x128xbf16> to vector<1x15x128xbf16>
    %c0_33 = arith.constant 0 : index
    %c1_34 = arith.constant 1 : index
    %c0_35 = arith.constant 0 : index
    %52 = vector.load %arg10[%c0_33, %c1_34, %c0_35] : memref<10x16x384xbf16, #tpu.memory_space<vmem>>, vector<1x15x128xbf16>
    tpu.vector_store %arg10[%c0_33, %c1_34, %c0_35], %51 {strides = array<i32>} : memref<10x16x384xbf16, #tpu.memory_space<vmem>>, vector<1x15x128xbf16>,
    %c0_36 = arith.constant 0 : index
    %c0_37 = arith.constant 0 : index
    %c0_38 = arith.constant 0 : index
    %53 = vector.load %arg10[%c0_36, %c0_37, %c0_38] : memref<10x16x384xbf16, #tpu.memory_space<vmem>>, vector<1x1x128xbf16>
    %54 = vector.shape_cast %53 : vector<1x1x128xbf16> to vector<1x128xbf16>
    %55 = vector.shape_cast %49 : vector<1x128xbf16> to vector<1x1x128xbf16>
    tpu.vector_store %arg10[%c0_36, %c0_37, %c0_38], %55 {strides = array<i32>} : memref<10x16x384xbf16, #tpu.memory_space<vmem>>, vector<1x1x128xbf16>,
    %56 = vector.extract_strided_slice %48 {offsets = [0, 1, 0], sizes = [1, 15, 128], strides = [1, 1, 1]} : vector<1x16x128xbf16> to vector<1x15x128xbf16>
    %c0_39 = arith.constant 0 : index
    %c0_40 = arith.constant 0 : index
    %c256_41 = arith.constant 256 : index
    %57 = vector.load %arg10[%c0_39, %c0_40, %c256_41] : memref<10x16x384xbf16, #tpu.memory_space<vmem>>, vector<1x15x128xbf16>
    tpu.vector_store %arg10[%c0_39, %c0_40, %c256_41], %56 {strides = array<i32>} : memref<10x16x384xbf16, #tpu.memory_space<vmem>>, vector<1x15x128xbf16>,
    %c0_42 = arith.constant 0 : index
    %c15_43 = arith.constant 15 : index
    %c256_44 = arith.constant 256 : index
    %58 = vector.load %arg10[%c0_42, %c15_43, %c256_44] : memref<10x16x384xbf16, #tpu.memory_space<vmem>>, vector<1x1x128xbf16>
    %59 = vector.shape_cast %58 : vector<1x1x128xbf16> to vector<1x128xbf16>
    %60 = vector.shape_cast %49 : vector<1x128xbf16> to vector<1x1x128xbf16>
    tpu.vector_store %arg10[%c0_42, %c15_43, %c256_44], %60 {strides = array<i32>} : memref<10x16x384xbf16, #tpu.memory_space<vmem>>, vector<1x1x128xbf16>,
    %c8_i32_45 = arith.constant 8 : i32
    %61 = arith.addi %1, %c8_i32_45 : i32
    %c16_i32 = arith.constant 16 : i32
    %62 = arith.cmpi slt, %61, %c16_i32 : i32
    %63 = arith.extui %62 : i1 to i32
    %64 = arith.sitofp %63 : i32 to f32
    %c8_i32_46 = arith.constant 8 : i32
    %65 = arith.addi %1, %c8_i32_46 : i32
    %c15_i32 = arith.constant 15 : i32
    %66 = arith.minsi %65, %c15_i32 : i32
    %c0_47 = arith.constant 0 : index
    %67 = arith.index_cast %66 : i32 to index
    %c0_48 = arith.constant 0 : index
    %c0_49 = arith.constant 0 : index
    %68 = vector.load %arg2[%c0_47, %67, %c0_48, %c0_49] : memref<1x16x16x128xf32, #tpu.memory_space<vmem>>, vector<1x1x16x128xf32>
    %69 = vector.shape_cast %68 : vector<1x1x16x128xf32> to vector<1x16x128xf32>
    %70 = vector.shape_cast %69 : vector<1x16x128xf32> to vector<16x128xf32>
    %71 = arith.truncf %70 : vector<16x128xf32> to vector<16x128xbf16>
    %c0_50 = arith.constant 0 : index
    %c0_51 = arith.constant 0 : index
    %72 = vector.load %arg3[%c0_50, %c0_51] : memref<128x128xbf16, #tpu.memory_space<vmem>>, vector<128x128xbf16>
    %cst_52 = arith.constant dense<0.000000e+00> : vector<16x128xf32>
    %73 = tpu.matmul %71, %72, %cst_52 {dimension_numbers = #tpu.dot_dimension_numbers<[1], [0], [0], [1], [0, 0, 1, 1], [], []>} : vector<16x128xbf16>, vector<128x128xbf16>, vector<16x128xf32> -> vector<16x128xf32>
    %c0_53 = arith.constant 0 : index
    %c0_54 = arith.constant 0 : index
    %74 = vector.load %arg4[%c0_53, %c0_54] : memref<1x128xf32, #tpu.memory_space<vmem>>, vector<1x128xf32>
    %75 = vector.broadcast %74 : vector<1x128xf32> to vector<16x128xf32>
    %76 = arith.addf %73, %75 : vector<16x128xf32>
    %cst_55 = arith.constant 0.000000e+00 : f32
    %77 = vector.broadcast %cst_55 : f32 to vector<16x128xf32>
    %78 = arith.maximumf %76, %77 : vector<16x128xf32>
    %79 = vector.shape_cast %78 : vector<16x128xf32> to vector<1x16x128xf32>
    %80 = vector.broadcast %64 : f32 to vector<1x16x128xf32>
    %81 = arith.mulf %79, %80 : vector<1x16x128xf32>
    %82 = arith.truncf %81 : vector<1x16x128xf32> to vector<1x16x128xbf16>
    %cst_56 = arith.constant 0.000000e+00 : bf16
    %83 = vector.broadcast %cst_56 : bf16 to vector<1x128xbf16>
    %c9 = arith.constant 9 : index
    %c0_57 = arith.constant 0 : index
    %c128_58 = arith.constant 128 : index
    %84 = vector.load %arg10[%c9, %c0_57, %c128_58] : memref<10x16x384xbf16, #tpu.memory_space<vmem>>, vector<1x16x128xbf16>
    tpu.vector_store %arg10[%c9, %c0_57, %c128_58], %82 {strides = array<i32>} : memref<10x16x384xbf16, #tpu.memory_space<vmem>>, vector<1x16x128xbf16>,
    %85 = vector.extract_strided_slice %82 {offsets = [0, 0, 0], sizes = [1, 15, 128], strides = [1, 1, 1]} : vector<1x16x128xbf16> to vector<1x15x128xbf16>
    %c9_59 = arith.constant 9 : index
    %c1_60 = arith.constant 1 : index
    %c0_61 = arith.constant 0 : index
    %86 = vector.load %arg10[%c9_59, %c1_60, %c0_61] : memref<10x16x384xbf16, #tpu.memory_space<vmem>>, vector<1x15x128xbf16>
    tpu.vector_store %arg10[%c9_59, %c1_60, %c0_61], %85 {strides = array<i32>} : memref<10x16x384xbf16, #tpu.memory_space<vmem>>, vector<1x15x128xbf16>,
    %c9_62 = arith.constant 9 : index
    %c0_63 = arith.constant 0 : index
    %c0_64 = arith.constant 0 : index
    %87 = vector.load %arg10[%c9_62, %c0_63, %c0_64] : memref<10x16x384xbf16, #tpu.memory_space<vmem>>, vector<1x1x128xbf16>
    %88 = vector.shape_cast %87 : vector<1x1x128xbf16> to vector<1x128xbf16>
    %89 = vector.shape_cast %83 : vector<1x128xbf16> to vector<1x1x128xbf16>
    tpu.vector_store %arg10[%c9_62, %c0_63, %c0_64], %89 {strides = array<i32>} : memref<10x16x384xbf16, #tpu.memory_space<vmem>>, vector<1x1x128xbf16>,
    %90 = vector.extract_strided_slice %82 {offsets = [0, 1, 0], sizes = [1, 15, 128], strides = [1, 1, 1]} : vector<1x16x128xbf16> to vector<1x15x128xbf16>
    %c9_65 = arith.constant 9 : index
    %c0_66 = arith.constant 0 : index
    %c256_67 = arith.constant 256 : index
    %91 = vector.load %arg10[%c9_65, %c0_66, %c256_67] : memref<10x16x384xbf16, #tpu.memory_space<vmem>>, vector<1x15x128xbf16>
    tpu.vector_store %arg10[%c9_65, %c0_66, %c256_67], %90 {strides = array<i32>} : memref<10x16x384xbf16, #tpu.memory_space<vmem>>, vector<1x15x128xbf16>,
    %c9_68 = arith.constant 9 : index
    %c15_69 = arith.constant 15 : index
    %c256_70 = arith.constant 256 : index
    %92 = vector.load %arg10[%c9_68, %c15_69, %c256_70] : memref<10x16x384xbf16, #tpu.memory_space<vmem>>, vector<1x1x128xbf16>
    %93 = vector.shape_cast %92 : vector<1x1x128xbf16> to vector<1x128xbf16>
    %94 = vector.shape_cast %83 : vector<1x128xbf16> to vector<1x1x128xbf16>
    tpu.vector_store %arg10[%c9_68, %c15_69, %c256_70], %94 {strides = array<i32>} : memref<10x16x384xbf16, #tpu.memory_space<vmem>>, vector<1x1x128xbf16>,
    %c0_71 = arith.constant 0 : index
    %c0_72 = arith.constant 0 : index
    %c0_73 = arith.constant 0 : index
    %95 = vector.load %arg10[%c0_71, %c0_72, %c0_73] : memref<10x16x384xbf16, #tpu.memory_space<vmem>>, vector<8x16x384xbf16>
    %96 = vector.shape_cast %95 : vector<8x16x384xbf16> to vector<128x384xbf16>
    %c0_74 = arith.constant 0 : index
    %c0_75 = arith.constant 0 : index
    %c0_76 = arith.constant 0 : index
    %97 = vector.load %arg5[%c0_74, %c0_75, %c0_76] : memref<3x384x128xbf16, #tpu.memory_space<vmem>>, vector<1x384x128xbf16>
    %98 = vector.shape_cast %97 : vector<1x384x128xbf16> to vector<384x128xbf16>
    %cst_77 = arith.constant dense<0.000000e+00> : vector<128x128xf32>
    %99 = tpu.matmul %96, %98, %cst_77 {dimension_numbers = #tpu.dot_dimension_numbers<[1], [0], [0], [1], [0, 0, 1, 1], [], []>} : vector<128x384xbf16>, vector<384x128xbf16>, vector<128x128xf32> -> vector<128x128xf32>
    %c1_78 = arith.constant 1 : index
    %c0_79 = arith.constant 0 : index
    %c0_80 = arith.constant 0 : index
    %100 = vector.load %arg10[%c1_78, %c0_79, %c0_80] : memref<10x16x384xbf16, #tpu.memory_space<vmem>>, vector<8x16x384xbf16>
    %101 = vector.shape_cast %100 : vector<8x16x384xbf16> to vector<128x384xbf16>
    %c1_81 = arith.constant 1 : index
    %c0_82 = arith.constant 0 : index
    %c0_83 = arith.constant 0 : index
    %102 = vector.load %arg5[%c1_81, %c0_82, %c0_83] : memref<3x384x128xbf16, #tpu.memory_space<vmem>>, vector<1x384x128xbf16>
    %103 = vector.shape_cast %102 : vector<1x384x128xbf16> to vector<384x128xbf16>
    %cst_84 = arith.constant dense<0.000000e+00> : vector<128x128xf32>
    %104 = tpu.matmul %101, %103, %cst_84 {dimension_numbers = #tpu.dot_dimension_numbers<[1], [0], [0], [1], [0, 0, 1, 1], [], []>} : vector<128x384xbf16>, vector<384x128xbf16>, vector<128x128xf32> -> vector<128x128xf32>
    %105 = arith.addf %99, %104 : vector<128x128xf32>
    %c2 = arith.constant 2 : index
    %c0_85 = arith.constant 0 : index
    %c0_86 = arith.constant 0 : index
    %106 = vector.load %arg10[%c2, %c0_85, %c0_86] : memref<10x16x384xbf16, #tpu.memory_space<vmem>>, vector<8x16x384xbf16>
    %107 = vector.shape_cast %106 : vector<8x16x384xbf16> to vector<128x384xbf16>
    %c2_87 = arith.constant 2 : index
    %c0_88 = arith.constant 0 : index
    %c0_89 = arith.constant 0 : index
    %108 = vector.load %arg5[%c2_87, %c0_88, %c0_89] : memref<3x384x128xbf16, #tpu.memory_space<vmem>>, vector<1x384x128xbf16>
    %109 = vector.shape_cast %108 : vector<1x384x128xbf16> to vector<384x128xbf16>
    %cst_90 = arith.constant dense<0.000000e+00> : vector<128x128xf32>
    %110 = tpu.matmul %107, %109, %cst_90 {dimension_numbers = #tpu.dot_dimension_numbers<[1], [0], [0], [1], [0, 0, 1, 1], [], []>} : vector<128x384xbf16>, vector<384x128xbf16>, vector<128x128xf32> -> vector<128x128xf32>
    %111 = arith.addf %105, %110 : vector<128x128xf32>
    %c0_91 = arith.constant 0 : index
    %c0_92 = arith.constant 0 : index
    %112 = vector.load %arg6[%c0_91, %c0_92] : memref<1x128xf32, #tpu.memory_space<vmem>>, vector<1x128xf32>
    %113 = vector.broadcast %112 : vector<1x128xf32> to vector<128x128xf32>
    %114 = arith.addf %111, %113 : vector<128x128xf32>
    %cst_93 = arith.constant 0.000000e+00 : f32
    %115 = vector.broadcast %cst_93 : f32 to vector<128x128xf32>
    %116 = arith.maximumf %114, %115 : vector<128x128xf32>
    %117 = arith.truncf %116 : vector<128x128xf32> to vector<128x128xbf16>
    %c0_94 = arith.constant 0 : index
    %c0_95 = arith.constant 0 : index
    %118 = vector.load %arg7[%c0_94, %c0_95] : memref<128x128xbf16, #tpu.memory_space<vmem>>, vector<128x128xbf16>
    %cst_96 = arith.constant dense<0.000000e+00> : vector<128x128xf32>
    %119 = tpu.matmul %117, %118, %cst_96 {dimension_numbers = #tpu.dot_dimension_numbers<[1], [0], [0], [1], [0, 0, 1, 1], [], []>} : vector<128x128xbf16>, vector<128x128xbf16>, vector<128x128xf32> -> vector<128x128xf32>
    %c0_97 = arith.constant 0 : index
    %c0_98 = arith.constant 0 : index
    %120 = vector.load %arg8[%c0_97, %c0_98] : memref<1x128xf32, #tpu.memory_space<vmem>>, vector<1x128xf32>
    %121 = vector.broadcast %120 : vector<1x128xf32> to vector<128x128xf32>
    %122 = arith.addf %119, %121 : vector<128x128xf32>
    %c0_99 = arith.constant 0 : index
    %123 = arith.index_cast %1 : i32 to index
    %c0_100 = arith.constant 0 : index
    %c0_101 = arith.constant 0 : index
    %124 = vector.load %arg2[%c0_99, %123, %c0_100, %c0_101] : memref<1x16x16x128xf32, #tpu.memory_space<vmem>>, vector<1x8x16x128xf32>
    %125 = vector.shape_cast %124 : vector<1x8x16x128xf32> to vector<8x16x128xf32>
    %126 = vector.shape_cast %125 : vector<8x16x128xf32> to vector<128x128xf32>
    %127 = arith.addf %122, %126 : vector<128x128xf32>
    %cst_102 = arith.constant 0.000000e+00 : f32
    %128 = vector.broadcast %cst_102 : f32 to vector<128x128xf32>
    %129 = arith.maximumf %127, %128 : vector<128x128xf32>
    %130 = vector.shape_cast %129 : vector<128x128xf32> to vector<8x16x128xf32>
    %c0_103 = arith.constant 0 : index
    %c0_104 = arith.constant 0 : index
    %c0_105 = arith.constant 0 : index
    %c0_106 = arith.constant 0 : index
    %131 = vector.load %arg9[%c0_103, %c0_104, %c0_105, %c0_106] : memref<1x8x16x128xf32, #tpu.memory_space<vmem>>, vector<1x8x16x128xf32>
    %132 = vector.shape_cast %131 : vector<1x8x16x128xf32> to vector<8x16x128xf32>
    %133 = vector.shape_cast %130 : vector<8x16x128xf32> to vector<1x8x16x128xf32>
    tpu.vector_store %arg9[%c0_103, %c0_104, %c0_105, %c0_106], %133 {strides = array<i32>} : memref<1x8x16x128xf32, #tpu.memory_space<vmem>>, vector<1x8x16x128xf32>,
    return
  }
  func.func @transform_0(%arg0: i32, %arg1: i32) -> (i32, i32, i32, i32) {
    %c0_i32 = arith.constant 0 : i32
    %c0_i32_0 = arith.constant 0 : i32
    %c0_i32_1 = arith.constant 0 : i32
    %c0_i32_2 = arith.constant 0 : i32
    return %arg0, %c0_i32, %c0_i32_0, %c0_i32_1 : i32, i32, i32, i32
  }
  func.func @transform_1(%arg0: i32, %arg1: i32) -> (i32, i32) {
    %c0_i32 = arith.constant 0 : i32
    %c0_i32_0 = arith.constant 0 : i32
    %c0_i32_1 = arith.constant 0 : i32
    return %c0_i32, %c0_i32_0 : i32, i32
  }
  func.func @transform_2(%arg0: i32, %arg1: i32) -> (i32, i32) {
    %c0_i32 = arith.constant 0 : i32
    %c0_i32_0 = arith.constant 0 : i32
    %c0_i32_1 = arith.constant 0 : i32
    return %c0_i32, %c0_i32_0 : i32, i32
  }
  func.func @transform_3(%arg0: i32, %arg1: i32) -> (i32, i32, i32) {
    %c0_i32 = arith.constant 0 : i32
    %c0_i32_0 = arith.constant 0 : i32
    %c0_i32_1 = arith.constant 0 : i32
    %c0_i32_2 = arith.constant 0 : i32
    return %c0_i32, %c0_i32_0, %c0_i32_1 : i32, i32, i32
  }
  func.func @transform_4(%arg0: i32, %arg1: i32) -> (i32, i32) {
    %c0_i32 = arith.constant 0 : i32
    %c0_i32_0 = arith.constant 0 : i32
    %c0_i32_1 = arith.constant 0 : i32
    return %c0_i32, %c0_i32_0 : i32, i32
  }
  func.func @transform_5(%arg0: i32, %arg1: i32) -> (i32, i32) {
    %c0_i32 = arith.constant 0 : i32
    %c0_i32_0 = arith.constant 0 : i32
    %c0_i32_1 = arith.constant 0 : i32
    return %c0_i32, %c0_i32_0 : i32, i32
  }
  func.func @transform_6(%arg0: i32, %arg1: i32) -> (i32, i32) {
    %c0_i32 = arith.constant 0 : i32
    %c0_i32_0 = arith.constant 0 : i32
    %c0_i32_1 = arith.constant 0 : i32
    return %c0_i32, %c0_i32_0 : i32, i32
  }
  func.func @transform_7(%arg0: i32, %arg1: i32) -> (i32, i32, i32, i32) {
    %c0_i32 = arith.constant 0 : i32
    %c0_i32_0 = arith.constant 0 : i32
    %c0_i32_1 = arith.constant 0 : i32
    return %arg0, %arg1, %c0_i32, %c0_i32_0 : i32, i32, i32, i32
  }
}

module attributes {stable_mosaic.version = 11 : i64} {
  func.func @bottleneck_kernel(%arg0: i32, %arg1: i32, %arg2: memref<1x16x16x128xf32, #tpu.memory_space<vmem>>, %arg3: memref<128x128xbf16, #tpu.memory_space<vmem>>, %arg4: memref<1x128xf32, #tpu.memory_space<vmem>>, %arg5: memref<3x384x128xbf16, #tpu.memory_space<vmem>>, %arg6: memref<1x128xf32, #tpu.memory_space<vmem>>, %arg7: memref<128x128xbf16, #tpu.memory_space<vmem>>, %arg8: memref<1x128xf32, #tpu.memory_space<vmem>>, %arg9: memref<1x8x16x128xf32, #tpu.memory_space<vmem>>, %arg10: memref<10x16x384xbf16, #tpu.memory_space<vmem>>) attributes {dimension_semantics = [#tpu.dimension_semantics<parallel>, #tpu.dimension_semantics<parallel>], iteration_bounds = array<i64: 2, 2>, scalar_prefetch = 0 : i64, scratch_operands = 1 : i64, tpu.core_type = #tpu.core_type<tc>, window_params = [{transform_indices = @transform_0, window_bounds = array<i64: 1, 16, 16, 128>}, {pipeline_mode = #tpu.pipeline_mode<synchronous>, transform_indices = @transform_1, window_bounds = array<i64: 128, 128>}, {pipeline_mode = #tpu.pipeline_mode<synchronous>, transform_indices = @transform_2, window_bounds = array<i64: 1, 128>}, {pipeline_mode = #tpu.pipeline_mode<synchronous>, transform_indices = @transform_3, window_bounds = array<i64: 3, 384, 128>}, {pipeline_mode = #tpu.pipeline_mode<synchronous>, transform_indices = @transform_4, window_bounds = array<i64: 1, 128>}, {pipeline_mode = #tpu.pipeline_mode<synchronous>, transform_indices = @transform_5, window_bounds = array<i64: 128, 128>}, {pipeline_mode = #tpu.pipeline_mode<synchronous>, transform_indices = @transform_6, window_bounds = array<i64: 1, 128>}, {transform_indices = @transform_7, window_bounds = array<i64: 1, 8, 16, 128>}]} {
    %c8_i32 = arith.constant 8 : i32
    %0 = arith.muli %arg1, %c8_i32 : i32
    %1 = tpu.assume_multiple %0, 8 : i32
    %c0 = arith.constant 0 : index
    %2 = arith.index_cast %1 : i32 to index
    %c0_0 = arith.constant 0 : index
    %c0_1 = arith.constant 0 : index
    %3 = vector.load %arg2[%c0, %2, %c0_0, %c0_1] : memref<1x16x16x128xf32, #tpu.memory_space<vmem>>, vector<1x8x16x128xf32>
    %4 = vector.shape_cast %3 : vector<1x8x16x128xf32> to vector<8x16x128xf32>
    %5 = vector.shape_cast %4 : vector<8x16x128xf32> to vector<128x128xf32>
    %6 = arith.truncf %5 : vector<128x128xf32> to vector<128x128xbf16>
    %c0_2 = arith.constant 0 : index
    %c0_3 = arith.constant 0 : index
    %7 = vector.load %arg3[%c0_2, %c0_3] : memref<128x128xbf16, #tpu.memory_space<vmem>>, vector<128x128xbf16>
    %cst = arith.constant dense<0.000000e+00> : vector<128x128xf32>
    %8 = tpu.matmul %6, %7, %cst {dimension_numbers = #tpu.dot_dimension_numbers<[1], [0], [0], [1], [0, 0, 1, 1], [], []>} : vector<128x128xbf16>, vector<128x128xbf16>, vector<128x128xf32> -> vector<128x128xf32>
    %c0_4 = arith.constant 0 : index
    %c0_5 = arith.constant 0 : index
    %9 = vector.load %arg4[%c0_4, %c0_5] : memref<1x128xf32, #tpu.memory_space<vmem>>, vector<1x128xf32>
    %10 = vector.broadcast %9 : vector<1x128xf32> to vector<128x128xf32>
    %11 = arith.addf %8, %10 : vector<128x128xf32>
    %cst_6 = arith.constant 0.000000e+00 : f32
    %12 = vector.broadcast %cst_6 : f32 to vector<128x128xf32>
    %13 = arith.maximumf %11, %12 : vector<128x128xf32>
    %14 = vector.shape_cast %13 : vector<128x128xf32> to vector<8x16x128xf32>
    %15 = arith.truncf %14 : vector<8x16x128xf32> to vector<8x16x128xbf16>
    %cst_7 = arith.constant 0.000000e+00 : bf16
    %16 = vector.broadcast %cst_7 : bf16 to vector<8x128xbf16>
    %c1 = arith.constant 1 : index
    %c0_8 = arith.constant 0 : index
    %c128 = arith.constant 128 : index
    %17 = vector.load %arg10[%c1, %c0_8, %c128] : memref<10x16x384xbf16, #tpu.memory_space<vmem>>, vector<8x16x128xbf16>
    tpu.vector_store %arg10[%c1, %c0_8, %c128], %15 {strides = array<i32>} : memref<10x16x384xbf16, #tpu.memory_space<vmem>>, vector<8x16x128xbf16>,
    %18 = vector.extract_strided_slice %15 {offsets = [0, 0, 0], sizes = [8, 15, 128], strides = [1, 1, 1]} : vector<8x16x128xbf16> to vector<8x15x128xbf16>
    %c1_9 = arith.constant 1 : index
    %c1_10 = arith.constant 1 : index
    %c0_11 = arith.constant 0 : index
    %19 = vector.load %arg10[%c1_9, %c1_10, %c0_11] : memref<10x16x384xbf16, #tpu.memory_space<vmem>>, vector<8x15x128xbf16>
    tpu.vector_store %arg10[%c1_9, %c1_10, %c0_11], %18 {strides = array<i32>} : memref<10x16x384xbf16, #tpu.memory_space<vmem>>, vector<8x15x128xbf16>,
    %c1_12 = arith.constant 1 : index
    %c0_13 = arith.constant 0 : index
    %c0_14 = arith.constant 0 : index
    %20 = vector.load %arg10[%c1_12, %c0_13, %c0_14] : memref<10x16x384xbf16, #tpu.memory_space<vmem>>, vector<8x1x128xbf16>
    %21 = vector.shape_cast %20 : vector<8x1x128xbf16> to vector<8x128xbf16>
    %22 = vector.shape_cast %16 : vector<8x128xbf16> to vector<8x1x128xbf16>
    tpu.vector_store %arg10[%c1_12, %c0_13, %c0_14], %22 {strides = array<i32>} : memref<10x16x384xbf16, #tpu.memory_space<vmem>>, vector<8x1x128xbf16>,
    %23 = vector.extract_strided_slice %15 {offsets = [0, 1, 0], sizes = [8, 15, 128], strides = [1, 1, 1]} : vector<8x16x128xbf16> to vector<8x15x128xbf16>
    %c1_15 = arith.constant 1 : index
    %c0_16 = arith.constant 0 : index
    %c256 = arith.constant 256 : index
    %24 = vector.load %arg10[%c1_15, %c0_16, %c256] : memref<10x16x384xbf16, #tpu.memory_space<vmem>>, vector<8x15x128xbf16>
    tpu.vector_store %arg10[%c1_15, %c0_16, %c256], %23 {strides = array<i32>} : memref<10x16x384xbf16, #tpu.memory_space<vmem>>, vector<8x15x128xbf16>,
    %c1_17 = arith.constant 1 : index
    %c15 = arith.constant 15 : index
    %c256_18 = arith.constant 256 : index
    %25 = vector.load %arg10[%c1_17, %c15, %c256_18] : memref<10x16x384xbf16, #tpu.memory_space<vmem>>, vector<8x1x128xbf16>
    %26 = vector.shape_cast %25 : vector<8x1x128xbf16> to vector<8x128xbf16>
    %27 = vector.shape_cast %16 : vector<8x128xbf16> to vector<8x1x128xbf16>
    tpu.vector_store %arg10[%c1_17, %c15, %c256_18], %27 {strides = array<i32>} : memref<10x16x384xbf16, #tpu.memory_space<vmem>>, vector<8x1x128xbf16>,
    %c0_i32 = arith.constant 0 : i32
    %28 = arith.cmpi sgt, %arg1, %c0_i32 : i32
    %29 = arith.extui %28 : i1 to i32
    %30 = arith.sitofp %29 : i32 to f32
    %c1_i32 = arith.constant 1 : i32
    %31 = arith.subi %1, %c1_i32 : i32
    %c0_i32_19 = arith.constant 0 : i32
    %32 = arith.maxsi %31, %c0_i32_19 : i32
    %c0_20 = arith.constant 0 : index
    %33 = arith.index_cast %32 : i32 to index
    %c0_21 = arith.constant 0 : index
    %c0_22 = arith.constant 0 : index
    %34 = vector.load %arg2[%c0_20, %33, %c0_21, %c0_22] : memref<1x16x16x128xf32, #tpu.memory_space<vmem>>, vector<1x1x16x128xf32>
    %35 = vector.shape_cast %34 : vector<1x1x16x128xf32> to vector<1x16x128xf32>
    %36 = vector.shape_cast %35 : vector<1x16x128xf32> to vector<16x128xf32>
    %37 = arith.truncf %36 : vector<16x128xf32> to vector<16x128xbf16>
    %c0_23 = arith.constant 0 : index
    %c0_24 = arith.constant 0 : index
    %38 = vector.load %arg3[%c0_23, %c0_24] : memref<128x128xbf16, #tpu.memory_space<vmem>>, vector<128x128xbf16>
    %cst_25 = arith.constant dense<0.000000e+00> : vector<16x128xf32>
    %39 = tpu.matmul %37, %38, %cst_25 {dimension_numbers = #tpu.dot_dimension_numbers<[1], [0], [0], [1], [0, 0, 1, 1], [], []>} : vector<16x128xbf16>, vector<128x128xbf16>, vector<16x128xf32> -> vector<16x128xf32>
    %c0_26 = arith.constant 0 : index
    %c0_27 = arith.constant 0 : index
    %40 = vector.load %arg4[%c0_26, %c0_27] : memref<1x128xf32, #tpu.memory_space<vmem>>, vector<1x128xf32>
    %41 = vector.broadcast %40 : vector<1x128xf32> to vector<16x128xf32>
    %42 = arith.addf %39, %41 : vector<16x128xf32>
    %cst_28 = arith.constant 0.000000e+00 : f32
    %43 = vector.broadcast %cst_28 : f32 to vector<16x128xf32>
    %44 = arith.maximumf %42, %43 : vector<16x128xf32>
    %45 = vector.shape_cast %44 : vector<16x128xf32> to vector<1x16x128xf32>
    %46 = vector.broadcast %30 : f32 to vector<1x16x128xf32>
    %47 = arith.mulf %45, %46 : vector<1x16x128xf32>
    %48 = arith.truncf %47 : vector<1x16x128xf32> to vector<1x16x128xbf16>
    %cst_29 = arith.constant 0.000000e+00 : bf16
    %49 = vector.broadcast %cst_29 : bf16 to vector<1x128xbf16>
    %c0_30 = arith.constant 0 : index
    %c0_31 = arith.constant 0 : index
    %c128_32 = arith.constant 128 : index
    %50 = vector.load %arg10[%c0_30, %c0_31, %c128_32] : memref<10x16x384xbf16, #tpu.memory_space<vmem>>, vector<1x16x128xbf16>
    tpu.vector_store %arg10[%c0_30, %c0_31, %c128_32], %48 {strides = array<i32>} : memref<10x16x384xbf16, #tpu.memory_space<vmem>>, vector<1x16x128xbf16>,
    %51 = vector.extract_strided_slice %48 {offsets = [0, 0, 0], sizes = [1, 15, 128], strides = [1, 1, 1]} : vector<1x16x128xbf16> to vector<1x15x128xbf16>
    %c0_33 = arith.constant 0 : index
    %c1_34 = arith.constant 1 : index
    %c0_35 = arith.constant 0 : index
    %52 = vector.load %arg10[%c0_33, %c1_34, %c0_35] : memref<10x16x384xbf16, #tpu.memory_space<vmem>>, vector<1x15x128xbf16>
    tpu.vector_store %arg10[%c0_33, %c1_34, %c0_35], %51 {strides = array<i32>} : memref<10x16x384xbf16, #tpu.memory_space<vmem>>, vector<1x15x128xbf16>,
    %c0_36 = arith.constant 0 : index
    %c0_37 = arith.constant 0 : index
    %c0_38 = arith.constant 0 : index
    %53 = vector.load %arg10[%c0_36, %c0_37, %c0_38] : memref<10x16x384xbf16, #tpu.memory_space<vmem>>, vector<1x1x128xbf16>
    %54 = vector.shape_cast %53 : vector<1x1x128xbf16> to vector<1x128xbf16>
    %55 = vector.shape_cast %49 : vector<1x128xbf16> to vector<1x1x128xbf16>
    tpu.vector_store %arg10[%c0_36, %c0_37, %c0_38], %55 {strides = array<i32>} : memref<10x16x384xbf16, #tpu.memory_space<vmem>>, vector<1x1x128xbf16>,
    %56 = vector.extract_strided_slice %48 {offsets = [0, 1, 0], sizes = [1, 15, 128], strides = [1, 1, 1]} : vector<1x16x128xbf16> to vector<1x15x128xbf16>
    %c0_39 = arith.constant 0 : index
    %c0_40 = arith.constant 0 : index
    %c256_41 = arith.constant 256 : index
    %57 = vector.load %arg10[%c0_39, %c0_40, %c256_41] : memref<10x16x384xbf16, #tpu.memory_space<vmem>>, vector<1x15x128xbf16>
    tpu.vector_store %arg10[%c0_39, %c0_40, %c256_41], %56 {strides = array<i32>} : memref<10x16x384xbf16, #tpu.memory_space<vmem>>, vector<1x15x128xbf16>,
    %c0_42 = arith.constant 0 : index
    %c15_43 = arith.constant 15 : index
    %c256_44 = arith.constant 256 : index
    %58 = vector.load %arg10[%c0_42, %c15_43, %c256_44] : memref<10x16x384xbf16, #tpu.memory_space<vmem>>, vector<1x1x128xbf16>
    %59 = vector.shape_cast %58 : vector<1x1x128xbf16> to vector<1x128xbf16>
    %60 = vector.shape_cast %49 : vector<1x128xbf16> to vector<1x1x128xbf16>
    tpu.vector_store %arg10[%c0_42, %c15_43, %c256_44], %60 {strides = array<i32>} : memref<10x16x384xbf16, #tpu.memory_space<vmem>>, vector<1x1x128xbf16>,
    %c8_i32_45 = arith.constant 8 : i32
    %61 = arith.addi %1, %c8_i32_45 : i32
    %c16_i32 = arith.constant 16 : i32
    %62 = arith.cmpi slt, %61, %c16_i32 : i32
    %63 = arith.extui %62 : i1 to i32
    %64 = arith.sitofp %63 : i32 to f32
    %c8_i32_46 = arith.constant 8 : i32
    %65 = arith.addi %1, %c8_i32_46 : i32
    %c15_i32 = arith.constant 15 : i32
    %66 = arith.minsi %65, %c15_i32 : i32
    %c0_47 = arith.constant 0 : index
    %67 = arith.index_cast %66 : i32 to index
    %c0_48 = arith.constant 0 : index
    %c0_49 = arith.constant 0 : index
    %68 = vector.load %arg2[%c0_47, %67, %c0_48, %c0_49] : memref<1x16x16x128xf32, #tpu.memory_space<vmem>>, vector<1x1x16x128xf32>
    %69 = vector.shape_cast %68 : vector<1x1x16x128xf32> to vector<1x16x128xf32>
    %70 = vector.shape_cast %69 : vector<1x16x128xf32> to vector<16x128xf32>
    %71 = arith.truncf %70 : vector<16x128xf32> to vector<16x128xbf16>
    %c0_50 = arith.constant 0 : index
    %c0_51 = arith.constant 0 : index
    %72 = vector.load %arg3[%c0_50, %c0_51] : memref<128x128xbf16, #tpu.memory_space<vmem>>, vector<128x128xbf16>
    %cst_52 = arith.constant dense<0.000000e+00> : vector<16x128xf32>
    %73 = tpu.matmul %71, %72, %cst_52 {dimension_numbers = #tpu.dot_dimension_numbers<[1], [0], [0], [1], [0, 0, 1, 1], [], []>} : vector<16x128xbf16>, vector<128x128xbf16>, vector<16x128xf32> -> vector<16x128xf32>
    %c0_53 = arith.constant 0 : index
    %c0_54 = arith.constant 0 : index
    %74 = vector.load %arg4[%c0_53, %c0_54] : memref<1x128xf32, #tpu.memory_space<vmem>>, vector<1x128xf32>
    %75 = vector.broadcast %74 : vector<1x128xf32> to vector<16x128xf32>
    %76 = arith.addf %73, %75 : vector<16x128xf32>
    %cst_55 = arith.constant 0.000000e+00 : f32
    %77 = vector.broadcast %cst_55 : f32 to vector<16x128xf32>
    %78 = arith.maximumf %76, %77 : vector<16x128xf32>
    %79 = vector.shape_cast %78 : vector<16x128xf32> to vector<1x16x128xf32>
    %80 = vector.broadcast %64 : f32 to vector<1x16x128xf32>
    %81 = arith.mulf %79, %80 : vector<1x16x128xf32>
    %82 = arith.truncf %81 : vector<1x16x128xf32> to vector<1x16x128xbf16>
    %cst_56 = arith.constant 0.000000e+00 : bf16
    %83 = vector.broadcast %cst_56 : bf16 to vector<1x128xbf16>
    %c9 = arith.constant 9 : index
    %c0_57 = arith.constant 0 : index
    %c128_58 = arith.constant 128 : index
    %84 = vector.load %arg10[%c9, %c0_57, %c128_58] : memref<10x16x384xbf16, #tpu.memory_space<vmem>>, vector<1x16x128xbf16>
    tpu.vector_store %arg10[%c9, %c0_57, %c128_58], %82 {strides = array<i32>} : memref<10x16x384xbf16, #tpu.memory_space<vmem>>, vector<1x16x128xbf16>,
    %85 = vector.extract_strided_slice %82 {offsets = [0, 0, 0], sizes = [1, 15, 128], strides = [1, 1, 1]} : vector<1x16x128xbf16> to vector<1x15x128xbf16>
    %c9_59 = arith.constant 9 : index
    %c1_60 = arith.constant 1 : index
    %c0_61 = arith.constant 0 : index
    %86 = vector.load %arg10[%c9_59, %c1_60, %c0_61] : memref<10x16x384xbf16, #tpu.memory_space<vmem>>, vector<1x15x128xbf16>
    tpu.vector_store %arg10[%c9_59, %c1_60, %c0_61], %85 {strides = array<i32>} : memref<10x16x384xbf16, #tpu.memory_space<vmem>>, vector<1x15x128xbf16>,
    %c9_62 = arith.constant 9 : index
    %c0_63 = arith.constant 0 : index
    %c0_64 = arith.constant 0 : index
    %87 = vector.load %arg10[%c9_62, %c0_63, %c0_64] : memref<10x16x384xbf16, #tpu.memory_space<vmem>>, vector<1x1x128xbf16>
    %88 = vector.shape_cast %87 : vector<1x1x128xbf16> to vector<1x128xbf16>
    %89 = vector.shape_cast %83 : vector<1x128xbf16> to vector<1x1x128xbf16>
    tpu.vector_store %arg10[%c9_62, %c0_63, %c0_64], %89 {strides = array<i32>} : memref<10x16x384xbf16, #tpu.memory_space<vmem>>, vector<1x1x128xbf16>,
    %90 = vector.extract_strided_slice %82 {offsets = [0, 1, 0], sizes = [1, 15, 128], strides = [1, 1, 1]} : vector<1x16x128xbf16> to vector<1x15x128xbf16>
    %c9_65 = arith.constant 9 : index
    %c0_66 = arith.constant 0 : index
    %c256_67 = arith.constant 256 : index
    %91 = vector.load %arg10[%c9_65, %c0_66, %c256_67] : memref<10x16x384xbf16, #tpu.memory_space<vmem>>, vector<1x15x128xbf16>
    tpu.vector_store %arg10[%c9_65, %c0_66, %c256_67], %90 {strides = array<i32>} : memref<10x16x384xbf16, #tpu.memory_space<vmem>>, vector<1x15x128xbf16>,
    %c9_68 = arith.constant 9 : index
    %c15_69 = arith.constant 15 : index
    %c256_70 = arith.constant 256 : index
    %92 = vector.load %arg10[%c9_68, %c15_69, %c256_70] : memref<10x16x384xbf16, #tpu.memory_space<vmem>>, vector<1x1x128xbf16>
    %93 = vector.shape_cast %92 : vector<1x1x128xbf16> to vector<1x128xbf16>
    %94 = vector.shape_cast %83 : vector<1x128xbf16> to vector<1x1x128xbf16>
    tpu.vector_store %arg10[%c9_68, %c15_69, %c256_70], %94 {strides = array<i32>} : memref<10x16x384xbf16, #tpu.memory_space<vmem>>, vector<1x1x128xbf16>,
    %c0_71 = arith.constant 0 : index
    %c0_72 = arith.constant 0 : index
    %c0_73 = arith.constant 0 : index
    %95 = vector.load %arg10[%c0_71, %c0_72, %c0_73] : memref<10x16x384xbf16, #tpu.memory_space<vmem>>, vector<8x16x384xbf16>
    %96 = vector.shape_cast %95 : vector<8x16x384xbf16> to vector<128x384xbf16>
    %c0_74 = arith.constant 0 : index
    %c0_75 = arith.constant 0 : index
    %c0_76 = arith.constant 0 : index
    %97 = vector.load %arg5[%c0_74, %c0_75, %c0_76] : memref<3x384x128xbf16, #tpu.memory_space<vmem>>, vector<1x384x128xbf16>
    %98 = vector.shape_cast %97 : vector<1x384x128xbf16> to vector<384x128xbf16>
    %cst_77 = arith.constant dense<0.000000e+00> : vector<128x128xf32>
    %99 = tpu.matmul %96, %98, %cst_77 {dimension_numbers = #tpu.dot_dimension_numbers<[1], [0], [0], [1], [0, 0, 1, 1], [], []>} : vector<128x384xbf16>, vector<384x128xbf16>, vector<128x128xf32> -> vector<128x128xf32>
    %c1_78 = arith.constant 1 : index
    %c0_79 = arith.constant 0 : index
    %c0_80 = arith.constant 0 : index
    %100 = vector.load %arg10[%c1_78, %c0_79, %c0_80] : memref<10x16x384xbf16, #tpu.memory_space<vmem>>, vector<8x16x384xbf16>
    %101 = vector.shape_cast %100 : vector<8x16x384xbf16> to vector<128x384xbf16>
    %c1_81 = arith.constant 1 : index
    %c0_82 = arith.constant 0 : index
    %c0_83 = arith.constant 0 : index
    %102 = vector.load %arg5[%c1_81, %c0_82, %c0_83] : memref<3x384x128xbf16, #tpu.memory_space<vmem>>, vector<1x384x128xbf16>
    %103 = vector.shape_cast %102 : vector<1x384x128xbf16> to vector<384x128xbf16>
    %cst_84 = arith.constant dense<0.000000e+00> : vector<128x128xf32>
    %104 = tpu.matmul %101, %103, %cst_84 {dimension_numbers = #tpu.dot_dimension_numbers<[1], [0], [0], [1], [0, 0, 1, 1], [], []>} : vector<128x384xbf16>, vector<384x128xbf16>, vector<128x128xf32> -> vector<128x128xf32>
    %105 = arith.addf %99, %104 : vector<128x128xf32>
    %c2 = arith.constant 2 : index
    %c0_85 = arith.constant 0 : index
    %c0_86 = arith.constant 0 : index
    %106 = vector.load %arg10[%c2, %c0_85, %c0_86] : memref<10x16x384xbf16, #tpu.memory_space<vmem>>, vector<8x16x384xbf16>
    %107 = vector.shape_cast %106 : vector<8x16x384xbf16> to vector<128x384xbf16>
    %c2_87 = arith.constant 2 : index
    %c0_88 = arith.constant 0 : index
    %c0_89 = arith.constant 0 : index
    %108 = vector.load %arg5[%c2_87, %c0_88, %c0_89] : memref<3x384x128xbf16, #tpu.memory_space<vmem>>, vector<1x384x128xbf16>
    %109 = vector.shape_cast %108 : vector<1x384x128xbf16> to vector<384x128xbf16>
    %cst_90 = arith.constant dense<0.000000e+00> : vector<128x128xf32>
    %110 = tpu.matmul %107, %109, %cst_90 {dimension_numbers = #tpu.dot_dimension_numbers<[1], [0], [0], [1], [0, 0, 1, 1], [], []>} : vector<128x384xbf16>, vector<384x128xbf16>, vector<128x128xf32> -> vector<128x128xf32>
    %111 = arith.addf %105, %110 : vector<128x128xf32>
    %c0_91 = arith.constant 0 : index
    %c0_92 = arith.constant 0 : index
    %112 = vector.load %arg6[%c0_91, %c0_92] : memref<1x128xf32, #tpu.memory_space<vmem>>, vector<1x128xf32>
    %113 = vector.broadcast %112 : vector<1x128xf32> to vector<128x128xf32>
    %114 = arith.addf %111, %113 : vector<128x128xf32>
    %cst_93 = arith.constant 0.000000e+00 : f32
    %115 = vector.broadcast %cst_93 : f32 to vector<128x128xf32>
    %116 = arith.maximumf %114, %115 : vector<128x128xf32>
    %117 = arith.truncf %116 : vector<128x128xf32> to vector<128x128xbf16>
    %c0_94 = arith.constant 0 : index
    %c0_95 = arith.constant 0 : index
    %118 = vector.load %arg7[%c0_94, %c0_95] : memref<128x128xbf16, #tpu.memory_space<vmem>>, vector<128x128xbf16>
    %cst_96 = arith.constant dense<0.000000e+00> : vector<128x128xf32>
    %119 = tpu.matmul %117, %118, %cst_96 {dimension_numbers = #tpu.dot_dimension_numbers<[1], [0], [0], [1], [0, 0, 1, 1], [], []>} : vector<128x128xbf16>, vector<128x128xbf16>, vector<128x128xf32> -> vector<128x128xf32>
    %c0_97 = arith.constant 0 : index
    %c0_98 = arith.constant 0 : index
    %120 = vector.load %arg8[%c0_97, %c0_98] : memref<1x128xf32, #tpu.memory_space<vmem>>, vector<1x128xf32>
    %121 = vector.broadcast %120 : vector<1x128xf32> to vector<128x128xf32>
    %122 = arith.addf %119, %121 : vector<128x128xf32>
    %c0_99 = arith.constant 0 : index
    %123 = arith.index_cast %1 : i32 to index
    %c0_100 = arith.constant 0 : index
    %c0_101 = arith.constant 0 : index
    %124 = vector.load %arg2[%c0_99, %123, %c0_100, %c0_101] : memref<1x16x16x128xf32, #tpu.memory_space<vmem>>, vector<1x8x16x128xf32>
    %125 = vector.shape_cast %124 : vector<1x8x16x128xf32> to vector<8x16x128xf32>
    %126 = vector.shape_cast %125 : vector<8x16x128xf32> to vector<128x128xf32>
    %127 = arith.addf %122, %126 : vector<128x128xf32>
    %cst_102 = arith.constant 0.000000e+00 : f32
    %128 = vector.broadcast %cst_102 : f32 to vector<128x128xf32>
    %129 = arith.maximumf %127, %128 : vector<128x128xf32>
    %130 = vector.shape_cast %129 : vector<128x128xf32> to vector<8x16x128xf32>
    %c0_103 = arith.constant 0 : index
    %c0_104 = arith.constant 0 : index
    %c0_105 = arith.constant 0 : index
    %c0_106 = arith.constant 0 : index
    %131 = vector.load %arg9[%c0_103, %c0_104, %c0_105, %c0_106] : memref<1x8x16x128xf32, #tpu.memory_space<vmem>>, vector<1x8x16x128xf32>
    %132 = vector.shape_cast %131 : vector<1x8x16x128xf32> to vector<8x16x128xf32>
    %133 = vector.shape_cast %130 : vector<8x16x128xf32> to vector<1x8x16x128xf32>
    tpu.vector_store %arg9[%c0_103, %c0_104, %c0_105, %c0_106], %133 {strides = array<i32>} : memref<1x8x16x128xf32, #tpu.memory_space<vmem>>, vector<1x8x16x128xf32>,
    return
  }
  func.func @transform_0(%arg0: i32, %arg1: i32) -> (i32, i32, i32, i32) {
    %c0_i32 = arith.constant 0 : i32
    %c0_i32_0 = arith.constant 0 : i32
    %c0_i32_1 = arith.constant 0 : i32
    %c0_i32_2 = arith.constant 0 : i32
    return %arg0, %c0_i32, %c0_i32_0, %c0_i32_1 : i32, i32, i32, i32
  }
  func.func @transform_1(%arg0: i32, %arg1: i32) -> (i32, i32) {
    %c0_i32 = arith.constant 0 : i32
    %c0_i32_0 = arith.constant 0 : i32
    %c0_i32_1 = arith.constant 0 : i32
    return %c0_i32, %c0_i32_0 : i32, i32
  }
  func.func @transform_2(%arg0: i32, %arg1: i32) -> (i32, i32) {
    %c0_i32 = arith.constant 0 : i32
    %c0_i32_0 = arith.constant 0 : i32
    %c0_i32_1 = arith.constant 0 : i32
    return %c0_i32, %c0_i32_0 : i32, i32
  }
  func.func @transform_3(%arg0: i32, %arg1: i32) -> (i32, i32, i32) {
    %c0_i32 = arith.constant 0 : i32
    %c0_i32_0 = arith.constant 0 : i32
    %c0_i32_1 = arith.constant 0 : i32
    %c0_i32_2 = arith.constant 0 : i32
    return %c0_i32, %c0_i32_0, %c0_i32_1 : i32, i32, i32
  }
  func.func @transform_4(%arg0: i32, %arg1: i32) -> (i32, i32) {
    %c0_i32 = arith.constant 0 : i32
    %c0_i32_0 = arith.constant 0 : i32
    %c0_i32_1 = arith.constant 0 : i32
    return %c0_i32, %c0_i32_0 : i32, i32
  }
  func.func @transform_5(%arg0: i32, %arg1: i32) -> (i32, i32) {
    %c0_i32 = arith.constant 0 : i32
    %c0_i32_0 = arith.constant 0 : i32
    %c0_i32_1 = arith.constant 0 : i32
    return %c0_i32, %c0_i32_0 : i32, i32
  }
  func.func @transform_6(%arg0: i32, %arg1: i32) -> (i32, i32) {
    %c0_i32 = arith.constant 0 : i32
    %c0_i32_0 = arith.constant 0 : i32
    %c0_i32_1 = arith.constant 0 : i32
    return %c0_i32, %c0_i32_0 : i32, i32
  }
  func.func @transform_7(%arg0: i32, %arg1: i32) -> (i32, i32, i32, i32) {
    %c0_i32 = arith.constant 0 : i32
    %c0_i32_0 = arith.constant 0 : i32
    %c0_i32_1 = arith.constant 0 : i32
    return %arg0, %arg1, %c0_i32, %c0_i32_0 : i32, i32, i32, i32
  }
}

</mosaic_0001>

<bundles_post_ra>
// kernel: tpu_custom_call.1
= control target key start
LH: loop header
LB: loop body
LE: loop exit
PB: predicated region body
PF: predicated region fallthrough
CT: control target
= control target key end

     0   :  { %s4806_s0 = inlined_call_operand.hbm [shape: f32[2,16,16,128], index: 0, kind: input, shape index: {}]   ;;  %s4807_s1 = inlined_call_operand.hbm [shape: bf16[128,128], index: 1, kind: input, shape index: {}]   ;;  %s4808_s2 = inlined_call_operand.vmem [shape: f32[1,128], index: 2, kind: input, shape index: {}]   ;;  %s4809_s3 = inlined_call_operand.hbm [shape: bf16[3,384,128], index: 3, kind: input, shape index: {}]   ;;  %s4810_s4 = inlined_call_operand.vmem [shape: f32[1,128], index: 4, kind: input, shape index: {}]   ;;  %s4811_s5 = inlined_call_operand.hbm [shape: bf16[128,128], index: 5, kind: input, shape index: {}]   ;;  %s4812_s6 = inlined_call_operand.vmem [shape: f32[1,128], index: 6, kind: input, shape index: {}]   ;;  %s4813_s7 = inlined_call_operand.hbm [shape: f32[2,16,16,128], index: 7, kind: output, shape index: {}]  }
   0x1   :  { %4826 = sst [smem:[#allocation21_spill]] %s4807_s1 }
   0x2   :  { %4827 = sst [smem:[#allocation22_spill]] %s4809_s3 }
   0x3   :  { %4828 = sst [smem:[#allocation23_spill]] %s4810_s4 }
   0x4   :  { %4829 = sst [smem:[#allocation24_spill]] %s4812_s6 }
   0x5   :  { %4830 = sst [smem:[#allocation25_spill]] %s4813_s7 }
   0x6   :  { %12 = vsyncpa [#allocation4], 0 }
   0x7   :  { %14 = vsyncpa [#allocation4 + $0x1], 0 }
   0x8   :  { %15 = vsyncpa [#allocation7], 0 }
   0x9   :  { %16 = vsyncpa [#allocation10], 0 }
   0xa   :  { %17 = vsyncpa [#allocation5], 0 }
   0xb   :  { %19 = vsyncpa [#allocation5 + $0x1], 0  ;;  %s4008_s24 = smov 0   ;;  %s4010_s25 = smov 0  }
   0xc   :  { %s4012_s26 = smov 0   ;;  %s4014_s27 = smov 0  }
   0xd   :  { %s4016_s28 = smov 0   ;;  %s4018_s29 = smov 0  }
   0xe   :  { %s4020_s30 = smov 0   ;;  %s4022_s8 = smov 0  }
   0xf   :  { %s4024_s9 = smov 0   ;;  %s4026_s10 = smov 0  }
  0x10   :  { %s4028_s11 = smov 0  }
  0x11 LB: > { %4831 = sst [smem:[#allocation16_spill]] %s3913_s24  ;;  %s2754_s12 = sadd.s32 4294967295, %s3953_s11   ;;  %s3953_s11 = sphi %s4028_s11, %s25_s11   ;;  %s3949_s10 = sphi %s4026_s10, %s4878_s10   ;;  %s3945_s9 = sphi %s4024_s9, %s4877_s9   ;;  %s3941_s8 = sphi %s4022_s8, %s4876_s8   ;;  %s3937_s30 = sphi %s4020_s30, %s4875_s30   ;;  %s3933_s29 = sphi %s4018_s29, %s4874_s29   ;;  %s3929_s28 = sphi %s4016_s28, %s4873_s28   ;;  %s3925_s27 = sphi %s4014_s27, %s4872_s27   ;;  %s3921_s26 = sphi %s4012_s26, %s4871_s26   ;;  %s3917_s25 = sphi %s4010_s25, %s4870_s25   ;;  %s3913_s24 = sphi %s4008_s24, %s4869_s24  }
  0x12   : > { %4832 = sst [smem:[#allocation17_spill]] %s3917_s25  ;;  %s2755_s13 = sadd.s32 4294967294, %s3953_s11  }
  0x13   : > { %4833 = sst [smem:[#allocation18_spill]] %s3941_s8  ;;  %p57_p0 = scmp.ne.s32.totalorder %s3929_s28, %s3925_s27 }
  0x14   : > { %p4064_p1 = scmp.eq.s32.totalorder %s2754_s12, 0  ;;  %p208_p2 = scmp.ne.s32.totalorder %s3921_s26, %s3917_s25 }
  0x15   : > { %p209_p4 = scmp.eq.s32.totalorder %s2754_s12, 3  ;;  %p214_p5 = scmp.ne.s32.totalorder %s3917_s25, %s3913_s24 }
  0x16   : > { %s4834_s14 = scalar_select %p4064_p1, 1, 0 }
  0x17   : > { %p4073_p3 = por %p4064_p1, %p57_p0  ;;  %p215_p6 = scmp.eq.s32.totalorder %s2755_s13, 3 }
  0x18   : > { %p4079_p7 = por %p209_p4, %p208_p2  ;;  %p2756_p8 = scmp.ge.s32.totalorder %s3953_s11, 1 }
  0x19   : > { %s4835_s16 = scalar_select %p4073_p3, 1, 0 }
  0x1a   : > { %s4836_s17 = scalar_select %p4079_p7, 1, 0 }
  0x1b   : > { %p4084_p9 = por %p215_p6, %p214_p5  ;;  %p222_p10 = scmp.lt.s32.totalorder %s3953_s11, 5 }
  0x1c   : > { %4837 = sst [smem:[#allocation19_spill]] %s4836_s17  ;;  %s3955_s20 = smov [#allocation6]  }
  0x1d   : > { %s4838_s18 = scalar_select %p4084_p9, 1, 0 }
  0x1e   : > { %p4089_p11 = pnand %p2756_p8, %p222_p10  ;;  %s234_s21 = sshll.u32 %s3955_s20, 4  ;;  %s4093_s21 = int_to_ptr.vmem [resolvable:$true] %s234_s21 }
  0x1f   : > { %4839 = sst [smem:[#allocation20_spill]] %s4838_s18  ;;  %s3956_s23 = smov [#allocation8]  }
  0x20   : > { %s4840_s19 = scalar_select %p4089_p11, 1, 0 }
  0x21   : > { %p3480_p12 = pneg %p4089_p11  ;;  %s250_s27 = sshll.u32 %s3956_s23, 4  ;;  %s4103_s27 = int_to_ptr.vmem [resolvable:$true] %s250_s27 }
  0x22   : > { %s3957_s12 = smov [#allocation9]   ;;  %s4842_s1 = sld [smem:[#allocation21_spill]] }
  0x23   : > { %p4099_p13 = pnand %p3480_p12, %p4064_p1  ;;  %s4105_s13 = sshll.u32 %s3957_s12, 4  ;;  %s267_s13 = int_to_ptr.vmem [resolvable:$true] %s4105_s13 }
  0x25   : > { %p4115_p2 = pneg %p4099_p13 }
  0x28   : > { %s3709_s20 = scalar_lea.hbm %s4842_s1, 1024 }
  0x29   : > { %p3710_p0 = scmp.ne.s32.totalorder %s4842_s1, %s3709_s20  ;;  %p3716_p6 = scmp.lt.u32.totalorder %s3709_s20, %s4842_s1 }
  0x2b   : > { %p3712_p4 = pnand %p4115_p2, %p3710_p0 }
  0x2d   : > { %p3713_p5 = pneg %p3712_p4 }
  0x2f   : > { %p3718_p8 = pnand %p3716_p6, %p3713_p5 }
  0x31   : > { %3721 = shalt.err (!%p3718_p8)
}
  0x32   : > { %s3722_s7 = scalar_lea.vmem %s4093_s21, 1024  ;;  %p3730_p7 = scmp.lt.s32.totalorder %s4093_s21, %s4093_s21 }
  0x33   : > { %p3723_p10 = scmp.ne.s32.totalorder %s4093_s21, %s3722_s7  ;;  %p3731_p1 = scmp.lt.s32.totalorder %s3722_s7, %s3722_s7 }
  0x35   : > { %p3725_p12 = pnand %p3723_p10, %p4115_p2  ;;  %p3732_p0 = por %p3731_p1, %p3730_p7 }
  0x37   : > { %p3726_p9 = pneg %p3725_p12 }
  0x39   : > { %p3733_p4 = pnand %p3732_p0, %p3726_p9 }
  0x3b   : > { %3736 = shalt.err (!%p3733_p4)
}
  0x3c   : > { %s3958_s24 = smov 64   ;;  %s3959_s15 = smov 4  }
  0x3d   : > { %3483 = dma.hbm_to_vmem [thread:$0]  (!%p4099_p13), %s4842_s1, 1024, %s4093_s21, [#allocation7], %s3958_s24, %s3958_s24, %s3959_s15  }
  0x3e   : > { %s4844_s3 = sld [smem:[#allocation22_spill]] }
  0x44   : > { %s3737_s7 = scalar_lea.hbm %s4844_s3, 9216 }
  0x45   : > { %p3738_p1 = scmp.ne.s32.totalorder %s4844_s3, %s3737_s7  ;;  %p3744_p5 = scmp.lt.u32.totalorder %s3737_s7, %s4844_s3 }
  0x47   : > { %p3740_p7 = pnand %p3738_p1, %p4115_p2 }
  0x49   : > { %p3741_p9 = pneg %p3740_p7 }
  0x4b   : > { %p3746_p6 = pnand %p3744_p5, %p3741_p9 }
  0x4d   : > { %3749 = shalt.err (!%p3746_p6)
}
  0x4e   : > { %s3750_s21 = scalar_lea.vmem %s4103_s27, 9216  ;;  %p3758_p0 = scmp.lt.s32.totalorder %s4103_s27, %s4103_s27 }
  0x4f   : > { %p3751_p8 = scmp.ne.s32.totalorder %s4103_s27, %s3750_s21  ;;  %p3759_p4 = scmp.lt.s32.totalorder %s3750_s21, %s3750_s21 }
  0x51   : > { %p3753_p10 = pnand %p3751_p8, %p4115_p2  ;;  %p3760_p1 = por %p3759_p4, %p3758_p0 }
  0x53   : > { %p3754_p12 = pneg %p3753_p10 }
  0x55   : > { %p3761_p7 = pnand %p3760_p1, %p3754_p12 }
  0x57   : > { %3764 = shalt.err (!%p3761_p7)
}
  0x58   : > { %3486 = dma.hbm_to_vmem [thread:$0]  (!%p4099_p13), %s4844_s3, 9216, %s4103_s27, [#allocation7], %s3958_s24, %s3958_s24, %s3959_s15  }
  0x59   : > { %s3765_s18 = scalar_lea.hbm %s4811_s5, 1024 }
  0x5a   : > { %p3766_p9 = scmp.ne.s32.totalorder %s4811_s5, %s3765_s18  ;;  %p3772_p8 = scmp.lt.u32.totalorder %s3765_s18, %s4811_s5 }
  0x5c   : > { %p3768_p5 = pnand %p3766_p9, %p4115_p2 }
  0x5e   : > { %p3769_p6 = pneg %p3768_p5 }
  0x60   : > { %p3774_p10 = pnand %p3772_p8, %p3769_p6 }
  0x62   : > { %3777 = shalt.err (!%p3774_p10)
}
  0x63   : > { %s3778_s21 = scalar_lea.vmem %s267_s13, 1024  ;;  %p3786_p1 = scmp.lt.s32.totalorder %s267_s13, %s267_s13 }
  0x64   : > { %p3779_p12 = scmp.ne.s32.totalorder %s267_s13, %s3778_s21  ;;  %p3787_p7 = scmp.lt.s32.totalorder %s3778_s21, %s3778_s21 }
  0x66   : > { %p3781_p0 = pnand %p3779_p12, %p4115_p2  ;;  %p3788_p3 = por %p3787_p7, %p3786_p1 }
  0x68   : > { %p3782_p4 = pneg %p3781_p0 }
  0x6a   : > { %p3789_p11 = pnand %p3788_p3, %p3782_p4 }
  0x6c   : > { %3792 = shalt.err (!%p3789_p11)
}
  0x6d   : > { %3489 = dma.hbm_to_vmem [thread:$0]  (!%p4099_p13), %s4811_s5, 1024, %s267_s13, [#allocation10], %s3958_s24, %s3958_s24, %s3959_s15  }
  0x6e   : > { %s34_s17 = sadd.s32 1, %s3945_s9  ;;  %s37_s22 = sadd.s32 1, %s3949_s10 }
  0x6f   : > { %p35_p3 = scmp.ge.s32.totalorder %s34_s17, 2  ;;  %s44_s6 = sadd.s32 1, %s3933_s29 }
  0x70   : > { %p51_p11 = scmp.ne.s32.totalorder %s3933_s29, %s3929_s28  ;;  %p52_p2 = scmp.eq.s32.totalorder %s3953_s11, 0 }
  0x71   : > { %s4880_s17 = smov (%p35_p3, %s34_s17), 0  ;;  %s4882_s22 = smov (!%p35_p3, %s37_s22), %s3949_s10 }
  0x72   : > { %s194_s25 = ssub.s32 %s3945_s9, %s4880_s17  ;;  %p39_p9 = scmp.ge.s32.totalorder %s4882_s22, 2 }
  0x73   : > { %p3501_p5 = scmp.lt.s32.totalorder %s3953_s11, 4  ;;  %p4199_p13 = por %p52_p2, %p51_p11 }
  0x74   : > { %s283_s24 = sand.u32 1, %s3933_s29   ;;  %s4884_s22 = smov (%p39_p9, %s4882_s22), 0 }
  0x75   : > { %s2761_s15 = sshll.u32 %s283_s24, 8  ;;  %s41_s8 = ssub.s32 %s3949_s10, %s4884_s22 }
  0x76   : > { %p42_p6 = scmp.eq.s32.totalorder %s41_s8, 0  ;;  %s195_s18 = sor.u32 %s194_s25, %s41_s8 }
  0x77   : > { %p196_p8 = scmp.eq.s32.totalorder %s195_s18, 0  ;;  %s2891_s20 = sshll.u32 %s3949_s10, 12 }
  0x78   : > { %s4210_s23 = scalar_select %p42_p6, %s3933_s29, %s44_s6  }
  0x79   : > { %s4846_s12 = sadd.s32 1, %s3921_s26  ;;  %s4220_s4 = scalar_lea.hbm %s4806_s0, %s2891_s20 }
  0x7a   : > { %s4215_s7 = scalar_select %p196_p8, %s3921_s26, %s4846_s12  }
  0x7b   : > { %s287_s1 = scalar_lea.vmem [#allocation3], %s2761_s15  ;;  %p4228_p10 = pnand %p3501_p5, %p4199_p13 }
  0x7c   : > { %s294_s3 = sshll.u32 %s287_s1, 4  ;;  %s4232_s25 = scalar_lea.sflag [#allocation4], %s283_s24  ;;  %s4222_s3 = int_to_ptr.vmem [resolvable:$true] %s294_s3 }
  0x7d   : > { %s3793_s8 = scalar_lea.hbm %s4220_s4, 4096  ;;  %p3795_p0 = pneg %p4228_p10 }
  0x7e   : > { %p3794_p12 = scmp.ne.s32.totalorder %s4220_s4, %s3793_s8  ;;  %s3798_s13 = scalar_lea.hbm %s4806_s0, 8192 }
  0x7f   : > { %p3799_p7 = scmp.lt.u32.totalorder %s4220_s4, %s4806_s0  ;;  %p3800_p3 = scmp.lt.u32.totalorder %s3798_s13, %s3793_s8 }
  0x80   : > { %p3796_p4 = pnand %p3795_p0, %p3794_p12  ;;  %p3802_p2 = scmp.lt.u32.totalorder %s3793_s8, %s4220_s4 }
  0x81   : > { %p3801_p11 = por %p3800_p3, %p3799_p7 }
  0x82   : > { %p3797_p1 = pneg %p3796_p4 }
  0x83   : > { %p3803_p9 = por %p3802_p2, %p3801_p11 }
  0x85   : > { %p3804_p5 = pnand %p3803_p9, %p3797_p1 }
  0x87   : > { %3807 = shalt.err (!%p3804_p5)
}
  0x88   : > { %s3808_s24 = scalar_lea.vmem %s4222_s3, 4096  ;;  %s3960_s12 = smov [#allocation3]  }
  0x89   : > { %p3809_p13 = scmp.ne.s32.totalorder %s4222_s3, %s3808_s24  ;;  %s3813_s21 = sshll.u32 %s3960_s12, 4  ;;  %s3814_s21 = int_to_ptr.vmem [resolvable:$false] %s3813_s21 }
  0x8a   : > { %s3815_s27 = scalar_lea.vmem %s3814_s21, 8192  ;;  %p3816_p12 = scmp.lt.s32.totalorder %s4222_s3, %s3814_s21 }
  0x8b   : > { %p3811_p6 = pnand %p3809_p13, %p3795_p0  ;;  %p3817_p4 = scmp.lt.s32.totalorder %s3815_s27, %s3808_s24 }
  0x8d   : > { %p3812_p8 = pneg %p3811_p6  ;;  %p3818_p7 = por %p3817_p4, %p3816_p12 }
  0x8f   : > { %p3819_p3 = pnand %p3818_p7, %p3812_p8 }
  0x91   : > { %3822 = shalt.err (!%p3819_p3)
}
  0x92   : > { %s3961_s8 = smov 128   ;;  %s3962_s1 = smov 8  }
  0x93   : > { %3493 = dma.hbm_to_vmem [thread:$0]  (!%p4228_p10), %s4220_s4, 4096, %s4222_s3, %s4232_s25, %s3961_s8, %s3961_s8, %s3962_s1  }
  0x94   : > { %p4848_p0 = scmp.ne.s32.totalorder %s4840_s19, 0 }
  0x95   : > { %s308_s15 = sand.u32 (!%p4848_p0), 1, %s3929_s28   ;;  %p4849_p1 = scmp.ne.s32.totalorder (!%p4848_p0), %s4835_s16, 0 }
  0x96   : > { %306 = sbr.rel (%p4848_p0) target bundleno = 1062 (0x426), region = 48  ;;  %s2765_s13 = sshll.u32 (!%p4848_p0), %s308_s15, 8 }
  0x97   : > { %s309_s18 = scalar_lea.sflag (!%p4848_p0), [#allocation4], %s308_s15  ;;  %s4263_s20 = scalar_lea.vmem (!%p4848_p0), [#allocation3], %s2765_s13 }
  0x9d   : > { %3896 = dma.done.wait (%p4849_p1), %s309_s18, 4096  }
  0x9e   : > { %3898 = vsyncadd (%p4849_p1), %s309_s18, 4294963200  ;;  %p4850_p11 = scmp.ne.s32.totalorder %s4834_s14, 0 }
  0xa0   : > { %3900 = dma.done.wait (%p4850_p11), [#allocation7], 10240  }
  0xa1   : > { %3902 = vsyncadd (%p4850_p11), [#allocation7], 4294957056 }
  0xa2   : > { %3904 = dma.done.wait (%p4850_p11), [#allocation10], 1024  }
  0xa3   : > { %3906 = vsyncadd (%p4850_p11), [#allocation10], 4294966272  ;;  %v3963_v0 = vmov 0.0   ;;  %vm3964_vm0 = vmmov 0   ;;  %v3605_v1 = vld [vmem:[#allocation6] sm:$0xff]   ;;  %v3606_v2 = vld [vmem:[#allocation6 + $0x8] sm:$0xff]  }
  0xa4   : > { %3216 = vmatprep.subr.bf16.mxu1 %v3963_v0  ;;  %3232 = vmatprep.mubr.msk.bf16.mxu1 %vm3964_vm0, %v3963_v0  ;;  %v3607_v3 = vld [vmem:[#allocation6 + $0x10] sm:$0xff]   ;;  %s2892_s3 = sshll.u32 %s3937_s30, 7  ;;  %v3611_v4 = vld [vmem:[#allocation6] sm:$0xff]   ;;  %v3608_v5 = vld [vmem:[#allocation6 + $0x18] sm:$0xff]   ;;  %s2770_s16 = sshll.u32 %s3937_s30, 3  ;;  %vm649_vm1 = vcmask 1047552  }
  0xa5   : > { %3184 = vmatprep.subr.bf16.mxu0 %v3605_v1  ;;  %3217 = vmatpush3.bf16.msra.mxu1 %v3611_v4  ;;  %v3613_v6 = vld [vmem:[#allocation6 + $0x8] sm:$0xff]   ;;  %s4282_s14 = scalar_lea.vmem %s4263_s20, %s2892_s3 [#allocation3]  ;;  %v3609_v7 = vld [vmem:[#allocation6 + $0x20] sm:$0xff]   ;;  %v3615_v10 = vld [vmem:[#allocation6 + $0x10] sm:$0xff]   ;;  %s2781_s19 = sadd.s32 4294967295, %s2770_s16  ;;  %vm650_vm2 = vsmask.f32 7938 }
  0xa6   : > { %3185 = vmatpush3.bf16.msra.mxu0 %v3605_v1  ;;  %3218 = vmatprep.subr.bf16.mxu1 %v3963_v0  ;;  %v360_v8 = vld [vmem:[%s4282_s14] sm:$0xff]  ;;  %v361_v9 = vld [vmem:[%s4282_s14 + $0x8] sm:$0xff]  ;;  %v3610_v12 = vld [vmem:[#allocation6 + $0x28] sm:$0xff]   ;;  %p784_p10 = scmp.gt.s32.totalorder %s2781_s19, 0  ;;  %s4290_s4 = sadd.s32 8, %s2770_s16  ;;  %vm676_vm4 = vcmask 1040384  }
  0xa7   : > { %3186 = vmatprep.subr.bf16.mxu0 %v3606_v2  ;;  %v376_v11 = vpack.c.bf16 %v361_v9, %v360_v8  ;;  %v3616_v13 = vld [vmem:[#allocation6 + $0x18] sm:$0xff]   ;;  %v3612_v14 = vld [vmem:[#allocation6 + $0x30] sm:$0xff]   ;;  %v3617_v15 = vld [vmem:[#allocation6 + $0x20] sm:$0xff]   ;;  %p937_p2 = scmp.lt.s32.totalorder %s4290_s4, 15  ;;  %p780_p9 = scmp.gt.s32.totalorder %s3937_s30, 0  ;;  %vm753_vm8 = vcmask 1047559  }
  0xa8   : > { %s4886_s19 = smov (!%p784_p10, %s2781_s19), 0  ;;  %v3614_v16 = vld [vmem:[#allocation6 + $0x38] sm:$0xff]   ;;  %v3618_v17 = vld [vmem:[#allocation6 + $0x28] sm:$0xff]   ;;  %v362_v18 = vld [vmem:[%s4282_s14 + $0x10] sm:$0xff]  ;;  %vm727_vm3 = vsmask.f32 7424 }
  0xa9   : > { %3219 = vmatpush3.bf16.msra.mxu1 %v3613_v6  ;;  %3200 = vmatprep.mubr.bf16.mxu0 %v376_v11  ;;  %s2782_s6 = sshll.u32 %s4886_s19, 4  ;;  %v363_v19 = vld [vmem:[%s4282_s14 + $0x18] sm:$0xff]  ;;  %v364_v20 = vld [vmem:[%s4282_s14 + $0x20] sm:$0xff]  ;;  %v365_v21 = vld [vmem:[%s4282_s14 + $0x28] sm:$0xff]  ;;  %vm677_vm5 = vsmask.f32 256 }
  0xaa   : > { %3187 = vmatpush3.bf16.msra.mxu0 %v3606_v2  ;;  %3220 = vmatprep.subr.bf16.mxu1 %v3963_v0  ;;  %s4299_s25 = scalar_select %p937_p2, %s4290_s4, 15  ;;  %v3619_v22 = vld [vmem:[#allocation6 + $0x30] sm:$0xff]   ;;  %v377_v23 = vpack.c.bf16 %v363_v19, %v362_v18  ;;  %v3620_v24 = vld [vmem:[#allocation6 + $0x38] sm:$0xff]   ;;  %v3621_v27 = vld [vmem:[#allocation6] sm:$0xff]   ;;  %v378_v28 = vpack.c.bf16 %v365_v21, %v364_v20  ;;  %vm754_vm9 = vsmask.f32 7966 }
  0xab   : > { %3188 = vmatprep.subr.bf16.mxu0 %v3607_v3  ;;  %s787_s24 = scalar_lea.vmem %s4263_s20, %s2782_s6 [#allocation3]  ;;  %v366_v29 = vld [vmem:[%s4282_s14 + $0x30] sm:$0xff]  ;;  %v367_v30 = vld [vmem:[%s4282_s14 + $0x38] sm:$0xff]  ;;  %v368_v32 = vld [vmem:[%s4282_s14 + $0x40] sm:$0xff]  ;;  %p934_p5 = scmp.lt.s32.totalorder %s4290_s4, 16 }
  0xac   : > { %v788_v25 = vld [vmem:[%s787_s24] sm:$0xff]  ;;  %v789_v26 = vld [vmem:[%s787_s24 + $0x8] sm:$0xff]  ;;  %s2792_s12 = sshll.u32 %s4299_s25, 4  ;;  %v3622_v31 = vld [vmem:[#allocation6 + $0x8] sm:$0xff]   ;;  %v379_v36 = vpack.c.bf16 %v367_v30, %v366_v29  ;;  %s4859_s4 = sld [smem:[#allocation23_spill]] }
  0xad   : > { %3221 = vmatpush3.bf16.msra.mxu1 %v3615_v10  ;;  %v369_v33 = vld [vmem:[%s4282_s14 + $0x48] sm:$0xff]  ;;  %v790_v34 = vpack.c.bf16 %v789_v26, %v788_v25  ;;  %v3623_v35 = vld [vmem:[#allocation6 + $0x10] sm:$0xff]   ;;  %v370_v38 = vld [vmem:[%s4282_s14 + $0x50] sm:$0xff]  ;;  %s940_s21 = scalar_lea.vmem %s4263_s20, %s2792_s12 [#allocation3]  ;;  %s4860_s6 = sld [smem:[#allocation17_spill]] }
  0xae   : > { %3189 = vmatpush3.bf16.msra.mxu0 %v3607_v3  ;;  %3222 = vmatprep.subr.bf16.mxu1 %v3963_v0  ;;  %v380_v37 = vpack.c.bf16 %v369_v33, %v368_v32  ;;  %v371_v39 = vld [vmem:[%s4282_s14 + $0x58] sm:$0xff]  ;;  %v3624_v40 = vld [vmem:[#allocation6 + $0x18] sm:$0xff]   ;;  %v372_v41 = vld [vmem:[%s4282_s14 + $0x60] sm:$0xff]  ;;  %s781_s1 = scalar_select %p780_p9, 1, 0 }
  0xaf   : > { %3190 = vmatprep.subr.bf16.mxu0 %v3608_v5  ;;  %v373_v42 = vld [vmem:[%s4282_s14 + $0x68] sm:$0xff]  ;;  %v3625_v43 = vld [vmem:[#allocation6 + $0x20] sm:$0xff]   ;;  %v381_v44 = vpack.c.bf16 %v371_v39, %v370_v38  ;;  %v375_v47 = vld [vmem:[%s4282_s14 + $0x78] sm:$0xff]  ;;  %s4440_s13 = scalar_select %p934_p5, 1, 0 }
  0xb0   : > { %v382_v45 = vpack.c.bf16 %v373_v42, %v372_v41  ;;  %v374_v46 = vld [vmem:[%s4282_s14 + $0x70] sm:$0xff]  ;;  %v3626_v48 = vld [vmem:[#allocation6 + $0x28] sm:$0xff]   ;;  %v3627_v49 = vld [vmem:[#allocation6 + $0x30] sm:$0xff]   ;;  %s782_s15 = scvt.s32.f32 %s781_s1  ;;  %s4862_s1 = sld [smem:[#allocation18_spill]] }
  0xb1   : > { %3223 = vmatpush3.bf16.msra.mxu1 %v3616_v13  ;;  %v383_v50 = vpack.c.bf16 %v375_v47, %v374_v46  ;;  %v3628_v51 = vld [vmem:[#allocation6 + $0x38] sm:$0xff]   ;;  %v941_v52 = vld [vmem:[%s940_s21] sm:$0xff]  ;;  %v3629_v55 = vld [vmem:[#allocation8 + $0x100] sm:$0xff]   ;;  %s936_s3 = scvt.s32.f32 %s4440_s13 }
  0xb2   : > { %3191 = vmatpush3.bf16.msra.mxu0 %v3608_v5  ;;  %3224 = vmatprep.subr.bf16.mxu1 %v3963_v0  ;;  %v942_v53 = vld [vmem:[%s940_s21 + $0x8] sm:$0xff]  ;;  %v3630_v56 = vld [vmem:[#allocation8 + $0x140] sm:$0xff]   ;;  %v3632_v58 = vld [vmem:[#allocation8 + $0x108] sm:$0xff]   ;;  %v905_v38 = vstv %s782_s15  ;;  %s4861_s21 = sld [smem:[#allocation24_spill]]  ;;  %s2893_s15 = sshll.u32 %s3937_s30, 4 }
  0xb3   : > { %3192 = vmatprep.subr.bf16.mxu0 %v3609_v7  ;;  %v943_v54 = vpack.c.bf16 %v942_v53, %v941_v52  ;;  %v3631_v57 = vld [vmem:[#allocation8 + $0xc0] sm:$0xff]   ;;  %v3633_v59 = vld [vmem:[#allocation8 + $0x148] sm:$0xff]   ;;  %v3635_v61 = vld [vmem:[#allocation8 + $0x110] sm:$0xff]   ;;  %s352_s25 = sand.u32 1, %s4860_s6  }
  0xb4   : > { %v3634_v60 = vld [vmem:[#allocation8 + $0xc8] sm:$0xff]   ;;  %v3636_v62 = vld [vmem:[#allocation8 + $0x150] sm:$0xff]   ;;  %v3639_v1 = vld [vmem:[#allocation8 + $0x158] sm:$0xff]   ;;  %s2769_s27 = sshll.u32 %s352_s25, 7 }
  0xb5   : > { %3225 = vmatpush3.bf16.msra.mxu1 %v3617_v15  ;;  %v3637_v63 = vld [vmem:[#allocation8 + $0xd0] sm:$0xff]   ;;  %v3640_v2 = vld [vmem:[#allocation8 + $0xd8] sm:$0xff]   ;;  %v3641_v3 = vld [vmem:[#allocation8 + $0x120] sm:$0xff]   ;;  %s4691_s8 = scalar_lea.vmem [#allocation11], %s2769_s27 }
  0xb6   : > { %3193 = vmatpush3.bf16.msra.mxu0 %v3609_v7  ;;  %3226 = vmatprep.subr.bf16.mxu1 %v3963_v0  ;;  %v3642_v4 = vld [vmem:[#allocation8 + $0x160] sm:$0xff]   ;;  %v3644_v6 = vld [vmem:[#allocation8 + $0x128] sm:$0xff]   ;;  %v3647_v9 = vld [vmem:[#allocation8 + $0x130] sm:$0xff]   ;;  %s2887_s13 = sshll.u32 %s4862_s1, 5  ;;  %s2632_s20 = sshll.u32 %s4691_s8, 4  ;;  %s4738_s20 = int_to_ptr.vmem [resolvable:$true] %s2632_s20 }
  0xb7   : > { %3194 = vmatprep.subr.bf16.mxu0 %v3610_v12  ;;  %v3643_v5 = vld [vmem:[#allocation8 + $0xe0] sm:$0xff]   ;;  %v3645_v7 = vld [vmem:[#allocation8 + $0x168] sm:$0xff]   ;;  %v3648_v10 = vld [vmem:[#allocation8 + $0x170] sm:$0xff]   ;;  %s2629_s18 = sadd.s32 %s2893_s15, %s2887_s13  ;;  %s3823_s12 = scalar_lea.vmem %s4738_s20, 2048 }
  0xb8   : > { %v3646_v8 = vld [vmem:[#allocation8 + $0xe8] sm:$0xff]   ;;  %v3649_v11 = vld [vmem:[#allocation8 + $0xf0] sm:$0xff]   ;;  %v3651_v13 = vld [vmem:[#allocation8 + $0x178] sm:$0xff]   ;;  %s2888_s30 = sshll.u32 %s2629_s18, 7  ;;  %p3824_p13 = scmp.ne.s32.totalorder %s4738_s20, %s3823_s12 }
  0xb9   : > { %3227 = vmatpush3.bf16.msra.mxu1 %v3618_v17  ;;  %v3653_v15 = vld [vmem:[#allocation8 + $0x40] sm:$0xff]   ;;  %v4333_v17 = vld [vmem:[%s4808_s2] ss:$0 sm:$0xff]  ;;  %vm4355_vm6 = vmand %vm649_vm1, %vm650_vm2 }
  0xba   : > { %3195 = vmatpush3.bf16.msra.mxu0 %v3610_v12  ;;  %3228 = vmatprep.subr.bf16.mxu1 %v3963_v0  ;;  %v3650_v12 = vld [vmem:[#allocation8 + $0x138] sm:$0xff]   ;;  %vm4362_vm7 = vmand %vm649_vm1, %vm727_vm3 }
  0xbb   : > { %3196 = vmatprep.subr.bf16.mxu0 %v3612_v14  ;;  %vm4390_vm10 = vmand %vm676_vm4, %vm677_vm5 }
  0xbc   : > { %vm4397_vm11 = vmand %vm753_vm8, %vm754_vm9 }
  0xbd   : > { %3229 = vmatpush3.bf16.msra.mxu1 %v3619_v22 }
  0xbe   : > { %3197 = vmatpush3.bf16.msra.mxu0 %v3612_v14  ;;  %3230 = vmatprep.subr.bf16.mxu1 %v3963_v0  ;;  %v3652_v14 = vld [vmem:[#allocation8 + $0xf8] sm:$0xff]  }
  0xbf   : > { %3198 = vmatprep.subr.bf16.mxu0 %v3614_v16 }
  0xc1   : > { %3231 = vmatpush3.bf16.msra.mxu1 %v3620_v24 }
  0xc2   : > { %3199 = vmatpush3.bf16.msra.mxu0 %v3614_v16  ;;  %2928 = vmatprep.subr.bf16.mxu1 %v3629_v55  ;;  %v3669_v16 = vld [vmem:[#allocation8 + $0x1c0] sm:$0xff]  }
  0xc3   : > { %3236 = vmatprep.subr.bf16.mxu0 %v3963_v0  ;;  %v655_v55 = vld [vmem:[#allocation2 + $0x30] sm:$0xff] }
  0xc4   : > { %3233 = vmatmul.mubr.bf16.vlgmr.msra.gmra.mrb[0].mxu1 %v790_v34 }
  0xc5   : > { %3201 = vmatmul.mubr.bf16.vlgmr.msra.gmra.mrb[0].mxu0 %v377_v23  ;;  %2929 = vmatpush3.bf16.msra.mxu1 %v3631_v57  ;;  %v732_v57 = vld [vmem:[#allocation2 + $0x40] sm:$0xff] }
  0xc6   : > { %3204 = vmatprep.mubr.bf16.mxu0 %v378_v28  ;;  %3237 = vmatpush3.bf16.msra.mxu0 %v3621_v27 }
  0xc7   : > { %3238 = vmatprep.subr.bf16.mxu0 %v3963_v0  ;;  %2930 = vmatprep.subr.bf16.mxu1 %v3632_v58 }
  0xc9   : > { %2931 = vmatpush3.bf16.msra.mxu1 %v3634_v60 }
  0xca   : > { %3239 = vmatpush3.bf16.msra.mxu0 %v3622_v31  ;;  %2932 = vmatprep.subr.bf16.mxu1 %v3635_v61 }
  0xcb   : > { %3240 = vmatprep.subr.bf16.mxu0 %v3963_v0 }
  0xcd   : > { %3205 = vmatmul.mubr.bf16.gmra.mrb[4].mxu0 %v379_v36  ;;  %2933 = vmatpush3.bf16.msra.mxu1 %v3637_v63 }
  0xce   : > { %3208 = vmatprep.mubr.bf16.mxu0 %v380_v37  ;;  %3241 = vmatpush3.bf16.msra.mxu0 %v3623_v35 }
  0xcf   : > { %3242 = vmatprep.subr.bf16.mxu0 %v3963_v0 }
  0xd2   : > { %3243 = vmatpush3.bf16.msra.mxu0 %v3624_v40 }
  0xd3   : > { %3244 = vmatprep.subr.bf16.mxu0 %v3963_v0 }
  0xd5   : > { %3209 = vmatmul.mubr.bf16.gmra.mrb[8].mxu0 %v381_v44 }
  0xd6   : > { %3212 = vmatprep.mubr.bf16.mxu0 %v382_v45  ;;  %3245 = vmatpush3.bf16.msra.mxu0 %v3625_v43 }
  0xd7   : > { %3246 = vmatprep.subr.bf16.mxu0 %v3963_v0 }
  0xda   : > { %3247 = vmatpush3.bf16.msra.mxu0 %v3626_v48 }
  0xdb   : > { %3248 = vmatprep.subr.bf16.mxu0 %v3963_v0 }
  0xdd   : > { %3213 = vmatmul.mubr.bf16.gmra.mrb[12].mxu0 %v383_v50  ;;  %v3686_v50 = vld [vmem:[#allocation8 + $0x1b0] sm:$0xff]  }
  0xde   : > { %3249 = vmatpush3.bf16.msra.mxu0 %v3627_v49  ;;  %3252 = vmatprep.mubr.msk.bf16.mxu0 %vm3964_vm0, %v3963_v0 }
  0xdf   : > { %3250 = vmatprep.subr.bf16.mxu0 %v3963_v0  ;;  %v3638_v0 = vld [vmem:[#allocation8 + $0x118] sm:$0xff]  }
  0xe0   : > { %2934 = vmatprep.subr.bf16.mxu1 %v3638_v0  ;;  %v652_v0 = vld [vmem:[#allocation2 + $0x18] sm:$0xff] }
  0xe1   : > { %2935 = vmatpush3.bf16.msra.mxu1 %v3640_v2 }
  0xe2   : > { %3251 = vmatpush3.bf16.msra.mxu0 %v3628_v51  ;;  %2936 = vmatprep.subr.bf16.mxu1 %v3641_v3 }
  0xe3   : > { %3256 = vmatprep.subr.bf16.mxu0 %v3630_v56 }
  0xe5   : > { %3253 = vmatmul.mubr.bf16.vlgmr.msra.gmra.mrb[16].mxu0 %v943_v54  ;;  %2937 = vmatpush3.bf16.msra.mxu1 %v3643_v5 }
  0xe6   : > { %3257 = vmatpush3.bf16.msra.mxu0 %v3630_v56  ;;  %2938 = vmatprep.subr.bf16.mxu1 %v3644_v6  ;;  %v3687_v56 = vld [vmem:[#allocation8 + $0x1f8] sm:$0xff]  }
  0xe7   : > { %3258 = vmatprep.subr.bf16.mxu0 %v3633_v59 }
  0xe9   : > { %2939 = vmatpush3.bf16.msra.mxu1 %v3646_v8 }
  0xea   : > { %3259 = vmatpush3.bf16.msra.mxu0 %v3633_v59  ;;  %2940 = vmatprep.subr.bf16.mxu1 %v3647_v9 }
  0xeb   : > { %3260 = vmatprep.subr.bf16.mxu0 %v3636_v62 }
  0xed   : > { %2941 = vmatpush3.bf16.msra.mxu1 %v3649_v11 }
  0xee   : > { %3261 = vmatpush3.bf16.msra.mxu0 %v3636_v62  ;;  %2942 = vmatprep.subr.bf16.mxu1 %v3650_v12 }
  0xef   : > { %3262 = vmatprep.subr.bf16.mxu0 %v3639_v1 }
  0xf1   : > { %2943 = vmatpush3.bf16.msra.mxu1 %v3652_v14 }
  0xf2   : > { %3263 = vmatpush3.bf16.msra.mxu0 %v3639_v1  ;;  %3088 = vmatprep.subr.bf16.mxu1 %v3669_v16  ;;  %v729_v1 = vld [vmem:[#allocation2 + $0x28] sm:$0xff] }
  0xf3   : > { %3264 = vmatprep.subr.bf16.mxu0 %v3642_v4 }
  0xf6   : > { %3265 = vmatpush3.bf16.msra.mxu0 %v3642_v4 }
  0xf7   : > { %3266 = vmatprep.subr.bf16.mxu0 %v3645_v7 }
  0xfa   : > { %3267 = vmatpush3.bf16.msra.mxu0 %v3645_v7 }
  0xfb   : > { %3268 = vmatprep.subr.bf16.mxu0 %v3648_v10 }
  0xfe   : > { %3269 = vmatpush3.bf16.msra.mxu0 %v3648_v10 }
  0xff   : > { %3270 = vmatprep.subr.bf16.mxu0 %v3651_v13 }
 0x102   : > { %3271 = vmatpush3.bf16.msra.mxu0 %v3651_v13 }
 0x103   : > { %3008 = vmatprep.subr.bf16.mxu0 %v3653_v15 }
 0x197   : > { %v896_v28 = vpop.f32.mrb[0].mxu1 }
 0x198   : > { %v3202_v18 = vpop.f32.mrb[0].mxu0  ;;  %v897_v31 = vadd.f32 %v4333_v17, %v896_v28  ;;  %v3234_v32 = vpop.f32.mrb[1].mxu1 }
 0x199   : > { %v498_v19 = vadd.f32 %v3202_v18, %v4333_v17  ;;  %v489_v20 = vpop.f32.mrb[1].mxu0  ;;  %v899_v34 = vpop.f32.mrb[2].mxu1  ;;  %v661_v32 = vld [vmem:[#allocation2 + $0x60] sm:$0xff] }
 0x19a   : > { %v490_v21 = vadd.f32 %v4333_v17, %v489_v20  ;;  %v3203_v22 = vpop.f32.mrb[2].mxu0  ;;  %v903_v37 = vmax.f32 %v897_v31, 0.0  ;;  %v3235_v39 = vpop.f32.mrb[3].mxu1  ;;  %v900_v44 = vadd.f32 %v4333_v17, %v899_v34  ;;  %v738_v34 = vld [vmem:[#allocation2 + $0x70] sm:$0xff] }
 0x19b   : > { %v501_v23 = vadd.f32 %v3203_v22, %v4333_v17  ;;  %v492_v24 = vpop.f32.mrb[3].mxu0  ;;  %v554_v26 = vmax.f32 %v498_v19, 0.0 }
 0x19c   : > { %v493_v25 = vadd.f32 %v4333_v17, %v492_v24  ;;  %v552_v29 = vmax.f32 %v490_v21, 0.0  ;;  %v906_v54 = vmul.f32 %v905_v38, %v903_v37  ;;  %v904_v3 = vmax.f32 %v900_v44, 0.0  ;;  %v735_v44 = vld [vmem:[#allocation2 + $0x58] sm:$0xff] }
 0x19d   : > { %v555_v27 = vmax.f32 %v501_v23, 0.0 }
 0x19e   : > { %v553_v30 = vmax.f32 %v493_v25, 0.0  ;;  %v907_v11 = vmul.f32 %v905_v38, %v904_v3 }
 0x19f   : > { %v4340_v33 = vpack.c.bf16 %v555_v27, %v554_v26 }
 0x1a0   : > { %v4342_v35 = vpack.c.bf16 %v553_v30, %v552_v29  ;;  %v3206_v36 = vpop.f32.mrb[4].mxu0  ;;  %v4382_v21 = vpack.c.bf16 %v907_v11, %v906_v54 }
 0x1a1   : > { %578 = vst [vmem:[#allocation2 + $0x38] sm:$0xff] %v4340_v33  ;;  %v593_v40 = vshrl.u32 %v4340_v33, 16  ;;  %v596_v41 = vshll.u32 %v4340_v33, 16  ;;  %v514_v42 = vadd.f32 %v3206_v36, %v4333_v17  ;;  %v505_v43 = vpop.f32.mrb[5].mxu0 }
 0x1a2   : > { %v586_v45 = vshrl.u32 %v4342_v35, 16  ;;  %v589_v46 = vshll.u32 %v4342_v35, 16  ;;  %v506_v47 = vadd.f32 %v4333_v17, %v505_v43  ;;  %v3207_v48 = vpop.f32.mrb[6].mxu0  ;;  %1408 = vmatprep.mubr.bf16.mxu1 %v4342_v35  ;;  %v658_v43 = vld [vmem:[#allocation2 + $0x48] sm:$0xff] }
 0x1a3   : > { %v595_v49 = vrot.slane %v593_v40, 7  ;;  %v705_v51 = vrot.slane %v596_v41, 1  ;;  %v517_v52 = vadd.f32 %v3207_v48, %v4333_v17  ;;  %v508_v53 = vpop.f32.mrb[7].mxu0  ;;  %v558_v60 = vmax.f32 %v514_v42, 0.0 }
 0x1a4   : > { %v588_v58 = vrot.slane %v586_v45, 7  ;;  %v703_v59 = vrot.slane %v589_v46, 1  ;;  %v509_v61 = vadd.f32 %v4333_v17, %v508_v53  ;;  %v556_v6 = vmax.f32 %v506_v47, 0.0 }
 0x1a5   : > { %v598_v62 = vor.u32 %v596_v41, %v595_v49  ;;  %v706_v63 = vor.u32 %v705_v51, %v593_v40  ;;  %v559_v2 = vmax.f32 %v517_v52, 0.0  ;;  %v914_v51 = vshll.u32 %v4382_v21, 16 }
 0x1a6   : > { %v591_v4 = vor.u32 %v589_v46, %v588_v58  ;;  %v704_v5 = vor.u32 %v703_v59, %v586_v45  ;;  %v557_v7 = vmax.f32 %v509_v61, 0.0  ;;  %v911_v46 = vshrl.u32 %v4382_v21, 16 }
 0x1a7   : > { %v656_v8 = vsel %vm4355_vm6, %v598_v62, %v655_v55  ;;  %v733_v9 = vsel %vm4362_vm7, %v706_v63, %v732_v57  ;;  %v4371_v10 = vpack.c.bf16 %v559_v2, %v558_v60 }
 0x1a8   : > { %657 = vst [vmem:[#allocation2 + $0x30] sm:$0xff] %v656_v8  ;;  %734 = vst [vmem:[#allocation2 + $0x40] sm:$0xff] %v733_v9  ;;  %v653_v12 = vsel %vm4355_vm6, %v591_v4, %v652_v0  ;;  %v730_v13 = vsel %vm4362_vm7, %v704_v5, %v729_v1  ;;  %v4377_v14 = vpack.c.bf16 %v557_v7, %v556_v6  ;;  %v3210_v15 = vpop.f32.mrb[8].mxu0  ;;  %v913_v58 = vrot.slane %v911_v46, 7  ;;  %v918_v5 = vld [vmem:[#allocation2] sm:$0xff] }
 0x1a9   : > { %654 = vst [vmem:[#allocation2 + $0x18] sm:$0xff] %v653_v12  ;;  %731 = vst [vmem:[#allocation2 + $0x28] sm:$0xff] %v730_v13  ;;  %v607_v16 = vshrl.u32 %v4371_v10, 16  ;;  %v610_v18 = vshll.u32 %v4371_v10, 16  ;;  %v530_v19 = vadd.f32 %v3210_v15, %v4333_v17  ;;  %v521_v20 = vpop.f32.mrb[9].mxu0  ;;  %v924_v9 = vrot.slane %v914_v51, 1 }
 0x1aa   : > { %v600_v22 = vshrl.u32 %v4377_v14, 16  ;;  %v603_v23 = vshll.u32 %v4377_v14, 16  ;;  %v522_v24 = vadd.f32 %v4333_v17, %v521_v20  ;;  %v3211_v25 = vpop.f32.mrb[10].mxu0  ;;  %v916_v8 = vor.u32 %v914_v51, %v913_v58  ;;  %v667_v20 = vld [vmem:[#allocation2 + $0x90] sm:$0xff]  ;;  %v3655_v51 = vld [vmem:[#allocation8 + $0x48] sm:$0xff]  }
 0x1ab   : > { %v609_v26 = vrot.slane %v607_v16, 7  ;;  %v709_v27 = vrot.slane %v610_v18, 1  ;;  %v562_v28 = vmax.f32 %v530_v19, 0.0  ;;  %v533_v29 = vadd.f32 %v3211_v25, %v4333_v17  ;;  %v524_v30 = vpop.f32.mrb[11].mxu0 }
 0x1ac   : > { %v602_v36 = vrot.slane %v600_v22, 7  ;;  %v707_v37 = vrot.slane %v603_v23, 1  ;;  %v560_v38 = vmax.f32 %v522_v24, 0.0  ;;  %v525_v39 = vadd.f32 %v4333_v17, %v524_v30  ;;  %v664_v30 = vld [vmem:[#allocation2 + $0x78] sm:$0xff] }
 0x1ad   : > { %v612_v41 = vor.u32 %v610_v18, %v609_v26  ;;  %v710_v42 = vor.u32 %v709_v27, %v607_v16  ;;  %v563_v45 = vmax.f32 %v533_v29, 0.0  ;;  %v927_v16 = vld [vmem:[#allocation2 + $0x10] sm:$0xff]  ;;  %v919_v25 = vsel %vm4355_vm6, %v916_v8, %v918_v5 }
 0x1ae   : > { %v605_v47 = vor.u32 %v603_v23, %v602_v36  ;;  %v708_v48 = vor.u32 %v707_v37, %v600_v22  ;;  %v561_v49 = vmax.f32 %v525_v39, 0.0  ;;  %v744_v22 = vld [vmem:[#allocation2 + $0xa0] sm:$0xff]  ;;  %v925_v26 = vor.u32 %v924_v9, %v911_v46  ;;  %920 = vst [vmem:[#allocation2] sm:$0xff] %v919_v25  ;;  %v3656_v9 = vld [vmem:[#allocation8 + $0x8] sm:$0xff]  }
 0x1af   : > { %v682_v52 = vld [vmem:[#allocation2 + $0x30] sm:$0x1]  ;;  %v759_v53 = vld [vmem:[#allocation2 + $0x40] sm:$0x80]  ;;  %v662_v54 = vsel %vm4355_vm6, %v612_v41, %v661_v32  ;;  %v739_v55 = vsel %vm4362_vm7, %v710_v42, %v738_v34  ;;  %v4407_v57 = vpack.c.bf16 %v563_v45, %v562_v28  ;;  %v741_v32 = vld [vmem:[#allocation2 + $0x88] sm:$0xff] }
 0x1b0   : > { %v683_v59 = vsel %vm4390_vm10, 0, %v682_v52  ;;  %v760_v60 = vsel %vm4397_vm11, 0, %v759_v53  ;;  %v679_v61 = vld [vmem:[#allocation2 + $0x18] sm:$0x1]  ;;  %v756_v62 = vld [vmem:[#allocation2 + $0x28] sm:$0x80]  ;;  %v659_v63 = vsel %vm4355_vm6, %v605_v47, %v658_v43  ;;  %v736_v0 = vsel %vm4362_vm7, %v708_v48, %v735_v44 }
 0x1b1   : > { %663 = vst [vmem:[#allocation2 + $0x60] sm:$0xff] %v662_v54  ;;  %740 = vst [vmem:[#allocation2 + $0x70] sm:$0xff] %v739_v55  ;;  %v680_v1 = vsel %vm4390_vm10, 0, %v679_v61  ;;  %v757_v2 = vsel %vm4397_vm11, 0, %v756_v62  ;;  %v621_v3 = vshrl.u32 %v4407_v57, 16  ;;  %v624_v4 = vshll.u32 %v4407_v57, 16 }
 0x1b2   : > { %684 = vst [vmem:[#allocation2 + $0x30] sm:$0x1] %v683_v59  ;;  %761 = vst [vmem:[#allocation2 + $0x40] sm:$0x80] %v760_v60  ;;  %v3214_v6 = vpop.f32.mrb[12].mxu0  ;;  %v4423_v7 = vpack.c.bf16 %v561_v49, %v560_v38  ;;  %v928_v38 = vsel %vm4362_vm7, %v925_v26, %v927_v16  ;;  %v3654_v41 = vld [vmem:[#allocation8] sm:$0xff]  }
 0x1b3   : > { %660 = vst [vmem:[#allocation2 + $0x48] sm:$0xff] %v659_v63  ;;  %737 = vst [vmem:[#allocation2 + $0x58] sm:$0xff] %v736_v0  ;;  %v4426_v11 = vadd.f32 %v3214_v6, %v4333_v17  ;;  %v537_v12 = vpop.f32.mrb[13].mxu0  ;;  %v623_v13 = vrot.slane %v621_v3, 7  ;;  %v713_v15 = vrot.slane %v624_v4, 1  ;;  %v3670_v42 = vld [vmem:[#allocation8 + $0x180] sm:$0xff]  }
 0x1b4   : > { %681 = vst [vmem:[#allocation2 + $0x18] sm:$0x1] %v680_v1  ;;  %758 = vst [vmem:[#allocation2 + $0x28] sm:$0x80] %v757_v2  ;;  %v538_v18 = vadd.f32 %v4333_v17, %v537_v12  ;;  %v3215_v19 = vpop.f32.mrb[14].mxu0  ;;  %v614_v23 = vshrl.u32 %v4423_v7, 16 }
 0x1b5   : > { %v617_v24 = vshll.u32 %v4423_v7, 16  ;;  %v540_v27 = vpop.f32.mrb[15].mxu0  ;;  %v626_v28 = vor.u32 %v624_v4, %v623_v13  ;;  %v714_v29 = vor.u32 %v713_v15, %v621_v3  ;;  %v566_v34 = vmax.f32 %v4426_v11, 0.0  ;;  %v4445_v43 = vld [vmem:[%s4808_s2] ss:$0 sm:$0xff]  ;;  %929 = vst [vmem:[#allocation2 + $0x10] sm:$0xff] %v928_v38 }
 0x1b6   : > { %v616_v36 = vrot.slane %v614_v23, 7  ;;  %v549_v39 = vadd.f32 %v3215_v19, %v4333_v17  ;;  %v564_v48 = vmax.f32 %v538_v18, 0.0  ;;  %v541_v49 = vadd.f32 %v4333_v17, %v540_v27  ;;  %v3672_v52 = vld [vmem:[#allocation8 + $0x1c8] sm:$0xff]   ;;  %v921_v13 = vld [vmem:[#allocation2] sm:$0x1] }
 0x1b7   : > { %v711_v37 = vrot.slane %v617_v24, 1  ;;  %v668_v46 = vsel %vm4355_vm6, %v626_v28, %v667_v20  ;;  %v745_v47 = vsel %vm4362_vm7, %v714_v29, %v744_v22  ;;  %v3657_v15 = vld [vmem:[#allocation8 + $0x50] sm:$0xff]   ;;  %v3673_v16 = vld [vmem:[#allocation8 + $0x188] sm:$0xff]   ;;  %v922_v19 = vsel %vm4390_vm10, 0, %v921_v13  ;;  %v3660_v13 = vld [vmem:[#allocation8 + $0x18] sm:$0xff]  }
 0x1b8   : > { %v688_v44 = vld [vmem:[#allocation2 + $0x60] sm:$0x1]  ;;  %v765_v45 = vld [vmem:[#allocation2 + $0x70] sm:$0x80]  ;;  %669 = vst [vmem:[#allocation2 + $0x90] sm:$0xff] %v668_v46  ;;  %746 = vst [vmem:[#allocation2 + $0xa0] sm:$0xff] %v745_v47  ;;  %v619_v59 = vor.u32 %v617_v24, %v616_v36 }
 0x1b9   : > { %v689_v53 = vsel %vm4390_vm10, 0, %v688_v44  ;;  %v766_v54 = vsel %vm4397_vm11, 0, %v765_v45  ;;  %v712_v60 = vor.u32 %v711_v37, %v614_v23  ;;  %v567_v62 = vmax.f32 %v549_v39, 0.0  ;;  %v4470_v4 = vld [vmem:[#allocation2 + $0x40] sm:$0xff]  ;;  %v1049_v5 = vpop.f32.mrb[16].mxu0  ;;  %v750_v39 = vld [vmem:[#allocation2 + $0xd0] sm:$0xff] }
 0x1ba   : > { %v685_v55 = vld [vmem:[#allocation2 + $0x48] sm:$0x1]  ;;  %v762_v58 = vld [vmem:[#allocation2 + $0x58] sm:$0x80]  ;;  %690 = vst [vmem:[#allocation2 + $0x60] sm:$0x1] %v689_v53  ;;  %v665_v2 = vsel %vm4355_vm6, %v619_v59, %v664_v30  ;;  %v1050_v11 = vadd.f32 %v4445_v43, %v1049_v5 }
 0x1bb   : > { %767 = vst [vmem:[#allocation2 + $0x70] sm:$0x80] %v766_v54  ;;  %v686_v61 = vsel %vm4390_vm10, 0, %v685_v55  ;;  %v763_v17 = vsel %vm4397_vm11, 0, %v762_v58  ;;  %v565_v63 = vmax.f32 %v541_v49, 0.0  ;;  %v4460_v0 = vld [vmem:[#allocation2 + $0x18] sm:$0xff]  ;;  %v742_v3 = vsel %vm4362_vm7, %v712_v60, %v741_v32 }
 0x1bc   : > { %v4462_v1 = vld [vmem:[#allocation2 + $0x28] sm:$0xff]  ;;  %687 = vst [vmem:[#allocation2 + $0x48] sm:$0x1] %v686_v61  ;;  %764 = vst [vmem:[#allocation2 + $0x58] sm:$0x80] %v763_v17  ;;  %1409 = vmatmul.mubr.bf16.vlgmr.msra.gmra.mrb[4].mxu1 %v4460_v0  ;;  %v4472_v6 = vpack.c.bf16 %v567_v62, %v566_v34  ;;  %v3254_v12 = vpop.f32.mrb[17].mxu0 }
 0x1bd   : > { %3272 = vmatprep.mubr.bf16.mxu0 %v4462_v1  ;;  %666 = vst [vmem:[#allocation2 + $0x78] sm:$0xff] %v665_v2  ;;  %743 = vst [vmem:[#allocation2 + $0x88] sm:$0xff] %v742_v3  ;;  %v4474_v8 = vpack.c.bf16 %v565_v63, %v564_v48  ;;  %1416 = vmatprep.mubr.bf16.mxu1 %v4340_v33  ;;  %v1052_v18 = vpop.f32.mrb[18].mxu0  ;;  %v3675_v24 = vld [vmem:[#allocation8 + $0x1d0] sm:$0xff]   ;;  %v930_v26 = vld [vmem:[#allocation2 + $0x10] sm:$0x80] }
 0x1be   : > { %3273 = vmatmul.mubr.bf16.vlgmr.msra.gmra.mrb[20].mxu0 %v4470_v4  ;;  %3089 = vmatpush3.bf16.msra.mxu1 %v3670_v42  ;;  %v635_v20 = vshrl.u32 %v4472_v6, 16  ;;  %v638_v22 = vshll.u32 %v4472_v6, 16  ;;  %v3255_v25 = vpop.f32.mrb[19].mxu0  ;;  %923 = vst [vmem:[#allocation2] sm:$0x1] %v922_v19  ;;  %v673_v27 = vld [vmem:[#allocation2 + $0xc0] sm:$0xff]  ;;  %v1053_v32 = vadd.f32 %v4445_v43, %v1052_v18  ;;  %v1058_v42 = vstv %s936_s3 }
 0x1bf   : > { %3009 = vmatpush3.bf16.msra.mxu0 %v3654_v41  ;;  %v628_v23 = vshrl.u32 %v4474_v8, 16  ;;  %3090 = vmatprep.subr.bf16.mxu1 %v3672_v52  ;;  %v631_v28 = vshll.u32 %v4474_v8, 16  ;;  %v3658_v29 = vld [vmem:[#allocation8 + $0x10] sm:$0xff]   ;;  %v1056_v30 = vmax.f32 %v1050_v11, 0.0  ;;  %v694_v34 = vld [vmem:[#allocation2 + $0x90] sm:$0x1] }
 0x1c0   : > { %3010 = vmatprep.subr.bf16.mxu0 %v3655_v51  ;;  %v771_v36 = vld [vmem:[#allocation2 + $0xa0] sm:$0x80]  ;;  %v931_v37 = vsel %vm4397_vm11, 0, %v930_v26  ;;  %v637_v38 = vrot.slane %v635_v20, 7  ;;  %v670_v41 = vld [vmem:[#allocation2 + $0xa8] sm:$0xff]  ;;  %v695_v44 = vsel %vm4390_vm10, 0, %v694_v34 }
 0x1c1   : > { %v772_v45 = vsel %vm4397_vm11, 0, %v771_v36  ;;  %932 = vst [vmem:[#allocation2 + $0x10] sm:$0x80] %v931_v37  ;;  %v717_v46 = vrot.slane %v638_v22, 1  ;;  %v630_v47 = vrot.slane %v628_v23, 7  ;;  %v747_v48 = vld [vmem:[#allocation2 + $0xb8] sm:$0xff]  ;;  %v1059_v63 = vmul.f32 %v1058_v42, %v1056_v30 }
 0x1c2   : > { %v3659_v43 = vld [vmem:[#allocation8 + $0x58] sm:$0xff]   ;;  %3091 = vmatpush3.bf16.msra.mxu1 %v3673_v16  ;;  %v3676_v49 = vld [vmem:[#allocation8 + $0x190] sm:$0xff]   ;;  %696 = vst [vmem:[#allocation2 + $0x90] sm:$0x1] %v695_v44  ;;  %773 = vst [vmem:[#allocation2 + $0xa0] sm:$0x80] %v772_v45  ;;  %v640_v51 = vor.u32 %v638_v22, %v637_v38 }
 0x1c3   : > { %3011 = vmatpush3.bf16.msra.mxu0 %v3656_v9  ;;  %v715_v52 = vrot.slane %v631_v28, 1  ;;  %v4493_v53 = vld [vmem:[#allocation2 + $0x30] sm:$0xff]  ;;  %v4495_v54 = vld [vmem:[#allocation2 + $0x58] sm:$0xff]  ;;  %3092 = vmatprep.subr.bf16.mxu1 %v3675_v24  ;;  %v3677_v55 = vld [vmem:[#allocation8 + $0x1d8] sm:$0xff]   ;;  %v1057_v58 = vmax.f32 %v1053_v32, 0.0  ;;  %v718_v61 = vor.u32 %v717_v46, %v635_v20  ;;  %v633_v17 = vor.u32 %v631_v28, %v630_v47  ;;  %s4863_s3 = sld [smem:[#allocation19_spill]] }
 0x1c4   : > { %3012 = vmatprep.subr.bf16.mxu0 %v3657_v15  ;;  %v691_v59 = vld [vmem:[#allocation2 + $0x78] sm:$0x1]  ;;  %v768_v60 = vld [vmem:[#allocation2 + $0x88] sm:$0x80]  ;;  %1417 = vmatmul.mubr.bf16.gmra.mrb[8].mxu1 %v4493_v53  ;;  %v4499_v62 = vld [vmem:[#allocation2 + $0x70] sm:$0xff]  ;;  %v674_v5 = vsel %vm4355_vm6, %v640_v51, %v673_v27 }
 0x1c5   : > { %3276 = vmatprep.mubr.bf16.mxu0 %v4495_v54  ;;  %v692_v2 = vsel %vm4390_vm10, 0, %v691_v59  ;;  %v769_v3 = vsel %vm4397_vm11, 0, %v768_v60  ;;  %v716_v9 = vor.u32 %v715_v52, %v628_v23  ;;  %1424 = vmatprep.mubr.bf16.mxu1 %v4377_v14  ;;  %675 = vst [vmem:[#allocation2 + $0xc0] sm:$0xff] %v674_v5  ;;  %v751_v11 = vsel %vm4362_vm7, %v718_v61, %v750_v39  ;;  %v3678_v15 = vld [vmem:[#allocation8 + $0x198] sm:$0xff]   ;;  %v3661_v19 = vld [vmem:[#allocation8 + $0x60] sm:$0xff]   ;;  %v3663_v27 = vld [vmem:[#allocation8 + $0x68] sm:$0xff]  }
 0x1c6   : > { %3277 = vmatmul.mubr.bf16.gmra.mrb[24].mxu0 %v4499_v62  ;;  %693 = vst [vmem:[#allocation2 + $0x78] sm:$0x1] %v692_v2  ;;  %770 = vst [vmem:[#allocation2 + $0x88] sm:$0x80] %v769_v3  ;;  %v671_v12 = vsel %vm4355_vm6, %v633_v17, %v670_v41  ;;  %3093 = vmatpush3.bf16.msra.mxu1 %v3676_v49  ;;  %v1060_v16 = vmul.f32 %v1058_v42, %v1057_v58  ;;  %v3680_v20 = vld [vmem:[#allocation8 + $0x1e0] sm:$0xff]   ;;  %v4519_v26 = vld [vmem:[#allocation2 + $0x48] sm:$0xff] }
 0x1c7   : > { %3013 = vmatpush3.bf16.msra.mxu0 %v3658_v29  ;;  %752 = vst [vmem:[#allocation2 + $0xd0] sm:$0xff] %v751_v11  ;;  %672 = vst [vmem:[#allocation2 + $0xa8] sm:$0xff] %v671_v12  ;;  %v748_v18 = vsel %vm4362_vm7, %v716_v9, %v747_v48  ;;  %3094 = vmatprep.subr.bf16.mxu1 %v3677_v55  ;;  %v3662_v23 = vld [vmem:[#allocation8 + $0x20] sm:$0xff]   ;;  %v3664_v28 = vld [vmem:[#allocation8 + $0x28] sm:$0xff]  }
 0x1c8   : > { %3014 = vmatprep.subr.bf16.mxu0 %v3659_v43  ;;  %749 = vst [vmem:[#allocation2 + $0xb8] sm:$0xff] %v748_v18  ;;  %v4515_v22 = vpack.c.bf16 %v1060_v16, %v1059_v63  ;;  %v3681_v29 = vld [vmem:[#allocation8 + $0x1a0] sm:$0xff]   ;;  %v3682_v30 = vld [vmem:[#allocation8 + $0x1e8] sm:$0xff]   ;;  %v1081_v39 = vld [vmem:[#allocation2 + $0xe8] sm:$0xff] }
 0x1c9   : > { %v1072_v34 = vld [vmem:[#allocation2 + $0xd8] sm:$0xff]  ;;  %v4528_v45 = vld [vmem:[#allocation2 + $0xa0] sm:$0xff]  ;;  %v3667_v63 = vld [vmem:[#allocation8 + $0x78] sm:$0xff]   ;;  %p4865_p6 = scmp.ne.s32.totalorder %s4863_s3, 0 }
 0x1ca   : > { %3095 = vmatpush3.bf16.msra.mxu1 %v3678_v15  ;;  %v1065_v24 = vshrl.u32 %v4515_v22, 16  ;;  %v1068_v25 = vshll.u32 %v4515_v22, 16  ;;  %v3665_v51 = vld [vmem:[#allocation8 + $0x70] sm:$0xff]   ;;  %v3683_v59 = vld [vmem:[#allocation8 + $0x1a8] sm:$0xff]   ;;  %v3668_v2 = vld [vmem:[#allocation8 + $0x38] sm:$0xff]  }
 0x1cb   : > { %3015 = vmatpush3.bf16.msra.mxu0 %v3660_v13  ;;  %3096 = vmatprep.subr.bf16.mxu1 %v3680_v20  ;;  %v3666_v60 = vld [vmem:[#allocation8 + $0x30] sm:$0xff]   ;;  %v3671_v3 = vld [vmem:[#allocation8 + $0x80] sm:$0xff]   ;;  %v3688_v13 = vld [vmem:[#allocation8 + $0x1b8] sm:$0xff]   ;;  %p3825_p8 = pnand %p3824_p13, %p4865_p6 }
 0x1cc   : > { %3016 = vmatprep.subr.bf16.mxu0 %v3661_v19  ;;  %1425 = vmatmul.mubr.bf16.gmra.mrb[12].mxu1 %v4519_v26  ;;  %v1067_v32 = vrot.slane %v1065_v24, 7  ;;  %v1078_v36 = vrot.slane %v1068_v25, 1  ;;  %v700_v37 = vld [vmem:[#allocation2 + $0xc0] sm:$0x1]  ;;  %v3674_v19 = vld [vmem:[#allocation8 + $0x88] sm:$0xff]   ;;  %v1174_v40 = vld [vmem:[#allocation2 + $0x90] sm:$0xff] }
 0x1cd   : > { %v4522_v38 = vld [vmem:[#allocation2 + $0x88] sm:$0xff]  ;;  %1432 = vmatprep.mubr.bf16.mxu1 %v4371_v10  ;;  %v701_v41 = vsel %vm4390_vm10, 0, %v700_v37  ;;  %v3685_v61 = vld [vmem:[#allocation8 + $0x1f0] sm:$0xff]   ;;  %v1171_v18 = vld [vmem:[#allocation2 + $0x78] sm:$0xff]  ;;  %p3826_p12 = pneg %p3825_p8 }
 0x1ce   : > { %v777_v42 = vld [vmem:[#allocation2 + $0xd0] sm:$0x80]  ;;  %v697_v44 = vld [vmem:[#allocation2 + $0xa8] sm:$0x1]  ;;  %3280 = vmatprep.mubr.bf16.mxu0 %v4522_v38  ;;  %v1070_v46 = vor.u32 %v1068_v25, %v1067_v32  ;;  %v1079_v47 = vor.u32 %v1078_v36, %v1065_v24  ;;  %702 = vst [vmem:[#allocation2 + $0xc0] sm:$0x1] %v701_v41  ;;  %3097 = vmatpush3.bf16.msra.mxu1 %v3681_v29 }
 0x1cf   : > { %3017 = vmatpush3.bf16.msra.mxu0 %v3662_v23  ;;  %v778_v48 = vsel %vm4397_vm11, 0, %v777_v42  ;;  %v698_v43 = vsel %vm4390_vm10, 0, %v697_v44  ;;  %v774_v49 = vld [vmem:[#allocation2 + $0xb8] sm:$0x80]  ;;  %3098 = vmatprep.subr.bf16.mxu1 %v3682_v30  ;;  %v4541_v17 = vld [vmem:[#allocation2 + $0x60] sm:$0xff]  ;;  %v3689_v24 = vld [vmem:[#allocation8 + $0xa0] sm:$0xff]  }
 0x1d0   : > { %3281 = vmatmul.mubr.bf16.gmra.mrb[28].mxu0 %v4528_v45  ;;  %3018 = vmatprep.subr.bf16.mxu0 %v3663_v27  ;;  %779 = vst [vmem:[#allocation2 + $0xd0] sm:$0x80] %v778_v48  ;;  %699 = vst [vmem:[#allocation2 + $0xa8] sm:$0x1] %v698_v43  ;;  %v775_v52 = vsel %vm4397_vm11, 0, %v774_v49  ;;  %v1073_v55 = vsel %vm4355_vm6, %v1070_v46, %v1072_v34  ;;  %v1082_v58 = vsel %vm4362_vm7, %v1079_v47, %v1081_v39  ;;  %v1087_v31 = vld [vmem:[#allocation2] sm:$0xff] }
 0x1d1   : > { %776 = vst [vmem:[#allocation2 + $0xb8] sm:$0x80] %v775_v52  ;;  %1074 = vst [vmem:[#allocation2 + $0xd8] sm:$0xff] %v1073_v55  ;;  %v3679_v20 = vld [vmem:[#allocation8 + $0x90] sm:$0xff]   ;;  %v3692_v27 = vld [vmem:[#allocation8 + $0xb8] sm:$0xff]  }
 0x1d2   : > { %1083 = vst [vmem:[#allocation2 + $0xe8] sm:$0xff] %v1082_v58  ;;  %3099 = vmatpush3.bf16.msra.mxu1 %v3683_v59  ;;  %v3701_v29 = vld [vmem:[#allocation9] sm:$0xff]   ;;  %v3703_v30 = vld [vmem:[#allocation9 + $0x10] sm:$0xff]   ;;  %v3706_v32 = vld [vmem:[#allocation9 + $0x28] sm:$0xff]  }
 0x1d3   : > { %3019 = vmatpush3.bf16.msra.mxu0 %v3664_v28  ;;  %3100 = vmatprep.subr.bf16.mxu1 %v3685_v61  ;;  %v3693_v28 = vld [vmem:[#allocation8 + $0x200] sm:$0xff]   ;;  %v3707_v34 = vld [vmem:[#allocation9 + $0x30] sm:$0xff]   ;;  %v3708_v49 = vld [vmem:[#allocation9 + $0x38] sm:$0xff]  }
 0x1d4   : > { %3020 = vmatprep.subr.bf16.mxu0 %v3665_v51  ;;  %1433 = vmatmul.mubr.bf16.gmra.mrb[16].mxu1 %v4541_v17 }
 0x1d5   : > { %1440 = vmatprep.mubr.bf16.mxu1 %v4423_v7  ;;  %v1180_v25 = vld [vmem:[#allocation2 + $0xc0] sm:$0xff] }
 0x1d6   : > { %3101 = vmatpush3.bf16.msra.mxu1 %v3686_v50 }
 0x1d7   : > { %3021 = vmatpush3.bf16.msra.mxu0 %v3666_v60  ;;  %v4548_v12 = vld [vmem:[#allocation2 + $0xd0] sm:$0xff]  ;;  %3102 = vmatprep.subr.bf16.mxu1 %v3687_v56  ;;  %v1177_v23 = vld [vmem:[#allocation2 + $0xa8] sm:$0xff] }
 0x1d8   : > { %3022 = vmatprep.subr.bf16.mxu0 %v3667_v63  ;;  %v4545_v5 = vld [vmem:[#allocation2 + $0xb8] sm:$0xff] }
 0x1d9   : > { %v1075_v9 = vld [vmem:[#allocation2 + $0xd8] sm:$0x1]  ;;  %v1084_v11 = vld [vmem:[#allocation2 + $0xe8] sm:$0x80]  ;;  %3284 = vmatprep.mubr.bf16.mxu0 %v4545_v5 }
 0x1da   : > { %v1076_v15 = vsel %vm4390_vm10, 0, %v1075_v9  ;;  %v1085_v16 = vsel %vm4397_vm11, 0, %v1084_v11  ;;  %3285 = vmatmul.mubr.bf16.gmra.mrb[32].mxu0 %v4548_v12  ;;  %3103 = vmatpush3.bf16.msra.mxu1 %v3688_v13 }
 0x1db   : > { %1077 = vst [vmem:[#allocation2 + $0xd8] sm:$0x1] %v1076_v15  ;;  %1086 = vst [vmem:[#allocation2 + $0xe8] sm:$0x80] %v1085_v16  ;;  %1746 = vmatprep.mubr.bf16.mxu0 %v4382_v21  ;;  %3023 = vmatpush3.bf16.msra.mxu0 %v3668_v2  ;;  %v3684_v21 = vld [vmem:[#allocation8 + $0x98] sm:$0xff]  }
 0x1dc   : > { %1441 = vmatmul.mubr.bf16.gmra.mrb[20].mxu1 %v1171_v18  ;;  %3288 = vmatprep.subr.bf16.mxu0 %v3671_v3 }
 0x1dd   : > { %1448 = vmatprep.mubr.bf16.mxu1 %v4407_v57  ;;  %3352 = vmatprep.subr.bf16.mxu1 %v3701_v29 }
 0x1e2   : > { %1747 = vmatmul.mubr.bf16.vlgmr.msra.gmra.mrb[36].mxu0 %v1087_v31 }
 0x1e3   : > { %3289 = vmatpush3.bf16.msra.mxu0 %v3671_v3  ;;  %1754 = vmatprep.mubr.bf16.mxu0 %v4342_v35  ;;  %v3690_v35 = vld [vmem:[#allocation8 + $0xa8] sm:$0xff]  }
 0x1e4   : > { %1449 = vmatmul.mubr.bf16.gmra.mrb[24].mxu1 %v1174_v40  ;;  %3290 = vmatprep.subr.bf16.mxu0 %v3674_v19 }
 0x1e5   : > { %1456 = vmatprep.mubr.bf16.mxu1 %v4474_v8 }
 0x1e7   : > { %3291 = vmatpush3.bf16.msra.mxu0 %v3674_v19 }
 0x1e8   : > { %3292 = vmatprep.subr.bf16.mxu0 %v3679_v20 }
 0x1ea   : > { %1755 = vmatmul.mubr.bf16.gmra.mrb[40].mxu0 %v4460_v0  ;;  %v1910_v0 = vld [vmem:[#allocation2 + $0x38] sm:$0xff] }
 0x1eb   : > { %1762 = vmatprep.mubr.bf16.mxu0 %v4340_v33  ;;  %3293 = vmatpush3.bf16.msra.mxu0 %v3679_v20  ;;  %v3691_v33 = vld [vmem:[#allocation8 + $0xb0] sm:$0xff]  }
 0x1ec   : > { %1457 = vmatmul.mubr.bf16.gmra.mrb[28].mxu1 %v1177_v23  ;;  %3294 = vmatprep.subr.bf16.mxu0 %v3684_v21 }
 0x1ed   : > { %1464 = vmatprep.mubr.bf16.mxu1 %v4472_v6 }
 0x1ef   : > { %3295 = vmatpush3.bf16.msra.mxu0 %v3684_v21 }
 0x1f0   : > { %3296 = vmatprep.subr.bf16.mxu0 %v3689_v24 }
 0x1f2   : > { %1763 = vmatmul.mubr.bf16.gmra.mrb[44].mxu0 %v4493_v53 }
 0x1f3   : > { %1770 = vmatprep.mubr.bf16.mxu0 %v4377_v14  ;;  %3297 = vmatpush3.bf16.msra.mxu0 %v3689_v24 }
 0x1f4   : > { %1465 = vmatmul.mubr.bf16.gmra.mrb[32].mxu1 %v1180_v25  ;;  %3298 = vmatprep.subr.bf16.mxu0 %v3690_v35 }
 0x1f5   : > { %2158 = vmatprep.mubr.bf16.mxu1 %v1910_v0 }
 0x1f7   : > { %3299 = vmatpush3.bf16.msra.mxu0 %v3690_v35 }
 0x1f8   : > { %3300 = vmatprep.subr.bf16.mxu0 %v3691_v33 }
 0x1fa   : > { %1771 = vmatmul.mubr.bf16.gmra.mrb[48].mxu0 %v4519_v26 }
 0x1fb   : > { %1778 = vmatprep.mubr.bf16.mxu0 %v4371_v10  ;;  %3301 = vmatpush3.bf16.msra.mxu0 %v3691_v33 }
 0x1fc   : > { %2159 = vmatmul.mubr.bf16.vlgmr.msra.gmra.mrb[36].mxu1 %v4493_v53  ;;  %3302 = vmatprep.subr.bf16.mxu0 %v3692_v27  ;;  %v1930_v53 = vld [vmem:[#allocation2 + $0xd8] sm:$0xff] }
 0x1fd   : > { %2166 = vmatprep.mubr.bf16.mxu1 %v4377_v14  ;;  %v1089_v14 = vld [vmem:[#allocation2 + $0x10] sm:$0xff]  ;;  %3353 = vmatpush3.bf16.msra.mxu1 %v3701_v29 }
 0x1ff   : > { %3303 = vmatpush3.bf16.msra.mxu0 %v3692_v27 }
 0x200   : > { %3320 = vmatprep.subr.bf16.mxu0 %v3693_v28 }
 0x202   : > { %1779 = vmatmul.mubr.bf16.gmra.mrb[52].mxu0 %v4541_v17 }
 0x203   : > { %1786 = vmatprep.mubr.bf16.mxu0 %v4423_v7 }
 0x204   : > { %2167 = vmatmul.mubr.bf16.gmra.mrb[40].mxu1 %v4519_v26  ;;  %v3700_v26 = vld [vmem:[#allocation8 + $0x238] sm:$0xff]  }
 0x205   : > { %2174 = vmatprep.mubr.bf16.mxu1 %v4371_v10  ;;  %v3694_v10 = vld [vmem:[#allocation8 + $0x208] sm:$0xff]  }
 0x20a   : > { %1787 = vmatmul.mubr.bf16.gmra.mrb[56].mxu0 %v1171_v18 }
 0x20b   : > { %1794 = vmatprep.mubr.bf16.mxu0 %v4407_v57 }
 0x20c   : > { %2175 = vmatmul.mubr.bf16.gmra.mrb[44].mxu1 %v4541_v17 }
 0x20d   : > { %2182 = vmatprep.mubr.bf16.mxu1 %v4423_v7  ;;  %v3695_v7 = vld [vmem:[#allocation8 + $0x210] sm:$0xff]  }
 0x212   : > { %1795 = vmatmul.mubr.bf16.gmra.mrb[60].mxu0 %v1174_v40 }
 0x213   : > { %1802 = vmatprep.mubr.bf16.mxu0 %v4474_v8 }
 0x214   : > { %2183 = vmatmul.mubr.bf16.gmra.mrb[48].mxu1 %v1171_v18 }
 0x215   : > { %2190 = vmatprep.mubr.bf16.mxu1 %v4407_v57  ;;  %v3696_v57 = vld [vmem:[#allocation8 + $0x218] sm:$0xff]  }
 0x21a   : > { %1803 = vmatmul.mubr.bf16.gmra.mrb[64].mxu0 %v1177_v23 }
 0x21b   : > { %3304 = vmatprep.mubr.bf16.mxu0 %v1089_v14 }
 0x21c   : > { %2191 = vmatmul.mubr.bf16.gmra.mrb[52].mxu1 %v1174_v40 }
 0x21d   : > { %2198 = vmatprep.mubr.bf16.mxu1 %v4474_v8  ;;  %v3697_v8 = vld [vmem:[#allocation8 + $0x220] sm:$0xff]  }
 0x222   : > { %3305 = vmatmul.mubr.bf16.vlgmr.msra.gmra.mrb[20].mxu0 %v4462_v1  ;;  %v3698_v1 = vld [vmem:[#allocation8 + $0x228] sm:$0xff]  }
 0x223   : > { %3321 = vmatpush3.bf16.msra.mxu0 %v3693_v28  ;;  %3308 = vmatprep.mubr.bf16.mxu0 %v4470_v4 }
 0x224   : > { %3322 = vmatprep.subr.bf16.mxu0 %v3694_v10  ;;  %2199 = vmatmul.mubr.bf16.gmra.mrb[56].mxu1 %v1177_v23 }
 0x225   : > { %2206 = vmatprep.mubr.bf16.mxu1 %v4472_v6  ;;  %v3699_v6 = vld [vmem:[#allocation8 + $0x230] sm:$0xff]  }
 0x227   : > { %3323 = vmatpush3.bf16.msra.mxu0 %v3694_v10 }
 0x228   : > { %3324 = vmatprep.subr.bf16.mxu0 %v3695_v7 }
 0x22a   : > { %3309 = vmatmul.mubr.bf16.gmra.mrb[24].mxu0 %v4495_v54 }
 0x22b   : > { %3325 = vmatpush3.bf16.msra.mxu0 %v3695_v7  ;;  %3312 = vmatprep.mubr.bf16.mxu0 %v4499_v62 }
 0x22c   : > { %3326 = vmatprep.subr.bf16.mxu0 %v3696_v57  ;;  %2207 = vmatmul.mubr.bf16.gmra.mrb[60].mxu1 %v1180_v25 }
 0x22d   : > { %2214 = vmatprep.mubr.bf16.mxu1 %v4515_v22  ;;  %v1932_v22 = vld [vmem:[#allocation2 + $0xe8] sm:$0xff] }
 0x22f   : > { %3327 = vmatpush3.bf16.msra.mxu0 %v3696_v57 }
 0x230   : > { %3328 = vmatprep.subr.bf16.mxu0 %v3697_v8 }
 0x232   : > { %3313 = vmatmul.mubr.bf16.gmra.mrb[28].mxu0 %v4522_v38 }
 0x233   : > { %3329 = vmatpush3.bf16.msra.mxu0 %v3697_v8  ;;  %3316 = vmatprep.mubr.bf16.mxu0 %v4528_v45 }
 0x234   : > { %3330 = vmatprep.subr.bf16.mxu0 %v3698_v1  ;;  %2215 = vmatmul.mubr.bf16.gmra.mrb[64].mxu1 %v1930_v53 }
 0x237   : > { %3331 = vmatpush3.bf16.msra.mxu0 %v3698_v1 }
 0x238   : > { %3332 = vmatprep.subr.bf16.mxu0 %v3699_v6 }
 0x23a   : > { %3317 = vmatmul.mubr.bf16.gmra.mrb[32].mxu0 %v4545_v5 }
 0x23b   : > { %3333 = vmatpush3.bf16.msra.mxu0 %v3699_v6  ;;  %3336 = vmatprep.mubr.bf16.mxu0 %v4470_v4  ;;  %v3702_v4 = vld [vmem:[#allocation9 + $0x8] sm:$0xff]  }
 0x23c   : > { %3334 = vmatprep.subr.bf16.mxu0 %v3700_v26  ;;  %3354 = vmatprep.subr.bf16.mxu1 %v3702_v4 }
 0x23d   : > { %3355 = vmatpush3.bf16.msra.mxu1 %v3702_v4 }
 0x23e   : > { %3356 = vmatprep.subr.bf16.mxu1 %v3703_v30 }
 0x23f   : > { %3335 = vmatpush3.bf16.msra.mxu0 %v3700_v26 }
 0x241   : > { %3357 = vmatpush3.bf16.msra.mxu1 %v3703_v30 }
 0x242   : > { %3337 = vmatmul.mubr.bf16.vlgmr.msra.gmra.mrb[20].mxu0 %v4495_v54  ;;  %v3704_v54 = vld [vmem:[#allocation9 + $0x18] sm:$0xff]  }
 0x243   : > { %3340 = vmatprep.mubr.bf16.mxu0 %v4499_v62  ;;  %3358 = vmatprep.subr.bf16.mxu1 %v3704_v54  ;;  %v3705_v62 = vld [vmem:[#allocation9 + $0x20] sm:$0xff]  }
 0x245   : > { %3359 = vmatpush3.bf16.msra.mxu1 %v3704_v54 }
 0x246   : > { %3360 = vmatprep.subr.bf16.mxu1 %v3705_v62 }
 0x249   : > { %3361 = vmatpush3.bf16.msra.mxu1 %v3705_v62 }
 0x24a   : > { %3341 = vmatmul.mubr.bf16.gmra.mrb[24].mxu0 %v4522_v38  ;;  %3362 = vmatprep.subr.bf16.mxu1 %v3706_v32 }
 0x24b   : > { %3344 = vmatprep.mubr.bf16.mxu0 %v4528_v45 }
 0x24d   : > { %3363 = vmatpush3.bf16.msra.mxu1 %v3706_v32 }
 0x24e   : > { %3364 = vmatprep.subr.bf16.mxu1 %v3707_v34 }
 0x251   : > { %3365 = vmatpush3.bf16.msra.mxu1 %v3707_v34 }
 0x252   : > { %3345 = vmatmul.mubr.bf16.gmra.mrb[28].mxu0 %v4545_v5  ;;  %3366 = vmatprep.subr.bf16.mxu1 %v3708_v49 }
 0x253   : > { %3348 = vmatprep.mubr.bf16.mxu0 %v4548_v12 }
 0x255   : > { %3367 = vmatpush3.bf16.msra.mxu1 %v3708_v49 }
 0x25a   : > { %3349 = vmatmul.mubr.bf16.gmra.mrb[32].mxu0 %v1932_v22 }
 0x28f   : > { %v2944_v36 = vpop.f32.mrb[4].mxu1 }
 0x290   : > { %v2945_v37 = vpop.f32.mrb[5].mxu1 }
 0x291   : > { %v2946_v38 = vadd.f32 %v2945_v37, %v2944_v36  ;;  %v2947_v39 = vpop.f32.mrb[6].mxu1 }
 0x292   : > { %v2948_v41 = vpop.f32.mrb[7].mxu1 }
 0x293   : > { %v2949_v42 = vadd.f32 %v2948_v41, %v2947_v39 }
 0x297   : > { %v2950_v44 = vpop.f32.mrb[8].mxu1 }
 0x298   : > { %v2951_v45 = vpop.f32.mrb[9].mxu1 }
 0x299   : > { %v2952_v46 = vadd.f32 %v2951_v45, %v2950_v44  ;;  %v2953_v47 = vpop.f32.mrb[10].mxu1 }
 0x29a   : > { %v2954_v48 = vpop.f32.mrb[11].mxu1 }
 0x29b   : > { %v2955_v43 = vadd.f32 %v2954_v48, %v2953_v47 }
 0x29f   : > { %v2956_v51 = vpop.f32.mrb[12].mxu1 }
 0x2a0   : > { %v2957_v52 = vpop.f32.mrb[13].mxu1 }
 0x2a1   : > { %v2958_v55 = vadd.f32 %v2957_v52, %v2956_v51  ;;  %v2959_v58 = vpop.f32.mrb[14].mxu1 }
 0x2a2   : > { %v2960_v59 = vpop.f32.mrb[15].mxu1 }
 0x2a3   : > { %v2961_v60 = vadd.f32 %v2960_v59, %v2959_v58 }
 0x2a7   : > { %v2962_v61 = vpop.f32.mrb[16].mxu1 }
 0x2a8   : > { %v2963_v17 = vpop.f32.mrb[17].mxu1 }
 0x2a9   : > { %v2964_v63 = vadd.f32 %v2963_v17, %v2962_v61  ;;  %v2965_v50 = vpop.f32.mrb[18].mxu1 }
 0x2aa   : > { %v2966_v56 = vpop.f32.mrb[19].mxu1 }
 0x2ab   : > { %v2967_v2 = vadd.f32 %v2966_v56, %v2965_v50 }
 0x2af   : > { %v2968_v3 = vpop.f32.mrb[20].mxu1 }
 0x2b0   : > { %v2969_v5 = vpop.f32.mrb[21].mxu1 }
 0x2b1   : > { %v4594_v9 = vadd.f32 %v2969_v5, %v2968_v3  ;;  %v2971_v11 = vpop.f32.mrb[22].mxu1 }
 0x2b2   : > { %v2972_v12 = vpop.f32.mrb[23].mxu1 }
 0x2b3   : > { %v4596_v13 = vadd.f32 %v2972_v12, %v2971_v11 }
 0x2b5   : > { %v3024_v15 = vpop.f32.mrb[36].mxu0 }
 0x2b6   : > { %v3025_v16 = vpop.f32.mrb[37].mxu0 }
 0x2b7   : > { %v3026_v18 = vadd.f32 %v3025_v16, %v3024_v15  ;;  %v3027_v19 = vpop.f32.mrb[38].mxu0  ;;  %v2974_v31 = vpop.f32.mrb[24].mxu1 }
 0x2b8   : > { %v3028_v40 = vpop.f32.mrb[39].mxu0  ;;  %v2975_v20 = vpop.f32.mrb[25].mxu1 }
 0x2b9   : > { %v3387_v21 = vadd.f32 %v3026_v18, %v2946_v38  ;;  %v3029_v23 = vadd.f32 %v3028_v40, %v3027_v19  ;;  %v4598_v24 = vadd.f32 %v2975_v20, %v2974_v31  ;;  %v2977_v35 = vpop.f32.mrb[26].mxu1 }
 0x2ba   : > { %v2978_v25 = vpop.f32.mrb[27].mxu1 }
 0x2bb   : > { %v3393_v0 = vadd.f32 %v3029_v23, %v2949_v42  ;;  %v4600_v33 = vadd.f32 %v2978_v25, %v2977_v35 }
 0x2bd   : > { %v3030_v27 = vpop.f32.mrb[40].mxu0 }
 0x2be   : > { %v3031_v28 = vpop.f32.mrb[41].mxu0 }
 0x2bf   : > { %v3032_v14 = vadd.f32 %v3031_v28, %v3030_v27  ;;  %v3033_v10 = vpop.f32.mrb[42].mxu0  ;;  %v2980_v7 = vpop.f32.mrb[28].mxu1 }
 0x2c0   : > { %v3034_v57 = vpop.f32.mrb[43].mxu0  ;;  %v2981_v8 = vpop.f32.mrb[29].mxu1 }
 0x2c1   : > { %v3384_v1 = vadd.f32 %v3032_v14, %v2952_v46  ;;  %v3035_v53 = vadd.f32 %v3034_v57, %v3033_v10  ;;  %v4602_v6 = vadd.f32 %v2981_v8, %v2980_v7  ;;  %v2983_v26 = vpop.f32.mrb[30].mxu1 }
 0x2c2   : > { %v2984_v22 = vpop.f32.mrb[31].mxu1 }
 0x2c3   : > { %v3390_v29 = vadd.f32 %v3035_v53, %v2955_v43  ;;  %v4604_v4 = vadd.f32 %v2984_v22, %v2983_v26 }
 0x2c5   : > { %v3036_v30 = vpop.f32.mrb[44].mxu0 }
 0x2c6   : > { %v3037_v54 = vpop.f32.mrb[45].mxu0 }
 0x2c7   : > { %v3038_v62 = vadd.f32 %v3037_v54, %v3036_v30  ;;  %v3039_v32 = vpop.f32.mrb[46].mxu0  ;;  %v2986_v34 = vpop.f32.mrb[32].mxu1 }
 0x2c8   : > { %v3040_v36 = vpop.f32.mrb[47].mxu0  ;;  %v2987_v37 = vpop.f32.mrb[33].mxu1 }
 0x2c9   : > { %v3399_v38 = vadd.f32 %v3038_v62, %v2958_v55  ;;  %v3041_v39 = vadd.f32 %v3040_v36, %v3039_v32  ;;  %v4606_v41 = vadd.f32 %v2987_v37, %v2986_v34  ;;  %v2989_v42 = vpop.f32.mrb[34].mxu1 }
 0x2ca   : > { %v2990_v44 = vpop.f32.mrb[35].mxu1 }
 0x2cb   : > { %v3405_v45 = vadd.f32 %v3041_v39, %v2961_v60  ;;  %v4608_v46 = vadd.f32 %v2990_v44, %v2989_v42 }
 0x2cd   : > { %v3042_v47 = vpop.f32.mrb[48].mxu0 }
 0x2ce   : > { %v3043_v48 = vpop.f32.mrb[49].mxu0 }
 0x2cf   : > { %v3044_v43 = vadd.f32 %v3043_v48, %v3042_v47  ;;  %v3045_v49 = vpop.f32.mrb[50].mxu0  ;;  %v3104_v51 = vpop.f32.mrb[36].mxu1 }
 0x2d0   : > { %v3046_v52 = vpop.f32.mrb[51].mxu0  ;;  %v3105_v58 = vpop.f32.mrb[37].mxu1 }
 0x2d1   : > { %v3396_v59 = vadd.f32 %v3044_v43, %v2964_v63  ;;  %v3047_v61 = vadd.f32 %v3046_v52, %v3045_v49  ;;  %v3106_v17 = vadd.f32 %v3105_v58, %v3104_v51  ;;  %v3107_v50 = vpop.f32.mrb[38].mxu1 }
 0x2d2   : > { %v3108_v55 = vpop.f32.mrb[39].mxu1 }
 0x2d3   : > { %v3402_v56 = vadd.f32 %v3047_v61, %v2967_v2  ;;  %v3109_v3 = vadd.f32 %v3108_v55, %v3107_v50  ;;  %v4610_v5 = vadd.f32 %v3387_v21, %v3106_v17 }
 0x2d5   : > { %v3048_v11 = vpop.f32.mrb[52].mxu0  ;;  %v4612_v60 = vadd.f32 %v3393_v0, %v3109_v3 }
 0x2d6   : > { %v3049_v12 = vpop.f32.mrb[53].mxu0 }
 0x2d7   : > { %v3050_v15 = vadd.f32 %v3049_v12, %v3048_v11  ;;  %v3051_v16 = vpop.f32.mrb[54].mxu0  ;;  %v3110_v18 = vpop.f32.mrb[40].mxu1 }
 0x2d8   : > { %v3052_v19 = vpop.f32.mrb[55].mxu0  ;;  %v3111_v31 = vpop.f32.mrb[41].mxu1 }
 0x2d9   : > { %v3411_v40 = vadd.f32 %v3050_v15, %v4594_v9  ;;  %v3053_v63 = vadd.f32 %v3052_v19, %v3051_v16  ;;  %v3112_v20 = vadd.f32 %v3111_v31, %v3110_v18  ;;  %v3113_v23 = vpop.f32.mrb[42].mxu1 }
 0x2da   : > { %v3114_v35 = vpop.f32.mrb[43].mxu1 }
 0x2db   : > { %v3417_v2 = vadd.f32 %v3053_v63, %v4596_v13  ;;  %v3115_v25 = vadd.f32 %v3114_v35, %v3113_v23  ;;  %v4616_v21 = vadd.f32 %v3384_v1, %v3112_v20 }
 0x2dd   : > { %v3054_v27 = vpop.f32.mrb[56].mxu0  ;;  %v4618_v0 = vadd.f32 %v3390_v29, %v3115_v25 }
 0x2de   : > { %v3055_v28 = vpop.f32.mrb[57].mxu0 }
 0x2df   : > { %v3056_v14 = vadd.f32 %v3055_v28, %v3054_v27  ;;  %v3057_v10 = vpop.f32.mrb[58].mxu0  ;;  %v3116_v7 = vpop.f32.mrb[44].mxu1 }
 0x2e0   : > { %v3058_v57 = vpop.f32.mrb[59].mxu0  ;;  %v3117_v8 = vpop.f32.mrb[45].mxu1 }
 0x2e1   : > { %v3408_v9 = vadd.f32 %v3056_v14, %v4598_v24  ;;  %v3059_v53 = vadd.f32 %v3058_v57, %v3057_v10  ;;  %v3118_v26 = vadd.f32 %v3117_v8, %v3116_v7  ;;  %v3119_v22 = vpop.f32.mrb[46].mxu1 }
 0x2e2   : > { %v3120_v30 = vpop.f32.mrb[47].mxu1 }
 0x2e3   : > { %v3414_v13 = vadd.f32 %v3059_v53, %v4600_v33  ;;  %v3121_v54 = vadd.f32 %v3120_v30, %v3119_v22  ;;  %v4622_v1 = vadd.f32 %v3399_v38, %v3118_v26 }
 0x2e5   : > { %v3060_v62 = vpop.f32.mrb[60].mxu0  ;;  %v4624_v29 = vadd.f32 %v3405_v45, %v3121_v54 }
 0x2e6   : > { %v3061_v32 = vpop.f32.mrb[61].mxu0 }
 0x2e7   : > { %v3062_v34 = vadd.f32 %v3061_v32, %v3060_v62  ;;  %v3063_v36 = vpop.f32.mrb[62].mxu0  ;;  %v3122_v37 = vpop.f32.mrb[48].mxu1 }
 0x2e8   : > { %v3064_v39 = vpop.f32.mrb[63].mxu0  ;;  %v3123_v42 = vpop.f32.mrb[49].mxu1 }
 0x2e9   : > { %v3423_v24 = vadd.f32 %v3062_v34, %v4602_v6  ;;  %v3065_v44 = vadd.f32 %v3064_v39, %v3063_v36  ;;  %v3124_v47 = vadd.f32 %v3123_v42, %v3122_v37  ;;  %v3125_v48 = vpop.f32.mrb[50].mxu1 }
 0x2ea   : > { %v3126_v43 = vpop.f32.mrb[51].mxu1 }
 0x2eb   : > { %v3429_v33 = vadd.f32 %v3065_v44, %v4604_v4  ;;  %v3127_v49 = vadd.f32 %v3126_v43, %v3125_v48  ;;  %v3397_v38 = vadd.f32 %v3396_v59, %v3124_v47 }
 0x2ed   : > { %v3066_v51 = vpop.f32.mrb[64].mxu0  ;;  %v4628_v52 = vadd.f32 %v3402_v56, %v3127_v49 }
 0x2ee   : > { %v3067_v45 = vpop.f32.mrb[65].mxu0 }
 0x2ef   : > { %v3068_v58 = vadd.f32 %v3067_v45, %v3066_v51  ;;  %v3069_v61 = vpop.f32.mrb[66].mxu0  ;;  %v3128_v17 = vpop.f32.mrb[52].mxu1 }
 0x2f0   : > { %v3070_v50 = vpop.f32.mrb[67].mxu0  ;;  %v3129_v55 = vpop.f32.mrb[53].mxu1 }
 0x2f1   : > { %v3420_v3 = vadd.f32 %v3068_v58, %v4606_v41  ;;  %v3071_v6 = vadd.f32 %v3070_v50, %v3069_v61  ;;  %v3130_v11 = vadd.f32 %v3129_v55, %v3128_v17  ;;  %v3131_v12 = vpop.f32.mrb[54].mxu1 }
 0x2f2   : > { %v3132_v15 = vpop.f32.mrb[55].mxu1 }
 0x2f3   : > { %v3426_v16 = vadd.f32 %v3071_v6, %v4608_v46  ;;  %v3133_v4 = vadd.f32 %v3132_v15, %v3131_v12  ;;  %v4632_v18 = vadd.f32 %v3411_v40, %v3130_v11 }
 0x2f5   : > { %v4634_v59 = vadd.f32 %v3417_v2, %v3133_v4 }
 0x2f7   : > { %v3134_v56 = vpop.f32.mrb[56].mxu1 }
 0x2f8   : > { %v3135_v19 = vpop.f32.mrb[57].mxu1 }
 0x2f9   : > { %v3136_v31 = vadd.f32 %v3135_v19, %v3134_v56  ;;  %v3137_v63 = vpop.f32.mrb[58].mxu1 }
 0x2fa   : > { %v3138_v20 = vpop.f32.mrb[59].mxu1 }
 0x2fb   : > { %v3139_v23 = vadd.f32 %v3138_v20, %v3137_v63  ;;  %v3409_v35 = vadd.f32 %v3408_v9, %v3136_v31 }
 0x2fd   : > { %v3415_v25 = vadd.f32 %v3414_v13, %v3139_v23  ;;  %v4645_v13 = vld [vmem:[%s4859_s4] ss:$0 sm:$0xff]  ;;  %s4864_s4 = sld [smem:[#allocation25_spill]] }
 0x2ff   : > { %v3140_v41 = vpop.f32.mrb[60].mxu1 }
 0x300   : > { %v3141_v27 = vpop.f32.mrb[61].mxu1 }
 0x301   : > { %v3142_v28 = vadd.f32 %v3141_v27, %v3140_v41  ;;  %v3143_v14 = vpop.f32.mrb[62].mxu1 }
 0x302   : > { %v3144_v10 = vpop.f32.mrb[63].mxu1 }
 0x303   : > { %v3145_v7 = vadd.f32 %v3144_v10, %v3143_v14  ;;  %v4636_v46 = vadd.f32 %v3423_v24, %v3142_v28  ;;  %s4736_s24 = scalar_lea.hbm %s4864_s4, %s2888_s30 }
 0x305   : > { %v4638_v40 = vadd.f32 %v3429_v33, %v3145_v7 }
 0x307   : > { %v3146_v2 = vpop.f32.mrb[64].mxu1 }
 0x308   : > { %v3147_v57 = vpop.f32.mrb[65].mxu1 }
 0x309   : > { %v3148_v8 = vadd.f32 %v3147_v57, %v3146_v2  ;;  %v3149_v53 = vpop.f32.mrb[66].mxu1 }
 0x30a   : > { %v3150_v26 = vpop.f32.mrb[67].mxu1 }
 0x30b   : > { %v3151_v22 = vadd.f32 %v3150_v26, %v3149_v53  ;;  %v3421_v30 = vadd.f32 %v3420_v3, %v3148_v8 }
 0x30d   : > { %v4640_v54 = vadd.f32 %v3426_v16, %v3151_v22 }
 0x315   : > { %v3338_v9 = vpop.f32.mrb[20].mxu0 }
 0x316   : > { %v3386_v62 = vadd.f32 %v4616_v21, %v3338_v9  ;;  %v2257_v32 = vpop.f32.mrb[21].mxu0 }
 0x317   : > { %v3389_v34 = vadd.f32 %v4610_v5, %v2257_v32  ;;  %v3339_v36 = vpop.f32.mrb[22].mxu0 }
 0x318   : > { %v2345_v37 = vadd.f32 %v3386_v62, %v4645_v13  ;;  %v3392_v39 = vadd.f32 %v4618_v0, %v3339_v36  ;;  %v2260_v42 = vpop.f32.mrb[23].mxu0 }
 0x319   : > { %v2343_v24 = vadd.f32 %v3389_v34, %v4645_v13  ;;  %v3395_v44 = vadd.f32 %v4612_v60, %v2260_v42 }
 0x31a   : > { %v2346_v47 = vadd.f32 %v3392_v39, %v4645_v13  ;;  %v2361_v43 = vmax.f32 %v2345_v37, 0.0 }
 0x31b   : > { %v2344_v48 = vadd.f32 %v3395_v44, %v4645_v13  ;;  %v2359_v21 = vmax.f32 %v2343_v24, 0.0 }
 0x31c   : > { %v2362_v33 = vmax.f32 %v2346_v47, 0.0 }
 0x31d   : > { %v2360_v49 = vmax.f32 %v2344_v48, 0.0  ;;  %v3342_v51 = vpop.f32.mrb[24].mxu0  ;;  %v2553_v48 = vld [vmem:[%s4282_s14 + $0x10] sm:$0xff] }
 0x31e   : > { %v2376_v5 = vpack.c.bf16 %v2362_v33, %v2361_v43  ;;  %v3398_v45 = vadd.f32 %v3397_v38, %v3342_v51  ;;  %v2273_v58 = vpop.f32.mrb[25].mxu0  ;;  %v2551_v33 = vld [vmem:[%s4282_s14] sm:$0xff]  ;;  %v2554_v51 = vld [vmem:[%s4282_s14 + $0x18] sm:$0xff] }
 0x31f   : > { %v3401_v61 = vadd.f32 %v4622_v1, %v2273_v58  ;;  %v3343_v0 = vpop.f32.mrb[26].mxu0  ;;  %v2375_v17 = vpack.c.bf16 %v2360_v49, %v2359_v21 }
 0x320   : > { %v2349_v50 = vadd.f32 %v3398_v45, %v4645_v13  ;;  %v3404_v60 = vadd.f32 %v4628_v52, %v3343_v0  ;;  %v2276_v55 = vpop.f32.mrb[27].mxu0 }
 0x321   : > { %v2347_v3 = vadd.f32 %v3401_v61, %v4645_v13  ;;  %v3407_v6 = vadd.f32 %v4624_v29, %v2276_v55  ;;  %3368 = vmatprep.mubr.bf16.mxu1 %v2375_v17  ;;  %v2552_v61 = vld [vmem:[%s4282_s14 + $0x8] sm:$0xff] }
 0x322   : > { %v2350_v11 = vadd.f32 %v3404_v60, %v4645_v13  ;;  %3369 = vmatmul.mubr.bf16.vlgmr.msra.gmra.mrb[68].mxu1 %v2376_v5  ;;  %v2365_v12 = vmax.f32 %v2349_v50, 0.0 }
 0x323   : > { %v2348_v38 = vadd.f32 %v3407_v6, %v4645_v13  ;;  %v2363_v1 = vmax.f32 %v2347_v3, 0.0 }
 0x324   : > { %v2366_v15 = vmax.f32 %v2350_v11, 0.0 }
 0x325   : > { %v2364_v16 = vmax.f32 %v2348_v38, 0.0  ;;  %v3346_v4 = vpop.f32.mrb[28].mxu0 }
 0x326   : > { %v3410_v56 = vadd.f32 %v3409_v35, %v3346_v4  ;;  %v2289_v19 = vpop.f32.mrb[29].mxu0  ;;  %v2378_v31 = vpack.c.bf16 %v2366_v15, %v2365_v12  ;;  %v2557_v12 = vld [vmem:[%s4282_s14 + $0x30] sm:$0xff] }
 0x327   : > { %v3413_v52 = vadd.f32 %v4632_v18, %v2289_v19  ;;  %v3347_v63 = vpop.f32.mrb[30].mxu0  ;;  %v2377_v20 = vpack.c.bf16 %v2364_v16, %v2363_v1  ;;  %v2555_v16 = vld [vmem:[%s4282_s14 + $0x20] sm:$0xff]  ;;  %v2558_v19 = vld [vmem:[%s4282_s14 + $0x38] sm:$0xff] }
 0x328   : > { %v2353_v29 = vadd.f32 %v3410_v56, %v4645_v13  ;;  %v3416_v23 = vadd.f32 %v3415_v25, %v3347_v63  ;;  %v2292_v41 = vpop.f32.mrb[31].mxu0 }
 0x329   : > { %v2351_v27 = vadd.f32 %v3413_v52, %v4645_v13  ;;  %v3419_v28 = vadd.f32 %v4634_v59, %v2292_v41  ;;  %3372 = vmatprep.mubr.bf16.mxu1 %v2377_v20  ;;  %v2556_v20 = vld [vmem:[%s4282_s14 + $0x28] sm:$0xff] }
 0x32a   : > { %v2354_v14 = vadd.f32 %v3416_v23, %v4645_v13  ;;  %3373 = vmatmul.mubr.bf16.gmra.mrb[72].mxu1 %v2378_v31  ;;  %v2369_v10 = vmax.f32 %v2353_v29, 0.0 }
 0x32b   : > { %v2352_v35 = vadd.f32 %v3419_v28, %v4645_v13  ;;  %v2367_v2 = vmax.f32 %v2351_v27, 0.0 }
 0x32c   : > { %v2370_v7 = vmax.f32 %v2354_v14, 0.0 }
 0x32d   : > { %v2368_v18 = vmax.f32 %v2352_v35, 0.0  ;;  %v3350_v57 = vpop.f32.mrb[32].mxu0 }
 0x32e   : > { %v3422_v8 = vadd.f32 %v3421_v30, %v3350_v57  ;;  %v2305_v53 = vpop.f32.mrb[33].mxu0  ;;  %v2380_v26 = vpack.c.bf16 %v2370_v7, %v2369_v10 }
 0x32f   : > { %v3425_v25 = vadd.f32 %v4636_v46, %v2305_v53  ;;  %v3351_v22 = vpop.f32.mrb[34].mxu0  ;;  %v2379_v9 = vpack.c.bf16 %v2368_v18, %v2367_v2  ;;  %v2561_v2 = vld [vmem:[%s4282_s14 + $0x50] sm:$0xff] }
 0x330   : > { %v2357_v59 = vadd.f32 %v3422_v8, %v4645_v13  ;;  %v3428_v62 = vadd.f32 %v4640_v54, %v3351_v22  ;;  %v2308_v32 = vpop.f32.mrb[35].mxu0  ;;  %v2559_v8 = vld [vmem:[%s4282_s14 + $0x40] sm:$0xff] }
 0x331   : > { %v2355_v34 = vadd.f32 %v3425_v25, %v4645_v13  ;;  %v3431_v36 = vadd.f32 %v4638_v40, %v2308_v32  ;;  %3376 = vmatprep.mubr.bf16.mxu1 %v2379_v9  ;;  %v4679_v40 = vld [vmem:[%s4861_s21] ss:$0 sm:$0xff]  ;;  %v2562_v25 = vld [vmem:[%s4282_s14 + $0x58] sm:$0xff]  ;;  %s3965_s21 = smov [#allocation11]  }
 0x332   : > { %v2358_v30 = vadd.f32 %v3428_v62, %v4645_v13  ;;  %3377 = vmatmul.mubr.bf16.gmra.mrb[76].mxu1 %v2380_v26  ;;  %v2373_v37 = vmax.f32 %v2357_v59, 0.0  ;;  %v2560_v62 = vld [vmem:[%s4282_s14 + $0x48] sm:$0xff]  ;;  %s3827_s27 = sshll.u32 %s3965_s21, 4  ;;  %s3828_s27 = int_to_ptr.vmem [resolvable:$false] %s3827_s27 }
 0x333   : > { %v2356_v46 = vadd.f32 %v3431_v36, %v4645_v13  ;;  %v2371_v42 = vmax.f32 %v2355_v34, 0.0  ;;  %s3829_s1 = scalar_lea.vmem %s3828_s27, 4096  ;;  %p3830_p4 = scmp.lt.s32.totalorder %s4738_s20, %s3828_s27 }
 0x334   : > { %v2374_v39 = vmax.f32 %v2358_v30, 0.0  ;;  %p3831_p7 = scmp.lt.s32.totalorder %s3829_s1, %s3823_s12 }
 0x335   : > { %v2372_v54 = vmax.f32 %v2356_v46, 0.0 }
 0x336   : > { %v2382_v24 = vpack.c.bf16 %v2374_v39, %v2373_v37  ;;  %p3832_p3 = por %p3831_p7, %p3830_p4 }
 0x337   : > { %v2381_v44 = vpack.c.bf16 %v2372_v54, %v2371_v42 }
 0x338   : > { %p3833_p0 = pnand %p3832_p3, %p3826_p12 }
 0x339   : > { %3380 = vmatprep.mubr.bf16.mxu1 %v2381_v44 }
 0x33a   : > { %3381 = vmatmul.mubr.bf16.gmra.mrb[80].mxu1 %v2382_v24  ;;  %v2565_v24 = vld [vmem:[%s4282_s14 + $0x70] sm:$0xff] }
 0x3f5   : > { %v3370_v47 = vpop.f32.mrb[68].mxu1 }
 0x3f6   : > { %v2497_v13 = vadd.f32 %v3370_v47, %v4679_v40  ;;  %v2488_v43 = vpop.f32.mrb[69].mxu1 }
 0x3f7   : > { %v2489_v21 = vadd.f32 %v4679_v40, %v2488_v43  ;;  %v3371_v49 = vpop.f32.mrb[70].mxu1 }
 0x3f8   : > { %v2569_v5 = vadd.f32 %v2553_v48, %v2497_v13  ;;  %v2500_v45 = vadd.f32 %v3371_v49, %v4679_v40  ;;  %v2491_v58 = vpop.f32.mrb[71].mxu1  ;;  %v2563_v48 = vld [vmem:[%s4282_s14 + $0x60] sm:$0xff] }
 0x3f9   : > { %v2567_v0 = vadd.f32 %v2551_v33, %v2489_v21  ;;  %v2492_v17 = vadd.f32 %v4679_v40, %v2491_v58  ;;  %v2566_v33 = vld [vmem:[%s4282_s14 + $0x78] sm:$0xff] }
 0x3fa   : > { %v2585_v50 = vmax.f32 %v2569_v5, 0.0  ;;  %v2570_v60 = vadd.f32 %v2554_v51, %v2500_v45  ;;  %v2564_v5 = vld [vmem:[%s4282_s14 + $0x68] sm:$0xff]  ;;  %s4745_s14 = scalar_lea.sflag [#allocation5], %s352_s25 }
 0x3fb   : > { %v2583_v55 = vmax.f32 %v2567_v0, 0.0  ;;  %v2568_v3 = vadd.f32 %v2552_v61, %v2492_v17 }
 0x3fc   : > { %2601 = vst [vmem:[%s4691_s8 + $0x10] sm:$0xff] %v2585_v50  ;;  %v2586_v6 = vmax.f32 %v2570_v60, 0.0 }
 0x3fd   : > { %2599 = vst [vmem:[%s4691_s8] sm:$0xff] %v2583_v55  ;;  %v2584_v11 = vmax.f32 %v2568_v3, 0.0  ;;  %v3374_v38 = vpop.f32.mrb[72].mxu1 }
 0x3fe   : > { %2602 = vst [vmem:[%s4691_s8 + $0x18] sm:$0xff] %v2586_v6  ;;  %v2513_v15 = vadd.f32 %v3374_v38, %v4679_v40  ;;  %v2504_v1 = vpop.f32.mrb[73].mxu1 }
 0x3ff   : > { %2600 = vst [vmem:[%s4691_s8 + $0x8] sm:$0xff] %v2584_v11  ;;  %v2505_v4 = vadd.f32 %v4679_v40, %v2504_v1  ;;  %v3375_v56 = vpop.f32.mrb[74].mxu1 }
 0x400   : > { %v2573_v31 = vadd.f32 %v2557_v12, %v2513_v15  ;;  %v2516_v52 = vadd.f32 %v3375_v56, %v4679_v40  ;;  %v2507_v63 = vpop.f32.mrb[75].mxu1 }
 0x401   : > { %v2571_v29 = vadd.f32 %v2555_v16, %v2505_v4  ;;  %v2508_v23 = vadd.f32 %v4679_v40, %v2507_v63 }
 0x402   : > { %v2589_v41 = vmax.f32 %v2573_v31, 0.0  ;;  %v2574_v27 = vadd.f32 %v2558_v19, %v2516_v52 }
 0x403   : > { %v2587_v28 = vmax.f32 %v2571_v29, 0.0  ;;  %v2572_v14 = vadd.f32 %v2556_v20, %v2508_v23 }
 0x404   : > { %2605 = vst [vmem:[%s4691_s8 + $0x30] sm:$0xff] %v2589_v41  ;;  %v2590_v35 = vmax.f32 %v2574_v27, 0.0 }
 0x405   : > { %2603 = vst [vmem:[%s4691_s8 + $0x20] sm:$0xff] %v2587_v28  ;;  %v2588_v10 = vmax.f32 %v2572_v14, 0.0  ;;  %v3378_v7 = vpop.f32.mrb[76].mxu1 }
 0x406   : > { %2606 = vst [vmem:[%s4691_s8 + $0x38] sm:$0xff] %v2590_v35  ;;  %v2529_v18 = vadd.f32 %v3378_v7, %v4679_v40  ;;  %v2520_v57 = vpop.f32.mrb[77].mxu1 }
 0x407   : > { %2604 = vst [vmem:[%s4691_s8 + $0x28] sm:$0xff] %v2588_v10  ;;  %v2521_v53 = vadd.f32 %v4679_v40, %v2520_v57  ;;  %v3379_v26 = vpop.f32.mrb[78].mxu1 }
 0x408   : > { %v2577_v22 = vadd.f32 %v2561_v2, %v2529_v18  ;;  %v2532_v9 = vadd.f32 %v3379_v26, %v4679_v40  ;;  %v2523_v59 = vpop.f32.mrb[79].mxu1 }
 0x409   : > { %v2575_v32 = vadd.f32 %v2559_v8, %v2521_v53  ;;  %v2524_v34 = vadd.f32 %v4679_v40, %v2523_v59 }
 0x40a   : > { %v2593_v36 = vmax.f32 %v2577_v22, 0.0  ;;  %v2578_v30 = vadd.f32 %v2562_v25, %v2532_v9 }
 0x40b   : > { %v2591_v46 = vmax.f32 %v2575_v32, 0.0  ;;  %v2576_v37 = vadd.f32 %v2560_v62, %v2524_v34 }
 0x40c   : > { %2609 = vst [vmem:[%s4691_s8 + $0x50] sm:$0xff] %v2593_v36  ;;  %v2594_v39 = vmax.f32 %v2578_v30, 0.0 }
 0x40d   : > { %2607 = vst [vmem:[%s4691_s8 + $0x40] sm:$0xff] %v2591_v46  ;;  %v2592_v42 = vmax.f32 %v2576_v37, 0.0  ;;  %v3382_v54 = vpop.f32.mrb[80].mxu1 }
 0x40e   : > { %2610 = vst [vmem:[%s4691_s8 + $0x58] sm:$0xff] %v2594_v39  ;;  %v2545_v44 = vadd.f32 %v3382_v54, %v4679_v40  ;;  %v2536_v47 = vpop.f32.mrb[81].mxu1 }
 0x40f   : > { %2608 = vst [vmem:[%s4691_s8 + $0x48] sm:$0xff] %v2592_v42  ;;  %v2537_v13 = vadd.f32 %v4679_v40, %v2536_v47  ;;  %v3383_v43 = vpop.f32.mrb[82].mxu1 }
 0x410   : > { %v2581_v21 = vadd.f32 %v2565_v24, %v2545_v44  ;;  %v2548_v49 = vadd.f32 %v3383_v43, %v4679_v40  ;;  %v2539_v51 = vpop.f32.mrb[83].mxu1 }
 0x411   : > { %v2579_v45 = vadd.f32 %v2563_v48, %v2537_v13  ;;  %v2540_v58 = vadd.f32 %v4679_v40, %v2539_v51 }
 0x412   : > { %v2597_v61 = vmax.f32 %v2581_v21, 0.0  ;;  %v2582_v0 = vadd.f32 %v2566_v33, %v2548_v49 }
 0x413   : > { %v2595_v17 = vmax.f32 %v2579_v45, 0.0  ;;  %v2580_v50 = vadd.f32 %v2564_v5, %v2540_v58 }
 0x414   : > { %2613 = vst [vmem:[%s4691_s8 + $0x70] sm:$0xff] %v2597_v61  ;;  %v2598_v60 = vmax.f32 %v2582_v0, 0.0 }
 0x415   : > { %2611 = vst [vmem:[%s4691_s8 + $0x60] sm:$0xff] %v2595_v17  ;;  %v2596_v40 = vmax.f32 %v2580_v50, 0.0 }
 0x416   : > { %2614 = vst [vmem:[%s4691_s8 + $0x78] sm:$0xff] %v2598_v60 }
 0x417   : > { %2612 = vst [vmem:[%s4691_s8 + $0x68] sm:$0xff] %v2596_v40 }
 0x418   : > { %3836 = shalt.err (!%p3833_p0)
}
 0x419   : > { %s3837_s6 = scalar_lea.hbm %s4736_s24, 2048  ;;  %s3841_s15 = scalar_lea.hbm %s4864_s4, 8192 }
 0x41a   : > { %p3838_p1 = scmp.ne.s32.totalorder %s4736_s24, %s3837_s6  ;;  %p3842_p2 = scmp.lt.u32.totalorder %s4736_s24, %s4864_s4 }
 0x41b   : > { %p3843_p9 = scmp.lt.u32.totalorder %s3841_s15, %s3837_s6  ;;  %p3845_p13 = scmp.lt.u32.totalorder %s3837_s6, %s4736_s24 }
 0x41c   : > { %p3839_p11 = pnand %p3838_p1, %p4865_p6 }
 0x41d   : > { %p3844_p5 = por %p3843_p9, %p3842_p2 }
 0x41e   : > { %p3840_p10 = pneg %p3839_p11 }
 0x41f   : > { %p3846_p8 = por %p3845_p13, %p3844_p5 }
 0x421   : > { %p3847_p12 = pnand %p3846_p8, %p3840_p10 }
 0x423   : > { %3850 = shalt.err (!%p3847_p12)
}
 0x424   : > { %s3966_s30 = smov 128   ;;  %s3967_s16 = smov 8  }
 0x425   : > { %3478 = dma.vmem_to_hbm [thread:$0]  (%p4865_p6), %s4738_s20, 2048, %s4736_s24, %s4745_s14, %s3966_s30, %s3966_s30, %s3967_s16  }
 0x426 PF: > { %s4866_s19 = sld [smem:[#allocation16_spill]]  ;;  %s4867_s12 = sld [smem:[#allocation20_spill]] }
 0x427   : > { %p3505_p4 = scmp.ge.s32.totalorder %s3953_s11, 2 }
 0x42c   : > { %s2647_s21 = sand.u32 1, %s4866_s19   ;;  %p4868_p7 = scmp.ne.s32.totalorder %s4867_s12, 0 }
 0x42d   : > { %s2648_s27 = scalar_lea.sflag [#allocation5], %s2647_s21 }
 0x42e   : > { %p3495_p3 = pnand %p3505_p4, %p4868_p7 }
 0x430   : > { %3908 = dma.done.wait (!%p3495_p3), %s2648_s27, 2048  }
 0x431   : > { %3910 = vsyncadd (!%p3495_p3), %s2648_s27, 4294965248  ;;  %s25_s11 = sadd.s32 1, %s3953_s11   ;;  %s4869_s24 = sld [smem:[#allocation17_spill]] }
 0x432   : > { %p22_p0 = scmp.ge.s32.totalorder %s25_s11, 6   ;;  %s4870_s25 = smov %s3921_s26 }
 0x433   : > { %s4871_s26 = smov %s4215_s7  ;;  %s4872_s27 = smov %s3929_s28 }
 0x434   : > { %s4873_s28 = smov %s3933_s29  ;;  %s4874_s29 = smov %s4210_s23 }
 0x435   : > { %s4875_s30 = smov %s3945_s9  ;;  %s4876_s8 = smov %s3949_s10 }
 0x436   : > { %s4877_s9 = smov %s4880_s17  ;;  %s4878_s10 = smov %s4884_s22 }
 0x437   :  { %24 = sbr.rel (!%p22_p0) target bundleno = 17 (0x11), region = 113 }
 0x43e   :  { %2653 = vsyncpa [#allocation4], 1 }
 0x43f   :  { %2655 = vsyncpa [#allocation4 + $0x1], 1 }
 0x440   :  { %2656 = vsyncpa [#allocation7], 1 }
 0x441   :  { %2657 = vsyncpa [#allocation10], 1 }
 0x442   :  { %2658 = vsyncpa [#allocation5], 1 }
 0x443   :  { %2660 = vsyncpa [#allocation5 + $0x1], 1 }

// kernel: tpu_custom_call.1
= control target key start
LH: loop header
LB: loop body
LE: loop exit
PB: predicated region body
PF: predicated region fallthrough
CT: control target
= control target key end

     0   :  { %s4806_s0 = inlined_call_operand.hbm [shape: f32[2,16,16,128], index: 0, kind: input, shape index: {}]   ;;  %s4807_s1 = inlined_call_operand.hbm [shape: bf16[128,128], index: 1, kind: input, shape index: {}]   ;;  %s4808_s2 = inlined_call_operand.vmem [shape: f32[1,128], index: 2, kind: input, shape index: {}]   ;;  %s4809_s3 = inlined_call_operand.hbm [shape: bf16[3,384,128], index: 3, kind: input, shape index: {}]   ;;  %s4810_s4 = inlined_call_operand.vmem [shape: f32[1,128], index: 4, kind: input, shape index: {}]   ;;  %s4811_s5 = inlined_call_operand.hbm [shape: bf16[128,128], index: 5, kind: input, shape index: {}]   ;;  %s4812_s6 = inlined_call_operand.vmem [shape: f32[1,128], index: 6, kind: input, shape index: {}]   ;;  %s4813_s7 = inlined_call_operand.hbm [shape: f32[2,16,16,128], index: 7, kind: output, shape index: {}]  }
   0x1   :  { %4826 = sst [smem:[#allocation21_spill]] %s4807_s1 }
   0x2   :  { %4827 = sst [smem:[#allocation22_spill]] %s4809_s3 }
   0x3   :  { %4828 = sst [smem:[#allocation23_spill]] %s4810_s4 }
   0x4   :  { %4829 = sst [smem:[#allocation24_spill]] %s4812_s6 }
   0x5   :  { %4830 = sst [smem:[#allocation25_spill]] %s4813_s7 }
   0x6   :  { %12 = vsyncpa [#allocation4], 0 }
   0x7   :  { %14 = vsyncpa [#allocation4 + $0x1], 0 }
   0x8   :  { %15 = vsyncpa [#allocation7], 0 }
   0x9   :  { %16 = vsyncpa [#allocation10], 0 }
   0xa   :  { %17 = vsyncpa [#allocation5], 0 }
   0xb   :  { %19 = vsyncpa [#allocation5 + $0x1], 0  ;;  %s4008_s24 = smov 0   ;;  %s4010_s25 = smov 0  }
   0xc   :  { %s4012_s26 = smov 0   ;;  %s4014_s27 = smov 0  }
   0xd   :  { %s4016_s28 = smov 0   ;;  %s4018_s29 = smov 0  }
   0xe   :  { %s4020_s30 = smov 0   ;;  %s4022_s8 = smov 0  }
   0xf   :  { %s4024_s9 = smov 0   ;;  %s4026_s10 = smov 0  }
  0x10   :  { %s4028_s11 = smov 0  }
  0x11 LB: > { %4831 = sst [smem:[#allocation16_spill]] %s3913_s24  ;;  %s2754_s12 = sadd.s32 4294967295, %s3953_s11   ;;  %s3953_s11 = sphi %s4028_s11, %s25_s11   ;;  %s3949_s10 = sphi %s4026_s10, %s4878_s10   ;;  %s3945_s9 = sphi %s4024_s9, %s4877_s9   ;;  %s3941_s8 = sphi %s4022_s8, %s4876_s8   ;;  %s3937_s30 = sphi %s4020_s30, %s4875_s30   ;;  %s3933_s29 = sphi %s4018_s29, %s4874_s29   ;;  %s3929_s28 = sphi %s4016_s28, %s4873_s28   ;;  %s3925_s27 = sphi %s4014_s27, %s4872_s27   ;;  %s3921_s26 = sphi %s4012_s26, %s4871_s26   ;;  %s3917_s25 = sphi %s4010_s25, %s4870_s25   ;;  %s3913_s24 = sphi %s4008_s24, %s4869_s24  }
  0x12   : > { %4832 = sst [smem:[#allocation17_spill]] %s3917_s25  ;;  %s2755_s13 = sadd.s32 4294967294, %s3953_s11  }
  0x13   : > { %4833 = sst [smem:[#allocation18_spill]] %s3941_s8  ;;  %p57_p0 = scmp.ne.s32.totalorder %s3929_s28, %s3925_s27 }
  0x14   : > { %p4064_p1 = scmp.eq.s32.totalorder %s2754_s12, 0  ;;  %p208_p2 = scmp.ne.s32.totalorder %s3921_s26, %s3917_s25 }
  0x15   : > { %p209_p4 = scmp.eq.s32.totalorder %s2754_s12, 3  ;;  %p214_p5 = scmp.ne.s32.totalorder %s3917_s25, %s3913_s24 }
  0x16   : > { %s4834_s14 = scalar_select %p4064_p1, 1, 0 }
  0x17   : > { %p4073_p3 = por %p4064_p1, %p57_p0  ;;  %p215_p6 = scmp.eq.s32.totalorder %s2755_s13, 3 }
  0x18   : > { %p4079_p7 = por %p209_p4, %p208_p2  ;;  %p2756_p8 = scmp.ge.s32.totalorder %s3953_s11, 1 }
  0x19   : > { %s4835_s16 = scalar_select %p4073_p3, 1, 0 }
  0x1a   : > { %s4836_s17 = scalar_select %p4079_p7, 1, 0 }
  0x1b   : > { %p4084_p9 = por %p215_p6, %p214_p5  ;;  %p222_p10 = scmp.lt.s32.totalorder %s3953_s11, 5 }
  0x1c   : > { %4837 = sst [smem:[#allocation19_spill]] %s4836_s17  ;;  %s3955_s20 = smov [#allocation6]  }
  0x1d   : > { %s4838_s18 = scalar_select %p4084_p9, 1, 0 }
  0x1e   : > { %p4089_p11 = pnand %p2756_p8, %p222_p10  ;;  %s234_s21 = sshll.u32 %s3955_s20, 4  ;;  %s4093_s21 = int_to_ptr.vmem [resolvable:$true] %s234_s21 }
  0x1f   : > { %4839 = sst [smem:[#allocation20_spill]] %s4838_s18  ;;  %s3956_s23 = smov [#allocation8]  }
  0x20   : > { %s4840_s19 = scalar_select %p4089_p11, 1, 0 }
  0x21   : > { %p3480_p12 = pneg %p4089_p11  ;;  %s250_s27 = sshll.u32 %s3956_s23, 4  ;;  %s4103_s27 = int_to_ptr.vmem [resolvable:$true] %s250_s27 }
  0x22   : > { %s3957_s12 = smov [#allocation9]   ;;  %s4842_s1 = sld [smem:[#allocation21_spill]] }
  0x23   : > { %p4099_p13 = pnand %p3480_p12, %p4064_p1  ;;  %s4105_s13 = sshll.u32 %s3957_s12, 4  ;;  %s267_s13 = int_to_ptr.vmem [resolvable:$true] %s4105_s13 }
  0x25   : > { %p4115_p2 = pneg %p4099_p13 }
  0x28   : > { %s3709_s20 = scalar_lea.hbm %s4842_s1, 1024 }
  0x29   : > { %p3710_p0 = scmp.ne.s32.totalorder %s4842_s1, %s3709_s20  ;;  %p3716_p6 = scmp.lt.u32.totalorder %s3709_s20, %s4842_s1 }
  0x2b   : > { %p3712_p4 = pnand %p4115_p2, %p3710_p0 }
  0x2d   : > { %p3713_p5 = pneg %p3712_p4 }
  0x2f   : > { %p3718_p8 = pnand %p3716_p6, %p3713_p5 }
  0x31   : > { %3721 = shalt.err (!%p3718_p8)
}
  0x32   : > { %s3722_s7 = scalar_lea.vmem %s4093_s21, 1024  ;;  %p3730_p7 = scmp.lt.s32.totalorder %s4093_s21, %s4093_s21 }
  0x33   : > { %p3723_p10 = scmp.ne.s32.totalorder %s4093_s21, %s3722_s7  ;;  %p3731_p1 = scmp.lt.s32.totalorder %s3722_s7, %s3722_s7 }
  0x35   : > { %p3725_p12 = pnand %p3723_p10, %p4115_p2  ;;  %p3732_p0 = por %p3731_p1, %p3730_p7 }
  0x37   : > { %p3726_p9 = pneg %p3725_p12 }
  0x39   : > { %p3733_p4 = pnand %p3732_p0, %p3726_p9 }
  0x3b   : > { %3736 = shalt.err (!%p3733_p4)
}
  0x3c   : > { %s3958_s24 = smov 64   ;;  %s3959_s15 = smov 4  }
  0x3d   : > { %3483 = dma.hbm_to_vmem [thread:$0]  (!%p4099_p13), %s4842_s1, 1024, %s4093_s21, [#allocation7], %s3958_s24, %s3958_s24, %s3959_s15  }
  0x3e   : > { %s4844_s3 = sld [smem:[#allocation22_spill]] }
  0x44   : > { %s3737_s7 = scalar_lea.hbm %s4844_s3, 9216 }
  0x45   : > { %p3738_p1 = scmp.ne.s32.totalorder %s4844_s3, %s3737_s7  ;;  %p3744_p5 = scmp.lt.u32.totalorder %s3737_s7, %s4844_s3 }
  0x47   : > { %p3740_p7 = pnand %p3738_p1, %p4115_p2 }
  0x49   : > { %p3741_p9 = pneg %p3740_p7 }
  0x4b   : > { %p3746_p6 = pnand %p3744_p5, %p3741_p9 }
  0x4d   : > { %3749 = shalt.err (!%p3746_p6)
}
  0x4e   : > { %s3750_s21 = scalar_lea.vmem %s4103_s27, 9216  ;;  %p3758_p0 = scmp.lt.s32.totalorder %s4103_s27, %s4103_s27 }
  0x4f   : > { %p3751_p8 = scmp.ne.s32.totalorder %s4103_s27, %s3750_s21  ;;  %p3759_p4 = scmp.lt.s32.totalorder %s3750_s21, %s3750_s21 }
  0x51   : > { %p3753_p10 = pnand %p3751_p8, %p4115_p2  ;;  %p3760_p1 = por %p3759_p4, %p3758_p0 }
  0x53   : > { %p3754_p12 = pneg %p3753_p10 }
  0x55   : > { %p3761_p7 = pnand %p3760_p1, %p3754_p12 }
  0x57   : > { %3764 = shalt.err (!%p3761_p7)
}
  0x58   : > { %3486 = dma.hbm_to_vmem [thread:$0]  (!%p4099_p13), %s4844_s3, 9216, %s4103_s27, [#allocation7], %s3958_s24, %s3958_s24, %s3959_s15  }
  0x59   : > { %s3765_s18 = scalar_lea.hbm %s4811_s5, 1024 }
  0x5a   : > { %p3766_p9 = scmp.ne.s32.totalorder %s4811_s5, %s3765_s18  ;;  %p3772_p8 = scmp.lt.u32.totalorder %s3765_s18, %s4811_s5 }
  0x5c   : > { %p3768_p5 = pnand %p3766_p9, %p4115_p2 }
  0x5e   : > { %p3769_p6 = pneg %p3768_p5 }
  0x60   : > { %p3774_p10 = pnand %p3772_p8, %p3769_p6 }
  0x62   : > { %3777 = shalt.err (!%p3774_p10)
}
  0x63   : > { %s3778_s21 = scalar_lea.vmem %s267_s13, 1024  ;;  %p3786_p1 = scmp.lt.s32.totalorder %s267_s13, %s267_s13 }
  0x64   : > { %p3779_p12 = scmp.ne.s32.totalorder %s267_s13, %s3778_s21  ;;  %p3787_p7 = scmp.lt.s32.totalorder %s3778_s21, %s3778_s21 }
  0x66   : > { %p3781_p0 = pnand %p3779_p12, %p4115_p2  ;;  %p3788_p3 = por %p3787_p7, %p3786_p1 }
  0x68   : > { %p3782_p4 = pneg %p3781_p0 }
  0x6a   : > { %p3789_p11 = pnand %p3788_p3, %p3782_p4 }
  0x6c   : > { %3792 = shalt.err (!%p3789_p11)
}
  0x6d   : > { %3489 = dma.hbm_to_vmem [thread:$0]  (!%p4099_p13), %s4811_s5, 1024, %s267_s13, [#allocation10], %s3958_s24, %s3958_s24, %s3959_s15  }
  0x6e   : > { %s34_s17 = sadd.s32 1, %s3945_s9  ;;  %s37_s22 = sadd.s32 1, %s3949_s10 }
  0x6f   : > { %p35_p3 = scmp.ge.s32.totalorder %s34_s17, 2  ;;  %s44_s6 = sadd.s32 1, %s3933_s29 }
  0x70   : > { %p51_p11 = scmp.ne.s32.totalorder %s3933_s29, %s3929_s28  ;;  %p52_p2 = scmp.eq.s32.totalorder %s3953_s11, 0 }
  0x71   : > { %s4880_s17 = smov (%p35_p3, %s34_s17), 0  ;;  %s4882_s22 = smov (!%p35_p3, %s37_s22), %s3949_s10 }
  0x72   : > { %s194_s25 = ssub.s32 %s3945_s9, %s4880_s17  ;;  %p39_p9 = scmp.ge.s32.totalorder %s4882_s22, 2 }
  0x73   : > { %p3501_p5 = scmp.lt.s32.totalorder %s3953_s11, 4  ;;  %p4199_p13 = por %p52_p2, %p51_p11 }
  0x74   : > { %s283_s24 = sand.u32 1, %s3933_s29   ;;  %s4884_s22 = smov (%p39_p9, %s4882_s22), 0 }
  0x75   : > { %s2761_s15 = sshll.u32 %s283_s24, 8  ;;  %s41_s8 = ssub.s32 %s3949_s10, %s4884_s22 }
  0x76   : > { %p42_p6 = scmp.eq.s32.totalorder %s41_s8, 0  ;;  %s195_s18 = sor.u32 %s194_s25, %s41_s8 }
  0x77   : > { %p196_p8 = scmp.eq.s32.totalorder %s195_s18, 0  ;;  %s2891_s20 = sshll.u32 %s3949_s10, 12 }
  0x78   : > { %s4210_s23 = scalar_select %p42_p6, %s3933_s29, %s44_s6  }
  0x79   : > { %s4846_s12 = sadd.s32 1, %s3921_s26  ;;  %s4220_s4 = scalar_lea.hbm %s4806_s0, %s2891_s20 }
  0x7a   : > { %s4215_s7 = scalar_select %p196_p8, %s3921_s26, %s4846_s12  }
  0x7b   : > { %s287_s1 = scalar_lea.vmem [#allocation3], %s2761_s15  ;;  %p4228_p10 = pnand %p3501_p5, %p4199_p13 }
  0x7c   : > { %s294_s3 = sshll.u32 %s287_s1, 4  ;;  %s4232_s25 = scalar_lea.sflag [#allocation4], %s283_s24  ;;  %s4222_s3 = int_to_ptr.vmem [resolvable:$true] %s294_s3 }
  0x7d   : > { %s3793_s8 = scalar_lea.hbm %s4220_s4, 4096  ;;  %p3795_p0 = pneg %p4228_p10 }
  0x7e   : > { %p3794_p12 = scmp.ne.s32.totalorder %s4220_s4, %s3793_s8  ;;  %s3798_s13 = scalar_lea.hbm %s4806_s0, 8192 }
  0x7f   : > { %p3799_p7 = scmp.lt.u32.totalorder %s4220_s4, %s4806_s0  ;;  %p3800_p3 = scmp.lt.u32.totalorder %s3798_s13, %s3793_s8 }
  0x80   : > { %p3796_p4 = pnand %p3795_p0, %p3794_p12  ;;  %p3802_p2 = scmp.lt.u32.totalorder %s3793_s8, %s4220_s4 }
  0x81   : > { %p3801_p11 = por %p3800_p3, %p3799_p7 }
  0x82   : > { %p3797_p1 = pneg %p3796_p4 }
  0x83   : > { %p3803_p9 = por %p3802_p2, %p3801_p11 }
  0x85   : > { %p3804_p5 = pnand %p3803_p9, %p3797_p1 }
  0x87   : > { %3807 = shalt.err (!%p3804_p5)
}
  0x88   : > { %s3808_s24 = scalar_lea.vmem %s4222_s3, 4096  ;;  %s3960_s12 = smov [#allocation3]  }
  0x89   : > { %p3809_p13 = scmp.ne.s32.totalorder %s4222_s3, %s3808_s24  ;;  %s3813_s21 = sshll.u32 %s3960_s12, 4  ;;  %s3814_s21 = int_to_ptr.vmem [resolvable:$false] %s3813_s21 }
  0x8a   : > { %s3815_s27 = scalar_lea.vmem %s3814_s21, 8192  ;;  %p3816_p12 = scmp.lt.s32.totalorder %s4222_s3, %s3814_s21 }
  0x8b   : > { %p3811_p6 = pnand %p3809_p13, %p3795_p0  ;;  %p3817_p4 = scmp.lt.s32.totalorder %s3815_s27, %s3808_s24 }
  0x8d   : > { %p3812_p8 = pneg %p3811_p6  ;;  %p3818_p7 = por %p3817_p4, %p3816_p12 }
  0x8f   : > { %p3819_p3 = pnand %p3818_p7, %p3812_p8 }
  0x91   : > { %3822 = shalt.err (!%p3819_p3)
}
  0x92   : > { %s3961_s8 = smov 128   ;;  %s3962_s1 = smov 8  }
  0x93   : > { %3493 = dma.hbm_to_vmem [thread:$0]  (!%p4228_p10), %s4220_s4, 4096, %s4222_s3, %s4232_s25, %s3961_s8, %s3961_s8, %s3962_s1  }
  0x94   : > { %p4848_p0 = scmp.ne.s32.totalorder %s4840_s19, 0 }
  0x95   : > { %s308_s15 = sand.u32 (!%p4848_p0), 1, %s3929_s28   ;;  %p4849_p1 = scmp.ne.s32.totalorder (!%p4848_p0), %s4835_s16, 0 }
  0x96   : > { %306 = sbr.rel (%p4848_p0) target bundleno = 1062 (0x426), region = 48  ;;  %s2765_s13 = sshll.u32 (!%p4848_p0), %s308_s15, 8 }
  0x97   : > { %s309_s18 = scalar_lea.sflag (!%p4848_p0), [#allocation4], %s308_s15  ;;  %s4263_s20 = scalar_lea.vmem (!%p4848_p0), [#allocation3], %s2765_s13 }
  0x9d   : > { %3896 = dma.done.wait (%p4849_p1), %s309_s18, 4096  }
  0x9e   : > { %3898 = vsyncadd (%p4849_p1), %s309_s18, 4294963200  ;;  %p4850_p11 = scmp.ne.s32.totalorder %s4834_s14, 0 }
  0xa0   : > { %3900 = dma.done.wait (%p4850_p11), [#allocation7], 10240  }
  0xa1   : > { %3902 = vsyncadd (%p4850_p11), [#allocation7], 4294957056 }
  0xa2   : > { %3904 = dma.done.wait (%p4850_p11), [#allocation10], 1024  }
  0xa3   : > { %3906 = vsyncadd (%p4850_p11), [#allocation10], 4294966272  ;;  %v3963_v0 = vmov 0.0   ;;  %vm3964_vm0 = vmmov 0   ;;  %v3605_v1 = vld [vmem:[#allocation6] sm:$0xff]   ;;  %v3606_v2 = vld [vmem:[#allocation6 + $0x8] sm:$0xff]  }
  0xa4   : > { %3216 = vmatprep.subr.bf16.mxu1 %v3963_v0  ;;  %3232 = vmatprep.mubr.msk.bf16.mxu1 %vm3964_vm0, %v3963_v0  ;;  %v3607_v3 = vld [vmem:[#allocation6 + $0x10] sm:$0xff]   ;;  %s2892_s3 = sshll.u32 %s3937_s30, 7  ;;  %v3611_v4 = vld [vmem:[#allocation6] sm:$0xff]   ;;  %v3608_v5 = vld [vmem:[#allocation6 + $0x18] sm:$0xff]   ;;  %s2770_s16 = sshll.u32 %s3937_s30, 3  ;;  %vm649_vm1 = vcmask 1047552  }
  0xa5   : > { %3184 = vmatprep.subr.bf16.mxu0 %v3605_v1  ;;  %3217 = vmatpush3.bf16.msra.mxu1 %v3611_v4  ;;  %v3613_v6 = vld [vmem:[#allocation6 + $0x8] sm:$0xff]   ;;  %s4282_s14 = scalar_lea.vmem %s4263_s20, %s2892_s3 [#allocation3]  ;;  %v3609_v7 = vld [vmem:[#allocation6 + $0x20] sm:$0xff]   ;;  %v3615_v10 = vld [vmem:[#allocation6 + $0x10] sm:$0xff]   ;;  %s2781_s19 = sadd.s32 4294967295, %s2770_s16  ;;  %vm650_vm2 = vsmask.f32 7938 }
  0xa6   : > { %3185 = vmatpush3.bf16.msra.mxu0 %v3605_v1  ;;  %3218 = vmatprep.subr.bf16.mxu1 %v3963_v0  ;;  %v360_v8 = vld [vmem:[%s4282_s14] sm:$0xff]  ;;  %v361_v9 = vld [vmem:[%s4282_s14 + $0x8] sm:$0xff]  ;;  %v3610_v12 = vld [vmem:[#allocation6 + $0x28] sm:$0xff]   ;;  %p784_p10 = scmp.gt.s32.totalorder %s2781_s19, 0  ;;  %s4290_s4 = sadd.s32 8, %s2770_s16  ;;  %vm676_vm4 = vcmask 1040384  }
  0xa7   : > { %3186 = vmatprep.subr.bf16.mxu0 %v3606_v2  ;;  %v376_v11 = vpack.c.bf16 %v361_v9, %v360_v8  ;;  %v3616_v13 = vld [vmem:[#allocation6 + $0x18] sm:$0xff]   ;;  %v3612_v14 = vld [vmem:[#allocation6 + $0x30] sm:$0xff]   ;;  %v3617_v15 = vld [vmem:[#allocation6 + $0x20] sm:$0xff]   ;;  %p937_p2 = scmp.lt.s32.totalorder %s4290_s4, 15  ;;  %p780_p9 = scmp.gt.s32.totalorder %s3937_s30, 0  ;;  %vm753_vm8 = vcmask 1047559  }
  0xa8   : > { %s4886_s19 = smov (!%p784_p10, %s2781_s19), 0  ;;  %v3614_v16 = vld [vmem:[#allocation6 + $0x38] sm:$0xff]   ;;  %v3618_v17 = vld [vmem:[#allocation6 + $0x28] sm:$0xff]   ;;  %v362_v18 = vld [vmem:[%s4282_s14 + $0x10] sm:$0xff]  ;;  %vm727_vm3 = vsmask.f32 7424 }
  0xa9   : > { %3219 = vmatpush3.bf16.msra.mxu1 %v3613_v6  ;;  %3200 = vmatprep.mubr.bf16.mxu0 %v376_v11  ;;  %s2782_s6 = sshll.u32 %s4886_s19, 4  ;;  %v363_v19 = vld [vmem:[%s4282_s14 + $0x18] sm:$0xff]  ;;  %v364_v20 = vld [vmem:[%s4282_s14 + $0x20] sm:$0xff]  ;;  %v365_v21 = vld [vmem:[%s4282_s14 + $0x28] sm:$0xff]  ;;  %vm677_vm5 = vsmask.f32 256 }
  0xaa   : > { %3187 = vmatpush3.bf16.msra.mxu0 %v3606_v2  ;;  %3220 = vmatprep.subr.bf16.mxu1 %v3963_v0  ;;  %s4299_s25 = scalar_select %p937_p2, %s4290_s4, 15  ;;  %v3619_v22 = vld [vmem:[#allocation6 + $0x30] sm:$0xff]   ;;  %v377_v23 = vpack.c.bf16 %v363_v19, %v362_v18  ;;  %v3620_v24 = vld [vmem:[#allocation6 + $0x38] sm:$0xff]   ;;  %v3621_v27 = vld [vmem:[#allocation6] sm:$0xff]   ;;  %v378_v28 = vpack.c.bf16 %v365_v21, %v364_v20  ;;  %vm754_vm9 = vsmask.f32 7966 }
  0xab   : > { %3188 = vmatprep.subr.bf16.mxu0 %v3607_v3  ;;  %s787_s24 = scalar_lea.vmem %s4263_s20, %s2782_s6 [#allocation3]  ;;  %v366_v29 = vld [vmem:[%s4282_s14 + $0x30] sm:$0xff]  ;;  %v367_v30 = vld [vmem:[%s4282_s14 + $0x38] sm:$0xff]  ;;  %v368_v32 = vld [vmem:[%s4282_s14 + $0x40] sm:$0xff]  ;;  %p934_p5 = scmp.lt.s32.totalorder %s4290_s4, 16 }
  0xac   : > { %v788_v25 = vld [vmem:[%s787_s24] sm:$0xff]  ;;  %v789_v26 = vld [vmem:[%s787_s24 + $0x8] sm:$0xff]  ;;  %s2792_s12 = sshll.u32 %s4299_s25, 4  ;;  %v3622_v31 = vld [vmem:[#allocation6 + $0x8] sm:$0xff]   ;;  %v379_v36 = vpack.c.bf16 %v367_v30, %v366_v29  ;;  %s4859_s4 = sld [smem:[#allocation23_spill]] }
  0xad   : > { %3221 = vmatpush3.bf16.msra.mxu1 %v3615_v10  ;;  %v369_v33 = vld [vmem:[%s4282_s14 + $0x48] sm:$0xff]  ;;  %v790_v34 = vpack.c.bf16 %v789_v26, %v788_v25  ;;  %v3623_v35 = vld [vmem:[#allocation6 + $0x10] sm:$0xff]   ;;  %v370_v38 = vld [vmem:[%s4282_s14 + $0x50] sm:$0xff]  ;;  %s940_s21 = scalar_lea.vmem %s4263_s20, %s2792_s12 [#allocation3]  ;;  %s4860_s6 = sld [smem:[#allocation17_spill]] }
  0xae   : > { %3189 = vmatpush3.bf16.msra.mxu0 %v3607_v3  ;;  %3222 = vmatprep.subr.bf16.mxu1 %v3963_v0  ;;  %v380_v37 = vpack.c.bf16 %v369_v33, %v368_v32  ;;  %v371_v39 = vld [vmem:[%s4282_s14 + $0x58] sm:$0xff]  ;;  %v3624_v40 = vld [vmem:[#allocation6 + $0x18] sm:$0xff]   ;;  %v372_v41 = vld [vmem:[%s4282_s14 + $0x60] sm:$0xff]  ;;  %s781_s1 = scalar_select %p780_p9, 1, 0 }
  0xaf   : > { %3190 = vmatprep.subr.bf16.mxu0 %v3608_v5  ;;  %v373_v42 = vld [vmem:[%s4282_s14 + $0x68] sm:$0xff]  ;;  %v3625_v43 = vld [vmem:[#allocation6 + $0x20] sm:$0xff]   ;;  %v381_v44 = vpack.c.bf16 %v371_v39, %v370_v38  ;;  %v375_v47 = vld [vmem:[%s4282_s14 + $0x78] sm:$0xff]  ;;  %s4440_s13 = scalar_select %p934_p5, 1, 0 }
  0xb0   : > { %v382_v45 = vpack.c.bf16 %v373_v42, %v372_v41  ;;  %v374_v46 = vld [vmem:[%s4282_s14 + $0x70] sm:$0xff]  ;;  %v3626_v48 = vld [vmem:[#allocation6 + $0x28] sm:$0xff]   ;;  %v3627_v49 = vld [vmem:[#allocation6 + $0x30] sm:$0xff]   ;;  %s782_s15 = scvt.s32.f32 %s781_s1  ;;  %s4862_s1 = sld [smem:[#allocation18_spill]] }
  0xb1   : > { %3223 = vmatpush3.bf16.msra.mxu1 %v3616_v13  ;;  %v383_v50 = vpack.c.bf16 %v375_v47, %v374_v46  ;;  %v3628_v51 = vld [vmem:[#allocation6 + $0x38] sm:$0xff]   ;;  %v941_v52 = vld [vmem:[%s940_s21] sm:$0xff]  ;;  %v3629_v55 = vld [vmem:[#allocation8 + $0x100] sm:$0xff]   ;;  %s936_s3 = scvt.s32.f32 %s4440_s13 }
  0xb2   : > { %3191 = vmatpush3.bf16.msra.mxu0 %v3608_v5  ;;  %3224 = vmatprep.subr.bf16.mxu1 %v3963_v0  ;;  %v942_v53 = vld [vmem:[%s940_s21 + $0x8] sm:$0xff]  ;;  %v3630_v56 = vld [vmem:[#allocation8 + $0x140] sm:$0xff]   ;;  %v3632_v58 = vld [vmem:[#allocation8 + $0x108] sm:$0xff]   ;;  %v905_v38 = vstv %s782_s15  ;;  %s4861_s21 = sld [smem:[#allocation24_spill]]  ;;  %s2893_s15 = sshll.u32 %s3937_s30, 4 }
  0xb3   : > { %3192 = vmatprep.subr.bf16.mxu0 %v3609_v7  ;;  %v943_v54 = vpack.c.bf16 %v942_v53, %v941_v52  ;;  %v3631_v57 = vld [vmem:[#allocation8 + $0xc0] sm:$0xff]   ;;  %v3633_v59 = vld [vmem:[#allocation8 + $0x148] sm:$0xff]   ;;  %v3635_v61 = vld [vmem:[#allocation8 + $0x110] sm:$0xff]   ;;  %s352_s25 = sand.u32 1, %s4860_s6  }
  0xb4   : > { %v3634_v60 = vld [vmem:[#allocation8 + $0xc8] sm:$0xff]   ;;  %v3636_v62 = vld [vmem:[#allocation8 + $0x150] sm:$0xff]   ;;  %v3639_v1 = vld [vmem:[#allocation8 + $0x158] sm:$0xff]   ;;  %s2769_s27 = sshll.u32 %s352_s25, 7 }
  0xb5   : > { %3225 = vmatpush3.bf16.msra.mxu1 %v3617_v15  ;;  %v3637_v63 = vld [vmem:[#allocation8 + $0xd0] sm:$0xff]   ;;  %v3640_v2 = vld [vmem:[#allocation8 + $0xd8] sm:$0xff]   ;;  %v3641_v3 = vld [vmem:[#allocation8 + $0x120] sm:$0xff]   ;;  %s4691_s8 = scalar_lea.vmem [#allocation11], %s2769_s27 }
  0xb6   : > { %3193 = vmatpush3.bf16.msra.mxu0 %v3609_v7  ;;  %3226 = vmatprep.subr.bf16.mxu1 %v3963_v0  ;;  %v3642_v4 = vld [vmem:[#allocation8 + $0x160] sm:$0xff]   ;;  %v3644_v6 = vld [vmem:[#allocation8 + $0x128] sm:$0xff]   ;;  %v3647_v9 = vld [vmem:[#allocation8 + $0x130] sm:$0xff]   ;;  %s2887_s13 = sshll.u32 %s4862_s1, 5  ;;  %s2632_s20 = sshll.u32 %s4691_s8, 4  ;;  %s4738_s20 = int_to_ptr.vmem [resolvable:$true] %s2632_s20 }
  0xb7   : > { %3194 = vmatprep.subr.bf16.mxu0 %v3610_v12  ;;  %v3643_v5 = vld [vmem:[#allocation8 + $0xe0] sm:$0xff]   ;;  %v3645_v7 = vld [vmem:[#allocation8 + $0x168] sm:$0xff]   ;;  %v3648_v10 = vld [vmem:[#allocation8 + $0x170] sm:$0xff]   ;;  %s2629_s18 = sadd.s32 %s2893_s15, %s2887_s13  ;;  %s3823_s12 = scalar_lea.vmem %s4738_s20, 2048 }
  0xb8   : > { %v3646_v8 = vld [vmem:[#allocation8 + $0xe8] sm:$0xff]   ;;  %v3649_v11 = vld [vmem:[#allocation8 + $0xf0] sm:$0xff]   ;;  %v3651_v13 = vld [vmem:[#allocation8 + $0x178] sm:$0xff]   ;;  %s2888_s30 = sshll.u32 %s2629_s18, 7  ;;  %p3824_p13 = scmp.ne.s32.totalorder %s4738_s20, %s3823_s12 }
  0xb9   : > { %3227 = vmatpush3.bf16.msra.mxu1 %v3618_v17  ;;  %v3653_v15 = vld [vmem:[#allocation8 + $0x40] sm:$0xff]   ;;  %v4333_v17 = vld [vmem:[%s4808_s2] ss:$0 sm:$0xff]  ;;  %vm4355_vm6 = vmand %vm649_vm1, %vm650_vm2 }
  0xba   : > { %3195 = vmatpush3.bf16.msra.mxu0 %v3610_v12  ;;  %3228 = vmatprep.subr.bf16.mxu1 %v3963_v0  ;;  %v3650_v12 = vld [vmem:[#allocation8 + $0x138] sm:$0xff]   ;;  %vm4362_vm7 = vmand %vm649_vm1, %vm727_vm3 }
  0xbb   : > { %3196 = vmatprep.subr.bf16.mxu0 %v3612_v14  ;;  %vm4390_vm10 = vmand %vm676_vm4, %vm677_vm5 }
  0xbc   : > { %vm4397_vm11 = vmand %vm753_vm8, %vm754_vm9 }
  0xbd   : > { %3229 = vmatpush3.bf16.msra.mxu1 %v3619_v22 }
  0xbe   : > { %3197 = vmatpush3.bf16.msra.mxu0 %v3612_v14  ;;  %3230 = vmatprep.subr.bf16.mxu1 %v3963_v0  ;;  %v3652_v14 = vld [vmem:[#allocation8 + $0xf8] sm:$0xff]  }
  0xbf   : > { %3198 = vmatprep.subr.bf16.mxu0 %v3614_v16 }
  0xc1   : > { %3231 = vmatpush3.bf16.msra.mxu1 %v3620_v24 }
  0xc2   : > { %3199 = vmatpush3.bf16.msra.mxu0 %v3614_v16  ;;  %2928 = vmatprep.subr.bf16.mxu1 %v3629_v55  ;;  %v3669_v16 = vld [vmem:[#allocation8 + $0x1c0] sm:$0xff]  }
  0xc3   : > { %3236 = vmatprep.subr.bf16.mxu0 %v3963_v0  ;;  %v655_v55 = vld [vmem:[#allocation2 + $0x30] sm:$0xff] }
  0xc4   : > { %3233 = vmatmul.mubr.bf16.vlgmr.msra.gmra.mrb[0].mxu1 %v790_v34 }
  0xc5   : > { %3201 = vmatmul.mubr.bf16.vlgmr.msra.gmra.mrb[0].mxu0 %v377_v23  ;;  %2929 = vmatpush3.bf16.msra.mxu1 %v3631_v57  ;;  %v732_v57 = vld [vmem:[#allocation2 + $0x40] sm:$0xff] }
  0xc6   : > { %3204 = vmatprep.mubr.bf16.mxu0 %v378_v28  ;;  %3237 = vmatpush3.bf16.msra.mxu0 %v3621_v27 }
  0xc7   : > { %3238 = vmatprep.subr.bf16.mxu0 %v3963_v0  ;;  %2930 = vmatprep.subr.bf16.mxu1 %v3632_v58 }
  0xc9   : > { %2931 = vmatpush3.bf16.msra.mxu1 %v3634_v60 }
  0xca   : > { %3239 = vmatpush3.bf16.msra.mxu0 %v3622_v31  ;;  %2932 = vmatprep.subr.bf16.mxu1 %v3635_v61 }
  0xcb   : > { %3240 = vmatprep.subr.bf16.mxu0 %v3963_v0 }
  0xcd   : > { %3205 = vmatmul.mubr.bf16.gmra.mrb[4].mxu0 %v379_v36  ;;  %2933 = vmatpush3.bf16.msra.mxu1 %v3637_v63 }
  0xce   : > { %3208 = vmatprep.mubr.bf16.mxu0 %v380_v37  ;;  %3241 = vmatpush3.bf16.msra.mxu0 %v3623_v35 }
  0xcf   : > { %3242 = vmatprep.subr.bf16.mxu0 %v3963_v0 }
  0xd2   : > { %3243 = vmatpush3.bf16.msra.mxu0 %v3624_v40 }
  0xd3   : > { %3244 = vmatprep.subr.bf16.mxu0 %v3963_v0 }
  0xd5   : > { %3209 = vmatmul.mubr.bf16.gmra.mrb[8].mxu0 %v381_v44 }
  0xd6   : > { %3212 = vmatprep.mubr.bf16.mxu0 %v382_v45  ;;  %3245 = vmatpush3.bf16.msra.mxu0 %v3625_v43 }
  0xd7   : > { %3246 = vmatprep.subr.bf16.mxu0 %v3963_v0 }
  0xda   : > { %3247 = vmatpush3.bf16.msra.mxu0 %v3626_v48 }
  0xdb   : > { %3248 = vmatprep.subr.bf16.mxu0 %v3963_v0 }
  0xdd   : > { %3213 = vmatmul.mubr.bf16.gmra.mrb[12].mxu0 %v383_v50  ;;  %v3686_v50 = vld [vmem:[#allocation8 + $0x1b0] sm:$0xff]  }
  0xde   : > { %3249 = vmatpush3.bf16.msra.mxu0 %v3627_v49  ;;  %3252 = vmatprep.mubr.msk.bf16.mxu0 %vm3964_vm0, %v3963_v0 }
  0xdf   : > { %3250 = vmatprep.subr.bf16.mxu0 %v3963_v0  ;;  %v3638_v0 = vld [vmem:[#allocation8 + $0x118] sm:$0xff]  }
  0xe0   : > { %2934 = vmatprep.subr.bf16.mxu1 %v3638_v0  ;;  %v652_v0 = vld [vmem:[#allocation2 + $0x18] sm:$0xff] }
  0xe1   : > { %2935 = vmatpush3.bf16.msra.mxu1 %v3640_v2 }
  0xe2   : > { %3251 = vmatpush3.bf16.msra.mxu0 %v3628_v51  ;;  %2936 = vmatprep.subr.bf16.mxu1 %v3641_v3 }
  0xe3   : > { %3256 = vmatprep.subr.bf16.mxu0 %v3630_v56 }
  0xe5   : > { %3253 = vmatmul.mubr.bf16.vlgmr.msra.gmra.mrb[16].mxu0 %v943_v54  ;;  %2937 = vmatpush3.bf16.msra.mxu1 %v3643_v5 }
  0xe6   : > { %3257 = vmatpush3.bf16.msra.mxu0 %v3630_v56  ;;  %2938 = vmatprep.subr.bf16.mxu1 %v3644_v6  ;;  %v3687_v56 = vld [vmem:[#allocation8 + $0x1f8] sm:$0xff]  }
  0xe7   : > { %3258 = vmatprep.subr.bf16.mxu0 %v3633_v59 }
  0xe9   : > { %2939 = vmatpush3.bf16.msra.mxu1 %v3646_v8 }
  0xea   : > { %3259 = vmatpush3.bf16.msra.mxu0 %v3633_v59  ;;  %2940 = vmatprep.subr.bf16.mxu1 %v3647_v9 }
  0xeb   : > { %3260 = vmatprep.subr.bf16.mxu0 %v3636_v62 }
  0xed   : > { %2941 = vmatpush3.bf16.msra.mxu1 %v3649_v11 }
  0xee   : > { %3261 = vmatpush3.bf16.msra.mxu0 %v3636_v62  ;;  %2942 = vmatprep.subr.bf16.mxu1 %v3650_v12 }
  0xef   : > { %3262 = vmatprep.subr.bf16.mxu0 %v3639_v1 }
  0xf1   : > { %2943 = vmatpush3.bf16.msra.mxu1 %v3652_v14 }
  0xf2   : > { %3263 = vmatpush3.bf16.msra.mxu0 %v3639_v1  ;;  %3088 = vmatprep.subr.bf16.mxu1 %v3669_v16  ;;  %v729_v1 = vld [vmem:[#allocation2 + $0x28] sm:$0xff] }
  0xf3   : > { %3264 = vmatprep.subr.bf16.mxu0 %v3642_v4 }
  0xf6   : > { %3265 = vmatpush3.bf16.msra.mxu0 %v3642_v4 }
  0xf7   : > { %3266 = vmatprep.subr.bf16.mxu0 %v3645_v7 }
  0xfa   : > { %3267 = vmatpush3.bf16.msra.mxu0 %v3645_v7 }
  0xfb   : > { %3268 = vmatprep.subr.bf16.mxu0 %v3648_v10 }
  0xfe   : > { %3269 = vmatpush3.bf16.msra.mxu0 %v3648_v10 }
  0xff   : > { %3270 = vmatprep.subr.bf16.mxu0 %v3651_v13 }
 0x102   : > { %3271 = vmatpush3.bf16.msra.mxu0 %v3651_v13 }
 0x103   : > { %3008 = vmatprep.subr.bf16.mxu0 %v3653_v15 }
 0x197   : > { %v896_v28 = vpop.f32.mrb[0].mxu1 }
 0x198   : > { %v3202_v18 = vpop.f32.mrb[0].mxu0  ;;  %v897_v31 = vadd.f32 %v4333_v17, %v896_v28  ;;  %v3234_v32 = vpop.f32.mrb[1].mxu1 }
 0x199   : > { %v498_v19 = vadd.f32 %v3202_v18, %v4333_v17  ;;  %v489_v20 = vpop.f32.mrb[1].mxu0  ;;  %v899_v34 = vpop.f32.mrb[2].mxu1  ;;  %v661_v32 = vld [vmem:[#allocation2 + $0x60] sm:$0xff] }
 0x19a   : > { %v490_v21 = vadd.f32 %v4333_v17, %v489_v20  ;;  %v3203_v22 = vpop.f32.mrb[2].mxu0  ;;  %v903_v37 = vmax.f32 %v897_v31, 0.0  ;;  %v3235_v39 = vpop.f32.mrb[3].mxu1  ;;  %v900_v44 = vadd.f32 %v4333_v17, %v899_v34  ;;  %v738_v34 = vld [vmem:[#allocation2 + $0x70] sm:$0xff] }
 0x19b   : > { %v501_v23 = vadd.f32 %v3203_v22, %v4333_v17  ;;  %v492_v24 = vpop.f32.mrb[3].mxu0  ;;  %v554_v26 = vmax.f32 %v498_v19, 0.0 }
 0x19c   : > { %v493_v25 = vadd.f32 %v4333_v17, %v492_v24  ;;  %v552_v29 = vmax.f32 %v490_v21, 0.0  ;;  %v906_v54 = vmul.f32 %v905_v38, %v903_v37  ;;  %v904_v3 = vmax.f32 %v900_v44, 0.0  ;;  %v735_v44 = vld [vmem:[#allocation2 + $0x58] sm:$0xff] }
 0x19d   : > { %v555_v27 = vmax.f32 %v501_v23, 0.0 }
 0x19e   : > { %v553_v30 = vmax.f32 %v493_v25, 0.0  ;;  %v907_v11 = vmul.f32 %v905_v38, %v904_v3 }
 0x19f   : > { %v4340_v33 = vpack.c.bf16 %v555_v27, %v554_v26 }
 0x1a0   : > { %v4342_v35 = vpack.c.bf16 %v553_v30, %v552_v29  ;;  %v3206_v36 = vpop.f32.mrb[4].mxu0  ;;  %v4382_v21 = vpack.c.bf16 %v907_v11, %v906_v54 }
 0x1a1   : > { %578 = vst [vmem:[#allocation2 + $0x38] sm:$0xff] %v4340_v33  ;;  %v593_v40 = vshrl.u32 %v4340_v33, 16  ;;  %v596_v41 = vshll.u32 %v4340_v33, 16  ;;  %v514_v42 = vadd.f32 %v3206_v36, %v4333_v17  ;;  %v505_v43 = vpop.f32.mrb[5].mxu0 }
 0x1a2   : > { %v586_v45 = vshrl.u32 %v4342_v35, 16  ;;  %v589_v46 = vshll.u32 %v4342_v35, 16  ;;  %v506_v47 = vadd.f32 %v4333_v17, %v505_v43  ;;  %v3207_v48 = vpop.f32.mrb[6].mxu0  ;;  %1408 = vmatprep.mubr.bf16.mxu1 %v4342_v35  ;;  %v658_v43 = vld [vmem:[#allocation2 + $0x48] sm:$0xff] }
 0x1a3   : > { %v595_v49 = vrot.slane %v593_v40, 7  ;;  %v705_v51 = vrot.slane %v596_v41, 1  ;;  %v517_v52 = vadd.f32 %v3207_v48, %v4333_v17  ;;  %v508_v53 = vpop.f32.mrb[7].mxu0  ;;  %v558_v60 = vmax.f32 %v514_v42, 0.0 }
 0x1a4   : > { %v588_v58 = vrot.slane %v586_v45, 7  ;;  %v703_v59 = vrot.slane %v589_v46, 1  ;;  %v509_v61 = vadd.f32 %v4333_v17, %v508_v53  ;;  %v556_v6 = vmax.f32 %v506_v47, 0.0 }
 0x1a5   : > { %v598_v62 = vor.u32 %v596_v41, %v595_v49  ;;  %v706_v63 = vor.u32 %v705_v51, %v593_v40  ;;  %v559_v2 = vmax.f32 %v517_v52, 0.0  ;;  %v914_v51 = vshll.u32 %v4382_v21, 16 }
 0x1a6   : > { %v591_v4 = vor.u32 %v589_v46, %v588_v58  ;;  %v704_v5 = vor.u32 %v703_v59, %v586_v45  ;;  %v557_v7 = vmax.f32 %v509_v61, 0.0  ;;  %v911_v46 = vshrl.u32 %v4382_v21, 16 }
 0x1a7   : > { %v656_v8 = vsel %vm4355_vm6, %v598_v62, %v655_v55  ;;  %v733_v9 = vsel %vm4362_vm7, %v706_v63, %v732_v57  ;;  %v4371_v10 = vpack.c.bf16 %v559_v2, %v558_v60 }
 0x1a8   : > { %657 = vst [vmem:[#allocation2 + $0x30] sm:$0xff] %v656_v8  ;;  %734 = vst [vmem:[#allocation2 + $0x40] sm:$0xff] %v733_v9  ;;  %v653_v12 = vsel %vm4355_vm6, %v591_v4, %v652_v0  ;;  %v730_v13 = vsel %vm4362_vm7, %v704_v5, %v729_v1  ;;  %v4377_v14 = vpack.c.bf16 %v557_v7, %v556_v6  ;;  %v3210_v15 = vpop.f32.mrb[8].mxu0  ;;  %v913_v58 = vrot.slane %v911_v46, 7  ;;  %v918_v5 = vld [vmem:[#allocation2] sm:$0xff] }
 0x1a9   : > { %654 = vst [vmem:[#allocation2 + $0x18] sm:$0xff] %v653_v12  ;;  %731 = vst [vmem:[#allocation2 + $0x28] sm:$0xff] %v730_v13  ;;  %v607_v16 = vshrl.u32 %v4371_v10, 16  ;;  %v610_v18 = vshll.u32 %v4371_v10, 16  ;;  %v530_v19 = vadd.f32 %v3210_v15, %v4333_v17  ;;  %v521_v20 = vpop.f32.mrb[9].mxu0  ;;  %v924_v9 = vrot.slane %v914_v51, 1 }
 0x1aa   : > { %v600_v22 = vshrl.u32 %v4377_v14, 16  ;;  %v603_v23 = vshll.u32 %v4377_v14, 16  ;;  %v522_v24 = vadd.f32 %v4333_v17, %v521_v20  ;;  %v3211_v25 = vpop.f32.mrb[10].mxu0  ;;  %v916_v8 = vor.u32 %v914_v51, %v913_v58  ;;  %v667_v20 = vld [vmem:[#allocation2 + $0x90] sm:$0xff]  ;;  %v3655_v51 = vld [vmem:[#allocation8 + $0x48] sm:$0xff]  }
 0x1ab   : > { %v609_v26 = vrot.slane %v607_v16, 7  ;;  %v709_v27 = vrot.slane %v610_v18, 1  ;;  %v562_v28 = vmax.f32 %v530_v19, 0.0  ;;  %v533_v29 = vadd.f32 %v3211_v25, %v4333_v17  ;;  %v524_v30 = vpop.f32.mrb[11].mxu0 }
 0x1ac   : > { %v602_v36 = vrot.slane %v600_v22, 7  ;;  %v707_v37 = vrot.slane %v603_v23, 1  ;;  %v560_v38 = vmax.f32 %v522_v24, 0.0  ;;  %v525_v39 = vadd.f32 %v4333_v17, %v524_v30  ;;  %v664_v30 = vld [vmem:[#allocation2 + $0x78] sm:$0xff] }
 0x1ad   : > { %v612_v41 = vor.u32 %v610_v18, %v609_v26  ;;  %v710_v42 = vor.u32 %v709_v27, %v607_v16  ;;  %v563_v45 = vmax.f32 %v533_v29, 0.0  ;;  %v927_v16 = vld [vmem:[#allocation2 + $0x10] sm:$0xff]  ;;  %v919_v25 = vsel %vm4355_vm6, %v916_v8, %v918_v5 }
 0x1ae   : > { %v605_v47 = vor.u32 %v603_v23, %v602_v36  ;;  %v708_v48 = vor.u32 %v707_v37, %v600_v22  ;;  %v561_v49 = vmax.f32 %v525_v39, 0.0  ;;  %v744_v22 = vld [vmem:[#allocation2 + $0xa0] sm:$0xff]  ;;  %v925_v26 = vor.u32 %v924_v9, %v911_v46  ;;  %920 = vst [vmem:[#allocation2] sm:$0xff] %v919_v25  ;;  %v3656_v9 = vld [vmem:[#allocation8 + $0x8] sm:$0xff]  }
 0x1af   : > { %v682_v52 = vld [vmem:[#allocation2 + $0x30] sm:$0x1]  ;;  %v759_v53 = vld [vmem:[#allocation2 + $0x40] sm:$0x80]  ;;  %v662_v54 = vsel %vm4355_vm6, %v612_v41, %v661_v32  ;;  %v739_v55 = vsel %vm4362_vm7, %v710_v42, %v738_v34  ;;  %v4407_v57 = vpack.c.bf16 %v563_v45, %v562_v28  ;;  %v741_v32 = vld [vmem:[#allocation2 + $0x88] sm:$0xff] }
 0x1b0   : > { %v683_v59 = vsel %vm4390_vm10, 0, %v682_v52  ;;  %v760_v60 = vsel %vm4397_vm11, 0, %v759_v53  ;;  %v679_v61 = vld [vmem:[#allocation2 + $0x18] sm:$0x1]  ;;  %v756_v62 = vld [vmem:[#allocation2 + $0x28] sm:$0x80]  ;;  %v659_v63 = vsel %vm4355_vm6, %v605_v47, %v658_v43  ;;  %v736_v0 = vsel %vm4362_vm7, %v708_v48, %v735_v44 }
 0x1b1   : > { %663 = vst [vmem:[#allocation2 + $0x60] sm:$0xff] %v662_v54  ;;  %740 = vst [vmem:[#allocation2 + $0x70] sm:$0xff] %v739_v55  ;;  %v680_v1 = vsel %vm4390_vm10, 0, %v679_v61  ;;  %v757_v2 = vsel %vm4397_vm11, 0, %v756_v62  ;;  %v621_v3 = vshrl.u32 %v4407_v57, 16  ;;  %v624_v4 = vshll.u32 %v4407_v57, 16 }
 0x1b2   : > { %684 = vst [vmem:[#allocation2 + $0x30] sm:$0x1] %v683_v59  ;;  %761 = vst [vmem:[#allocation2 + $0x40] sm:$0x80] %v760_v60  ;;  %v3214_v6 = vpop.f32.mrb[12].mxu0  ;;  %v4423_v7 = vpack.c.bf16 %v561_v49, %v560_v38  ;;  %v928_v38 = vsel %vm4362_vm7, %v925_v26, %v927_v16  ;;  %v3654_v41 = vld [vmem:[#allocation8] sm:$0xff]  }
 0x1b3   : > { %660 = vst [vmem:[#allocation2 + $0x48] sm:$0xff] %v659_v63  ;;  %737 = vst [vmem:[#allocation2 + $0x58] sm:$0xff] %v736_v0  ;;  %v4426_v11 = vadd.f32 %v3214_v6, %v4333_v17  ;;  %v537_v12 = vpop.f32.mrb[13].mxu0  ;;  %v623_v13 = vrot.slane %v621_v3, 7  ;;  %v713_v15 = vrot.slane %v624_v4, 1  ;;  %v3670_v42 = vld [vmem:[#allocation8 + $0x180] sm:$0xff]  }
 0x1b4   : > { %681 = vst [vmem:[#allocation2 + $0x18] sm:$0x1] %v680_v1  ;;  %758 = vst [vmem:[#allocation2 + $0x28] sm:$0x80] %v757_v2  ;;  %v538_v18 = vadd.f32 %v4333_v17, %v537_v12  ;;  %v3215_v19 = vpop.f32.mrb[14].mxu0  ;;  %v614_v23 = vshrl.u32 %v4423_v7, 16 }
 0x1b5   : > { %v617_v24 = vshll.u32 %v4423_v7, 16  ;;  %v540_v27 = vpop.f32.mrb[15].mxu0  ;;  %v626_v28 = vor.u32 %v624_v4, %v623_v13  ;;  %v714_v29 = vor.u32 %v713_v15, %v621_v3  ;;  %v566_v34 = vmax.f32 %v4426_v11, 0.0  ;;  %v4445_v43 = vld [vmem:[%s4808_s2] ss:$0 sm:$0xff]  ;;  %929 = vst [vmem:[#allocation2 + $0x10] sm:$0xff] %v928_v38 }
 0x1b6   : > { %v616_v36 = vrot.slane %v614_v23, 7  ;;  %v549_v39 = vadd.f32 %v3215_v19, %v4333_v17  ;;  %v564_v48 = vmax.f32 %v538_v18, 0.0  ;;  %v541_v49 = vadd.f32 %v4333_v17, %v540_v27  ;;  %v3672_v52 = vld [vmem:[#allocation8 + $0x1c8] sm:$0xff]   ;;  %v921_v13 = vld [vmem:[#allocation2] sm:$0x1] }
 0x1b7   : > { %v711_v37 = vrot.slane %v617_v24, 1  ;;  %v668_v46 = vsel %vm4355_vm6, %v626_v28, %v667_v20  ;;  %v745_v47 = vsel %vm4362_vm7, %v714_v29, %v744_v22  ;;  %v3657_v15 = vld [vmem:[#allocation8 + $0x50] sm:$0xff]   ;;  %v3673_v16 = vld [vmem:[#allocation8 + $0x188] sm:$0xff]   ;;  %v922_v19 = vsel %vm4390_vm10, 0, %v921_v13  ;;  %v3660_v13 = vld [vmem:[#allocation8 + $0x18] sm:$0xff]  }
 0x1b8   : > { %v688_v44 = vld [vmem:[#allocation2 + $0x60] sm:$0x1]  ;;  %v765_v45 = vld [vmem:[#allocation2 + $0x70] sm:$0x80]  ;;  %669 = vst [vmem:[#allocation2 + $0x90] sm:$0xff] %v668_v46  ;;  %746 = vst [vmem:[#allocation2 + $0xa0] sm:$0xff] %v745_v47  ;;  %v619_v59 = vor.u32 %v617_v24, %v616_v36 }
 0x1b9   : > { %v689_v53 = vsel %vm4390_vm10, 0, %v688_v44  ;;  %v766_v54 = vsel %vm4397_vm11, 0, %v765_v45  ;;  %v712_v60 = vor.u32 %v711_v37, %v614_v23  ;;  %v567_v62 = vmax.f32 %v549_v39, 0.0  ;;  %v4470_v4 = vld [vmem:[#allocation2 + $0x40] sm:$0xff]  ;;  %v1049_v5 = vpop.f32.mrb[16].mxu0  ;;  %v750_v39 = vld [vmem:[#allocation2 + $0xd0] sm:$0xff] }
 0x1ba   : > { %v685_v55 = vld [vmem:[#allocation2 + $0x48] sm:$0x1]  ;;  %v762_v58 = vld [vmem:[#allocation2 + $0x58] sm:$0x80]  ;;  %690 = vst [vmem:[#allocation2 + $0x60] sm:$0x1] %v689_v53  ;;  %v665_v2 = vsel %vm4355_vm6, %v619_v59, %v664_v30  ;;  %v1050_v11 = vadd.f32 %v4445_v43, %v1049_v5 }
 0x1bb   : > { %767 = vst [vmem:[#allocation2 + $0x70] sm:$0x80] %v766_v54  ;;  %v686_v61 = vsel %vm4390_vm10, 0, %v685_v55  ;;  %v763_v17 = vsel %vm4397_vm11, 0, %v762_v58  ;;  %v565_v63 = vmax.f32 %v541_v49, 0.0  ;;  %v4460_v0 = vld [vmem:[#allocation2 + $0x18] sm:$0xff]  ;;  %v742_v3 = vsel %vm4362_vm7, %v712_v60, %v741_v32 }
 0x1bc   : > { %v4462_v1 = vld [vmem:[#allocation2 + $0x28] sm:$0xff]  ;;  %687 = vst [vmem:[#allocation2 + $0x48] sm:$0x1] %v686_v61  ;;  %764 = vst [vmem:[#allocation2 + $0x58] sm:$0x80] %v763_v17  ;;  %1409 = vmatmul.mubr.bf16.vlgmr.msra.gmra.mrb[4].mxu1 %v4460_v0  ;;  %v4472_v6 = vpack.c.bf16 %v567_v62, %v566_v34  ;;  %v3254_v12 = vpop.f32.mrb[17].mxu0 }
 0x1bd   : > { %3272 = vmatprep.mubr.bf16.mxu0 %v4462_v1  ;;  %666 = vst [vmem:[#allocation2 + $0x78] sm:$0xff] %v665_v2  ;;  %743 = vst [vmem:[#allocation2 + $0x88] sm:$0xff] %v742_v3  ;;  %v4474_v8 = vpack.c.bf16 %v565_v63, %v564_v48  ;;  %1416 = vmatprep.mubr.bf16.mxu1 %v4340_v33  ;;  %v1052_v18 = vpop.f32.mrb[18].mxu0  ;;  %v3675_v24 = vld [vmem:[#allocation8 + $0x1d0] sm:$0xff]   ;;  %v930_v26 = vld [vmem:[#allocation2 + $0x10] sm:$0x80] }
 0x1be   : > { %3273 = vmatmul.mubr.bf16.vlgmr.msra.gmra.mrb[20].mxu0 %v4470_v4  ;;  %3089 = vmatpush3.bf16.msra.mxu1 %v3670_v42  ;;  %v635_v20 = vshrl.u32 %v4472_v6, 16  ;;  %v638_v22 = vshll.u32 %v4472_v6, 16  ;;  %v3255_v25 = vpop.f32.mrb[19].mxu0  ;;  %923 = vst [vmem:[#allocation2] sm:$0x1] %v922_v19  ;;  %v673_v27 = vld [vmem:[#allocation2 + $0xc0] sm:$0xff]  ;;  %v1053_v32 = vadd.f32 %v4445_v43, %v1052_v18  ;;  %v1058_v42 = vstv %s936_s3 }
 0x1bf   : > { %3009 = vmatpush3.bf16.msra.mxu0 %v3654_v41  ;;  %v628_v23 = vshrl.u32 %v4474_v8, 16  ;;  %3090 = vmatprep.subr.bf16.mxu1 %v3672_v52  ;;  %v631_v28 = vshll.u32 %v4474_v8, 16  ;;  %v3658_v29 = vld [vmem:[#allocation8 + $0x10] sm:$0xff]   ;;  %v1056_v30 = vmax.f32 %v1050_v11, 0.0  ;;  %v694_v34 = vld [vmem:[#allocation2 + $0x90] sm:$0x1] }
 0x1c0   : > { %3010 = vmatprep.subr.bf16.mxu0 %v3655_v51  ;;  %v771_v36 = vld [vmem:[#allocation2 + $0xa0] sm:$0x80]  ;;  %v931_v37 = vsel %vm4397_vm11, 0, %v930_v26  ;;  %v637_v38 = vrot.slane %v635_v20, 7  ;;  %v670_v41 = vld [vmem:[#allocation2 + $0xa8] sm:$0xff]  ;;  %v695_v44 = vsel %vm4390_vm10, 0, %v694_v34 }
 0x1c1   : > { %v772_v45 = vsel %vm4397_vm11, 0, %v771_v36  ;;  %932 = vst [vmem:[#allocation2 + $0x10] sm:$0x80] %v931_v37  ;;  %v717_v46 = vrot.slane %v638_v22, 1  ;;  %v630_v47 = vrot.slane %v628_v23, 7  ;;  %v747_v48 = vld [vmem:[#allocation2 + $0xb8] sm:$0xff]  ;;  %v1059_v63 = vmul.f32 %v1058_v42, %v1056_v30 }
 0x1c2   : > { %v3659_v43 = vld [vmem:[#allocation8 + $0x58] sm:$0xff]   ;;  %3091 = vmatpush3.bf16.msra.mxu1 %v3673_v16  ;;  %v3676_v49 = vld [vmem:[#allocation8 + $0x190] sm:$0xff]   ;;  %696 = vst [vmem:[#allocation2 + $0x90] sm:$0x1] %v695_v44  ;;  %773 = vst [vmem:[#allocation2 + $0xa0] sm:$0x80] %v772_v45  ;;  %v640_v51 = vor.u32 %v638_v22, %v637_v38 }
 0x1c3   : > { %3011 = vmatpush3.bf16.msra.mxu0 %v3656_v9  ;;  %v715_v52 = vrot.slane %v631_v28, 1  ;;  %v4493_v53 = vld [vmem:[#allocation2 + $0x30] sm:$0xff]  ;;  %v4495_v54 = vld [vmem:[#allocation2 + $0x58] sm:$0xff]  ;;  %3092 = vmatprep.subr.bf16.mxu1 %v3675_v24  ;;  %v3677_v55 = vld [vmem:[#allocation8 + $0x1d8] sm:$0xff]   ;;  %v1057_v58 = vmax.f32 %v1053_v32, 0.0  ;;  %v718_v61 = vor.u32 %v717_v46, %v635_v20  ;;  %v633_v17 = vor.u32 %v631_v28, %v630_v47  ;;  %s4863_s3 = sld [smem:[#allocation19_spill]] }
 0x1c4   : > { %3012 = vmatprep.subr.bf16.mxu0 %v3657_v15  ;;  %v691_v59 = vld [vmem:[#allocation2 + $0x78] sm:$0x1]  ;;  %v768_v60 = vld [vmem:[#allocation2 + $0x88] sm:$0x80]  ;;  %1417 = vmatmul.mubr.bf16.gmra.mrb[8].mxu1 %v4493_v53  ;;  %v4499_v62 = vld [vmem:[#allocation2 + $0x70] sm:$0xff]  ;;  %v674_v5 = vsel %vm4355_vm6, %v640_v51, %v673_v27 }
 0x1c5   : > { %3276 = vmatprep.mubr.bf16.mxu0 %v4495_v54  ;;  %v692_v2 = vsel %vm4390_vm10, 0, %v691_v59  ;;  %v769_v3 = vsel %vm4397_vm11, 0, %v768_v60  ;;  %v716_v9 = vor.u32 %v715_v52, %v628_v23  ;;  %1424 = vmatprep.mubr.bf16.mxu1 %v4377_v14  ;;  %675 = vst [vmem:[#allocation2 + $0xc0] sm:$0xff] %v674_v5  ;;  %v751_v11 = vsel %vm4362_vm7, %v718_v61, %v750_v39  ;;  %v3678_v15 = vld [vmem:[#allocation8 + $0x198] sm:$0xff]   ;;  %v3661_v19 = vld [vmem:[#allocation8 + $0x60] sm:$0xff]   ;;  %v3663_v27 = vld [vmem:[#allocation8 + $0x68] sm:$0xff]  }
 0x1c6   : > { %3277 = vmatmul.mubr.bf16.gmra.mrb[24].mxu0 %v4499_v62  ;;  %693 = vst [vmem:[#allocation2 + $0x78] sm:$0x1] %v692_v2  ;;  %770 = vst [vmem:[#allocation2 + $0x88] sm:$0x80] %v769_v3  ;;  %v671_v12 = vsel %vm4355_vm6, %v633_v17, %v670_v41  ;;  %3093 = vmatpush3.bf16.msra.mxu1 %v3676_v49  ;;  %v1060_v16 = vmul.f32 %v1058_v42, %v1057_v58  ;;  %v3680_v20 = vld [vmem:[#allocation8 + $0x1e0] sm:$0xff]   ;;  %v4519_v26 = vld [vmem:[#allocation2 + $0x48] sm:$0xff] }
 0x1c7   : > { %3013 = vmatpush3.bf16.msra.mxu0 %v3658_v29  ;;  %752 = vst [vmem:[#allocation2 + $0xd0] sm:$0xff] %v751_v11  ;;  %672 = vst [vmem:[#allocation2 + $0xa8] sm:$0xff] %v671_v12  ;;  %v748_v18 = vsel %vm4362_vm7, %v716_v9, %v747_v48  ;;  %3094 = vmatprep.subr.bf16.mxu1 %v3677_v55  ;;  %v3662_v23 = vld [vmem:[#allocation8 + $0x20] sm:$0xff]   ;;  %v3664_v28 = vld [vmem:[#allocation8 + $0x28] sm:$0xff]  }
 0x1c8   : > { %3014 = vmatprep.subr.bf16.mxu0 %v3659_v43  ;;  %749 = vst [vmem:[#allocation2 + $0xb8] sm:$0xff] %v748_v18  ;;  %v4515_v22 = vpack.c.bf16 %v1060_v16, %v1059_v63  ;;  %v3681_v29 = vld [vmem:[#allocation8 + $0x1a0] sm:$0xff]   ;;  %v3682_v30 = vld [vmem:[#allocation8 + $0x1e8] sm:$0xff]   ;;  %v1081_v39 = vld [vmem:[#allocation2 + $0xe8] sm:$0xff] }
 0x1c9   : > { %v1072_v34 = vld [vmem:[#allocation2 + $0xd8] sm:$0xff]  ;;  %v4528_v45 = vld [vmem:[#allocation2 + $0xa0] sm:$0xff]  ;;  %v3667_v63 = vld [vmem:[#allocation8 + $0x78] sm:$0xff]   ;;  %p4865_p6 = scmp.ne.s32.totalorder %s4863_s3, 0 }
 0x1ca   : > { %3095 = vmatpush3.bf16.msra.mxu1 %v3678_v15  ;;  %v1065_v24 = vshrl.u32 %v4515_v22, 16  ;;  %v1068_v25 = vshll.u32 %v4515_v22, 16  ;;  %v3665_v51 = vld [vmem:[#allocation8 + $0x70] sm:$0xff]   ;;  %v3683_v59 = vld [vmem:[#allocation8 + $0x1a8] sm:$0xff]   ;;  %v3668_v2 = vld [vmem:[#allocation8 + $0x38] sm:$0xff]  }
 0x1cb   : > { %3015 = vmatpush3.bf16.msra.mxu0 %v3660_v13  ;;  %3096 = vmatprep.subr.bf16.mxu1 %v3680_v20  ;;  %v3666_v60 = vld [vmem:[#allocation8 + $0x30] sm:$0xff]   ;;  %v3671_v3 = vld [vmem:[#allocation8 + $0x80] sm:$0xff]   ;;  %v3688_v13 = vld [vmem:[#allocation8 + $0x1b8] sm:$0xff]   ;;  %p3825_p8 = pnand %p3824_p13, %p4865_p6 }
 0x1cc   : > { %3016 = vmatprep.subr.bf16.mxu0 %v3661_v19  ;;  %1425 = vmatmul.mubr.bf16.gmra.mrb[12].mxu1 %v4519_v26  ;;  %v1067_v32 = vrot.slane %v1065_v24, 7  ;;  %v1078_v36 = vrot.slane %v1068_v25, 1  ;;  %v700_v37 = vld [vmem:[#allocation2 + $0xc0] sm:$0x1]  ;;  %v3674_v19 = vld [vmem:[#allocation8 + $0x88] sm:$0xff]   ;;  %v1174_v40 = vld [vmem:[#allocation2 + $0x90] sm:$0xff] }
 0x1cd   : > { %v4522_v38 = vld [vmem:[#allocation2 + $0x88] sm:$0xff]  ;;  %1432 = vmatprep.mubr.bf16.mxu1 %v4371_v10  ;;  %v701_v41 = vsel %vm4390_vm10, 0, %v700_v37  ;;  %v3685_v61 = vld [vmem:[#allocation8 + $0x1f0] sm:$0xff]   ;;  %v1171_v18 = vld [vmem:[#allocation2 + $0x78] sm:$0xff]  ;;  %p3826_p12 = pneg %p3825_p8 }
 0x1ce   : > { %v777_v42 = vld [vmem:[#allocation2 + $0xd0] sm:$0x80]  ;;  %v697_v44 = vld [vmem:[#allocation2 + $0xa8] sm:$0x1]  ;;  %3280 = vmatprep.mubr.bf16.mxu0 %v4522_v38  ;;  %v1070_v46 = vor.u32 %v1068_v25, %v1067_v32  ;;  %v1079_v47 = vor.u32 %v1078_v36, %v1065_v24  ;;  %702 = vst [vmem:[#allocation2 + $0xc0] sm:$0x1] %v701_v41  ;;  %3097 = vmatpush3.bf16.msra.mxu1 %v3681_v29 }
 0x1cf   : > { %3017 = vmatpush3.bf16.msra.mxu0 %v3662_v23  ;;  %v778_v48 = vsel %vm4397_vm11, 0, %v777_v42  ;;  %v698_v43 = vsel %vm4390_vm10, 0, %v697_v44  ;;  %v774_v49 = vld [vmem:[#allocation2 + $0xb8] sm:$0x80]  ;;  %3098 = vmatprep.subr.bf16.mxu1 %v3682_v30  ;;  %v4541_v17 = vld [vmem:[#allocation2 + $0x60] sm:$0xff]  ;;  %v3689_v24 = vld [vmem:[#allocation8 + $0xa0] sm:$0xff]  }
 0x1d0   : > { %3281 = vmatmul.mubr.bf16.gmra.mrb[28].mxu0 %v4528_v45  ;;  %3018 = vmatprep.subr.bf16.mxu0 %v3663_v27  ;;  %779 = vst [vmem:[#allocation2 + $0xd0] sm:$0x80] %v778_v48  ;;  %699 = vst [vmem:[#allocation2 + $0xa8] sm:$0x1] %v698_v43  ;;  %v775_v52 = vsel %vm4397_vm11, 0, %v774_v49  ;;  %v1073_v55 = vsel %vm4355_vm6, %v1070_v46, %v1072_v34  ;;  %v1082_v58 = vsel %vm4362_vm7, %v1079_v47, %v1081_v39  ;;  %v1087_v31 = vld [vmem:[#allocation2] sm:$0xff] }
 0x1d1   : > { %776 = vst [vmem:[#allocation2 + $0xb8] sm:$0x80] %v775_v52  ;;  %1074 = vst [vmem:[#allocation2 + $0xd8] sm:$0xff] %v1073_v55  ;;  %v3679_v20 = vld [vmem:[#allocation8 + $0x90] sm:$0xff]   ;;  %v3692_v27 = vld [vmem:[#allocation8 + $0xb8] sm:$0xff]  }
 0x1d2   : > { %1083 = vst [vmem:[#allocation2 + $0xe8] sm:$0xff] %v1082_v58  ;;  %3099 = vmatpush3.bf16.msra.mxu1 %v3683_v59  ;;  %v3701_v29 = vld [vmem:[#allocation9] sm:$0xff]   ;;  %v3703_v30 = vld [vmem:[#allocation9 + $0x10] sm:$0xff]   ;;  %v3706_v32 = vld [vmem:[#allocation9 + $0x28] sm:$0xff]  }
 0x1d3   : > { %3019 = vmatpush3.bf16.msra.mxu0 %v3664_v28  ;;  %3100 = vmatprep.subr.bf16.mxu1 %v3685_v61  ;;  %v3693_v28 = vld [vmem:[#allocation8 + $0x200] sm:$0xff]   ;;  %v3707_v34 = vld [vmem:[#allocation9 + $0x30] sm:$0xff]   ;;  %v3708_v49 = vld [vmem:[#allocation9 + $0x38] sm:$0xff]  }
 0x1d4   : > { %3020 = vmatprep.subr.bf16.mxu0 %v3665_v51  ;;  %1433 = vmatmul.mubr.bf16.gmra.mrb[16].mxu1 %v4541_v17 }
 0x1d5   : > { %1440 = vmatprep.mubr.bf16.mxu1 %v4423_v7  ;;  %v1180_v25 = vld [vmem:[#allocation2 + $0xc0] sm:$0xff] }
 0x1d6   : > { %3101 = vmatpush3.bf16.msra.mxu1 %v3686_v50 }
 0x1d7   : > { %3021 = vmatpush3.bf16.msra.mxu0 %v3666_v60  ;;  %v4548_v12 = vld [vmem:[#allocation2 + $0xd0] sm:$0xff]  ;;  %3102 = vmatprep.subr.bf16.mxu1 %v3687_v56  ;;  %v1177_v23 = vld [vmem:[#allocation2 + $0xa8] sm:$0xff] }
 0x1d8   : > { %3022 = vmatprep.subr.bf16.mxu0 %v3667_v63  ;;  %v4545_v5 = vld [vmem:[#allocation2 + $0xb8] sm:$0xff] }
 0x1d9   : > { %v1075_v9 = vld [vmem:[#allocation2 + $0xd8] sm:$0x1]  ;;  %v1084_v11 = vld [vmem:[#allocation2 + $0xe8] sm:$0x80]  ;;  %3284 = vmatprep.mubr.bf16.mxu0 %v4545_v5 }
 0x1da   : > { %v1076_v15 = vsel %vm4390_vm10, 0, %v1075_v9  ;;  %v1085_v16 = vsel %vm4397_vm11, 0, %v1084_v11  ;;  %3285 = vmatmul.mubr.bf16.gmra.mrb[32].mxu0 %v4548_v12  ;;  %3103 = vmatpush3.bf16.msra.mxu1 %v3688_v13 }
 0x1db   : > { %1077 = vst [vmem:[#allocation2 + $0xd8] sm:$0x1] %v1076_v15  ;;  %1086 = vst [vmem:[#allocation2 + $0xe8] sm:$0x80] %v1085_v16  ;;  %1746 = vmatprep.mubr.bf16.mxu0 %v4382_v21  ;;  %3023 = vmatpush3.bf16.msra.mxu0 %v3668_v2  ;;  %v3684_v21 = vld [vmem:[#allocation8 + $0x98] sm:$0xff]  }
 0x1dc   : > { %1441 = vmatmul.mubr.bf16.gmra.mrb[20].mxu1 %v1171_v18  ;;  %3288 = vmatprep.subr.bf16.mxu0 %v3671_v3 }
 0x1dd   : > { %1448 = vmatprep.mubr.bf16.mxu1 %v4407_v57  ;;  %3352 = vmatprep.subr.bf16.mxu1 %v3701_v29 }
 0x1e2   : > { %1747 = vmatmul.mubr.bf16.vlgmr.msra.gmra.mrb[36].mxu0 %v1087_v31 }
 0x1e3   : > { %3289 = vmatpush3.bf16.msra.mxu0 %v3671_v3  ;;  %1754 = vmatprep.mubr.bf16.mxu0 %v4342_v35  ;;  %v3690_v35 = vld [vmem:[#allocation8 + $0xa8] sm:$0xff]  }
 0x1e4   : > { %1449 = vmatmul.mubr.bf16.gmra.mrb[24].mxu1 %v1174_v40  ;;  %3290 = vmatprep.subr.bf16.mxu0 %v3674_v19 }
 0x1e5   : > { %1456 = vmatprep.mubr.bf16.mxu1 %v4474_v8 }
 0x1e7   : > { %3291 = vmatpush3.bf16.msra.mxu0 %v3674_v19 }
 0x1e8   : > { %3292 = vmatprep.subr.bf16.mxu0 %v3679_v20 }
 0x1ea   : > { %1755 = vmatmul.mubr.bf16.gmra.mrb[40].mxu0 %v4460_v0  ;;  %v1910_v0 = vld [vmem:[#allocation2 + $0x38] sm:$0xff] }
 0x1eb   : > { %1762 = vmatprep.mubr.bf16.mxu0 %v4340_v33  ;;  %3293 = vmatpush3.bf16.msra.mxu0 %v3679_v20  ;;  %v3691_v33 = vld [vmem:[#allocation8 + $0xb0] sm:$0xff]  }
 0x1ec   : > { %1457 = vmatmul.mubr.bf16.gmra.mrb[28].mxu1 %v1177_v23  ;;  %3294 = vmatprep.subr.bf16.mxu0 %v3684_v21 }
 0x1ed   : > { %1464 = vmatprep.mubr.bf16.mxu1 %v4472_v6 }
 0x1ef   : > { %3295 = vmatpush3.bf16.msra.mxu0 %v3684_v21 }
 0x1f0   : > { %3296 = vmatprep.subr.bf16.mxu0 %v3689_v24 }
 0x1f2   : > { %1763 = vmatmul.mubr.bf16.gmra.mrb[44].mxu0 %v4493_v53 }
 0x1f3   : > { %1770 = vmatprep.mubr.bf16.mxu0 %v4377_v14  ;;  %3297 = vmatpush3.bf16.msra.mxu0 %v3689_v24 }
 0x1f4   : > { %1465 = vmatmul.mubr.bf16.gmra.mrb[32].mxu1 %v1180_v25  ;;  %3298 = vmatprep.subr.bf16.mxu0 %v3690_v35 }
 0x1f5   : > { %2158 = vmatprep.mubr.bf16.mxu1 %v1910_v0 }
 0x1f7   : > { %3299 = vmatpush3.bf16.msra.mxu0 %v3690_v35 }
 0x1f8   : > { %3300 = vmatprep.subr.bf16.mxu0 %v3691_v33 }
 0x1fa   : > { %1771 = vmatmul.mubr.bf16.gmra.mrb[48].mxu0 %v4519_v26 }
 0x1fb   : > { %1778 = vmatprep.mubr.bf16.mxu0 %v4371_v10  ;;  %3301 = vmatpush3.bf16.msra.mxu0 %v3691_v33 }
 0x1fc   : > { %2159 = vmatmul.mubr.bf16.vlgmr.msra.gmra.mrb[36].mxu1 %v4493_v53  ;;  %3302 = vmatprep.subr.bf16.mxu0 %v3692_v27  ;;  %v1930_v53 = vld [vmem:[#allocation2 + $0xd8] sm:$0xff] }
 0x1fd   : > { %2166 = vmatprep.mubr.bf16.mxu1 %v4377_v14  ;;  %v1089_v14 = vld [vmem:[#allocation2 + $0x10] sm:$0xff]  ;;  %3353 = vmatpush3.bf16.msra.mxu1 %v3701_v29 }
 0x1ff   : > { %3303 = vmatpush3.bf16.msra.mxu0 %v3692_v27 }
 0x200   : > { %3320 = vmatprep.subr.bf16.mxu0 %v3693_v28 }
 0x202   : > { %1779 = vmatmul.mubr.bf16.gmra.mrb[52].mxu0 %v4541_v17 }
 0x203   : > { %1786 = vmatprep.mubr.bf16.mxu0 %v4423_v7 }
 0x204   : > { %2167 = vmatmul.mubr.bf16.gmra.mrb[40].mxu1 %v4519_v26  ;;  %v3700_v26 = vld [vmem:[#allocation8 + $0x238] sm:$0xff]  }
 0x205   : > { %2174 = vmatprep.mubr.bf16.mxu1 %v4371_v10  ;;  %v3694_v10 = vld [vmem:[#allocation8 + $0x208] sm:$0xff]  }
 0x20a   : > { %1787 = vmatmul.mubr.bf16.gmra.mrb[56].mxu0 %v1171_v18 }
 0x20b   : > { %1794 = vmatprep.mubr.bf16.mxu0 %v4407_v57 }
 0x20c   : > { %2175 = vmatmul.mubr.bf16.gmra.mrb[44].mxu1 %v4541_v17 }
 0x20d   : > { %2182 = vmatprep.mubr.bf16.mxu1 %v4423_v7  ;;  %v3695_v7 = vld [vmem:[#allocation8 + $0x210] sm:$0xff]  }
 0x212   : > { %1795 = vmatmul.mubr.bf16.gmra.mrb[60].mxu0 %v1174_v40 }
 0x213   : > { %1802 = vmatprep.mubr.bf16.mxu0 %v4474_v8 }
 0x214   : > { %2183 = vmatmul.mubr.bf16.gmra.mrb[48].mxu1 %v1171_v18 }
 0x215   : > { %2190 = vmatprep.mubr.bf16.mxu1 %v4407_v57  ;;  %v3696_v57 = vld [vmem:[#allocation8 + $0x218] sm:$0xff]  }
 0x21a   : > { %1803 = vmatmul.mubr.bf16.gmra.mrb[64].mxu0 %v1177_v23 }
 0x21b   : > { %3304 = vmatprep.mubr.bf16.mxu0 %v1089_v14 }
 0x21c   : > { %2191 = vmatmul.mubr.bf16.gmra.mrb[52].mxu1 %v1174_v40 }
 0x21d   : > { %2198 = vmatprep.mubr.bf16.mxu1 %v4474_v8  ;;  %v3697_v8 = vld [vmem:[#allocation8 + $0x220] sm:$0xff]  }
 0x222   : > { %3305 = vmatmul.mubr.bf16.vlgmr.msra.gmra.mrb[20].mxu0 %v4462_v1  ;;  %v3698_v1 = vld [vmem:[#allocation8 + $0x228] sm:$0xff]  }
 0x223   : > { %3321 = vmatpush3.bf16.msra.mxu0 %v3693_v28  ;;  %3308 = vmatprep.mubr.bf16.mxu0 %v4470_v4 }
 0x224   : > { %3322 = vmatprep.subr.bf16.mxu0 %v3694_v10  ;;  %2199 = vmatmul.mubr.bf16.gmra.mrb[56].mxu1 %v1177_v23 }
 0x225   : > { %2206 = vmatprep.mubr.bf16.mxu1 %v4472_v6  ;;  %v3699_v6 = vld [vmem:[#allocation8 + $0x230] sm:$0xff]  }
 0x227   : > { %3323 = vmatpush3.bf16.msra.mxu0 %v3694_v10 }
 0x228   : > { %3324 = vmatprep.subr.bf16.mxu0 %v3695_v7 }
 0x22a   : > { %3309 = vmatmul.mubr.bf16.gmra.mrb[24].mxu0 %v4495_v54 }
 0x22b   : > { %3325 = vmatpush3.bf16.msra.mxu0 %v3695_v7  ;;  %3312 = vmatprep.mubr.bf16.mxu0 %v4499_v62 }
 0x22c   : > { %3326 = vmatprep.subr.bf16.mxu0 %v3696_v57  ;;  %2207 = vmatmul.mubr.bf16.gmra.mrb[60].mxu1 %v1180_v25 }
 0x22d   : > { %2214 = vmatprep.mubr.bf16.mxu1 %v4515_v22  ;;  %v1932_v22 = vld [vmem:[#allocation2 + $0xe8] sm:$0xff] }
 0x22f   : > { %3327 = vmatpush3.bf16.msra.mxu0 %v3696_v57 }
 0x230   : > { %3328 = vmatprep.subr.bf16.mxu0 %v3697_v8 }
 0x232   : > { %3313 = vmatmul.mubr.bf16.gmra.mrb[28].mxu0 %v4522_v38 }
 0x233   : > { %3329 = vmatpush3.bf16.msra.mxu0 %v3697_v8  ;;  %3316 = vmatprep.mubr.bf16.mxu0 %v4528_v45 }
 0x234   : > { %3330 = vmatprep.subr.bf16.mxu0 %v3698_v1  ;;  %2215 = vmatmul.mubr.bf16.gmra.mrb[64].mxu1 %v1930_v53 }
 0x237   : > { %3331 = vmatpush3.bf16.msra.mxu0 %v3698_v1 }
 0x238   : > { %3332 = vmatprep.subr.bf16.mxu0 %v3699_v6 }
 0x23a   : > { %3317 = vmatmul.mubr.bf16.gmra.mrb[32].mxu0 %v4545_v5 }
 0x23b   : > { %3333 = vmatpush3.bf16.msra.mxu0 %v3699_v6  ;;  %3336 = vmatprep.mubr.bf16.mxu0 %v4470_v4  ;;  %v3702_v4 = vld [vmem:[#allocation9 + $0x8] sm:$0xff]  }
 0x23c   : > { %3334 = vmatprep.subr.bf16.mxu0 %v3700_v26  ;;  %3354 = vmatprep.subr.bf16.mxu1 %v3702_v4 }
 0x23d   : > { %3355 = vmatpush3.bf16.msra.mxu1 %v3702_v4 }
 0x23e   : > { %3356 = vmatprep.subr.bf16.mxu1 %v3703_v30 }
 0x23f   : > { %3335 = vmatpush3.bf16.msra.mxu0 %v3700_v26 }
 0x241   : > { %3357 = vmatpush3.bf16.msra.mxu1 %v3703_v30 }
 0x242   : > { %3337 = vmatmul.mubr.bf16.vlgmr.msra.gmra.mrb[20].mxu0 %v4495_v54  ;;  %v3704_v54 = vld [vmem:[#allocation9 + $0x18] sm:$0xff]  }
 0x243   : > { %3340 = vmatprep.mubr.bf16.mxu0 %v4499_v62  ;;  %3358 = vmatprep.subr.bf16.mxu1 %v3704_v54  ;;  %v3705_v62 = vld [vmem:[#allocation9 + $0x20] sm:$0xff]  }
 0x245   : > { %3359 = vmatpush3.bf16.msra.mxu1 %v3704_v54 }
 0x246   : > { %3360 = vmatprep.subr.bf16.mxu1 %v3705_v62 }
 0x249   : > { %3361 = vmatpush3.bf16.msra.mxu1 %v3705_v62 }
 0x24a   : > { %3341 = vmatmul.mubr.bf16.gmra.mrb[24].mxu0 %v4522_v38  ;;  %3362 = vmatprep.subr.bf16.mxu1 %v3706_v32 }
 0x24b   : > { %3344 = vmatprep.mubr.bf16.mxu0 %v4528_v45 }
 0x24d   : > { %3363 = vmatpush3.bf16.msra.mxu1 %v3706_v32 }
 0x24e   : > { %3364 = vmatprep.subr.bf16.mxu1 %v3707_v34 }
 0x251   : > { %3365 = vmatpush3.bf16.msra.mxu1 %v3707_v34 }
 0x252   : > { %3345 = vmatmul.mubr.bf16.gmra.mrb[28].mxu0 %v4545_v5  ;;  %3366 = vmatprep.subr.bf16.mxu1 %v3708_v49 }
 0x253   : > { %3348 = vmatprep.mubr.bf16.mxu0 %v4548_v12 }
 0x255   : > { %3367 = vmatpush3.bf16.msra.mxu1 %v3708_v49 }
 0x25a   : > { %3349 = vmatmul.mubr.bf16.gmra.mrb[32].mxu0 %v1932_v22 }
 0x28f   : > { %v2944_v36 = vpop.f32.mrb[4].mxu1 }
 0x290   : > { %v2945_v37 = vpop.f32.mrb[5].mxu1 }
 0x291   : > { %v2946_v38 = vadd.f32 %v2945_v37, %v2944_v36  ;;  %v2947_v39 = vpop.f32.mrb[6].mxu1 }
 0x292   : > { %v2948_v41 = vpop.f32.mrb[7].mxu1 }
 0x293   : > { %v2949_v42 = vadd.f32 %v2948_v41, %v2947_v39 }
 0x297   : > { %v2950_v44 = vpop.f32.mrb[8].mxu1 }
 0x298   : > { %v2951_v45 = vpop.f32.mrb[9].mxu1 }
 0x299   : > { %v2952_v46 = vadd.f32 %v2951_v45, %v2950_v44  ;;  %v2953_v47 = vpop.f32.mrb[10].mxu1 }
 0x29a   : > { %v2954_v48 = vpop.f32.mrb[11].mxu1 }
 0x29b   : > { %v2955_v43 = vadd.f32 %v2954_v48, %v2953_v47 }
 0x29f   : > { %v2956_v51 = vpop.f32.mrb[12].mxu1 }
 0x2a0   : > { %v2957_v52 = vpop.f32.mrb[13].mxu1 }
 0x2a1   : > { %v2958_v55 = vadd.f32 %v2957_v52, %v2956_v51  ;;  %v2959_v58 = vpop.f32.mrb[14].mxu1 }
 0x2a2   : > { %v2960_v59 = vpop.f32.mrb[15].mxu1 }
 0x2a3   : > { %v2961_v60 = vadd.f32 %v2960_v59, %v2959_v58 }
 0x2a7   : > { %v2962_v61 = vpop.f32.mrb[16].mxu1 }
 0x2a8   : > { %v2963_v17 = vpop.f32.mrb[17].mxu1 }
 0x2a9   : > { %v2964_v63 = vadd.f32 %v2963_v17, %v2962_v61  ;;  %v2965_v50 = vpop.f32.mrb[18].mxu1 }
 0x2aa   : > { %v2966_v56 = vpop.f32.mrb[19].mxu1 }
 0x2ab   : > { %v2967_v2 = vadd.f32 %v2966_v56, %v2965_v50 }
 0x2af   : > { %v2968_v3 = vpop.f32.mrb[20].mxu1 }
 0x2b0   : > { %v2969_v5 = vpop.f32.mrb[21].mxu1 }
 0x2b1   : > { %v4594_v9 = vadd.f32 %v2969_v5, %v2968_v3  ;;  %v2971_v11 = vpop.f32.mrb[22].mxu1 }
 0x2b2   : > { %v2972_v12 = vpop.f32.mrb[23].mxu1 }
 0x2b3   : > { %v4596_v13 = vadd.f32 %v2972_v12, %v2971_v11 }
 0x2b5   : > { %v3024_v15 = vpop.f32.mrb[36].mxu0 }
 0x2b6   : > { %v3025_v16 = vpop.f32.mrb[37].mxu0 }
 0x2b7   : > { %v3026_v18 = vadd.f32 %v3025_v16, %v3024_v15  ;;  %v3027_v19 = vpop.f32.mrb[38].mxu0  ;;  %v2974_v31 = vpop.f32.mrb[24].mxu1 }
 0x2b8   : > { %v3028_v40 = vpop.f32.mrb[39].mxu0  ;;  %v2975_v20 = vpop.f32.mrb[25].mxu1 }
 0x2b9   : > { %v3387_v21 = vadd.f32 %v3026_v18, %v2946_v38  ;;  %v3029_v23 = vadd.f32 %v3028_v40, %v3027_v19  ;;  %v4598_v24 = vadd.f32 %v2975_v20, %v2974_v31  ;;  %v2977_v35 = vpop.f32.mrb[26].mxu1 }
 0x2ba   : > { %v2978_v25 = vpop.f32.mrb[27].mxu1 }
 0x2bb   : > { %v3393_v0 = vadd.f32 %v3029_v23, %v2949_v42  ;;  %v4600_v33 = vadd.f32 %v2978_v25, %v2977_v35 }
 0x2bd   : > { %v3030_v27 = vpop.f32.mrb[40].mxu0 }
 0x2be   : > { %v3031_v28 = vpop.f32.mrb[41].mxu0 }
 0x2bf   : > { %v3032_v14 = vadd.f32 %v3031_v28, %v3030_v27  ;;  %v3033_v10 = vpop.f32.mrb[42].mxu0  ;;  %v2980_v7 = vpop.f32.mrb[28].mxu1 }
 0x2c0   : > { %v3034_v57 = vpop.f32.mrb[43].mxu0  ;;  %v2981_v8 = vpop.f32.mrb[29].mxu1 }
 0x2c1   : > { %v3384_v1 = vadd.f32 %v3032_v14, %v2952_v46  ;;  %v3035_v53 = vadd.f32 %v3034_v57, %v3033_v10  ;;  %v4602_v6 = vadd.f32 %v2981_v8, %v2980_v7  ;;  %v2983_v26 = vpop.f32.mrb[30].mxu1 }
 0x2c2   : > { %v2984_v22 = vpop.f32.mrb[31].mxu1 }
 0x2c3   : > { %v3390_v29 = vadd.f32 %v3035_v53, %v2955_v43  ;;  %v4604_v4 = vadd.f32 %v2984_v22, %v2983_v26 }
 0x2c5   : > { %v3036_v30 = vpop.f32.mrb[44].mxu0 }
 0x2c6   : > { %v3037_v54 = vpop.f32.mrb[45].mxu0 }
 0x2c7   : > { %v3038_v62 = vadd.f32 %v3037_v54, %v3036_v30  ;;  %v3039_v32 = vpop.f32.mrb[46].mxu0  ;;  %v2986_v34 = vpop.f32.mrb[32].mxu1 }
 0x2c8   : > { %v3040_v36 = vpop.f32.mrb[47].mxu0  ;;  %v2987_v37 = vpop.f32.mrb[33].mxu1 }
 0x2c9   : > { %v3399_v38 = vadd.f32 %v3038_v62, %v2958_v55  ;;  %v3041_v39 = vadd.f32 %v3040_v36, %v3039_v32  ;;  %v4606_v41 = vadd.f32 %v2987_v37, %v2986_v34  ;;  %v2989_v42 = vpop.f32.mrb[34].mxu1 }
 0x2ca   : > { %v2990_v44 = vpop.f32.mrb[35].mxu1 }
 0x2cb   : > { %v3405_v45 = vadd.f32 %v3041_v39, %v2961_v60  ;;  %v4608_v46 = vadd.f32 %v2990_v44, %v2989_v42 }
 0x2cd   : > { %v3042_v47 = vpop.f32.mrb[48].mxu0 }
 0x2ce   : > { %v3043_v48 = vpop.f32.mrb[49].mxu0 }
 0x2cf   : > { %v3044_v43 = vadd.f32 %v3043_v48, %v3042_v47  ;;  %v3045_v49 = vpop.f32.mrb[50].mxu0  ;;  %v3104_v51 = vpop.f32.mrb[36].mxu1 }
 0x2d0   : > { %v3046_v52 = vpop.f32.mrb[51].mxu0  ;;  %v3105_v58 = vpop.f32.mrb[37].mxu1 }
 0x2d1   : > { %v3396_v59 = vadd.f32 %v3044_v43, %v2964_v63  ;;  %v3047_v61 = vadd.f32 %v3046_v52, %v3045_v49  ;;  %v3106_v17 = vadd.f32 %v3105_v58, %v3104_v51  ;;  %v3107_v50 = vpop.f32.mrb[38].mxu1 }
 0x2d2   : > { %v3108_v55 = vpop.f32.mrb[39].mxu1 }
 0x2d3   : > { %v3402_v56 = vadd.f32 %v3047_v61, %v2967_v2  ;;  %v3109_v3 = vadd.f32 %v3108_v55, %v3107_v50  ;;  %v4610_v5 = vadd.f32 %v3387_v21, %v3106_v17 }
 0x2d5   : > { %v3048_v11 = vpop.f32.mrb[52].mxu0  ;;  %v4612_v60 = vadd.f32 %v3393_v0, %v3109_v3 }
 0x2d6   : > { %v3049_v12 = vpop.f32.mrb[53].mxu0 }
 0x2d7   : > { %v3050_v15 = vadd.f32 %v3049_v12, %v3048_v11  ;;  %v3051_v16 = vpop.f32.mrb[54].mxu0  ;;  %v3110_v18 = vpop.f32.mrb[40].mxu1 }
 0x2d8   : > { %v3052_v19 = vpop.f32.mrb[55].mxu0  ;;  %v3111_v31 = vpop.f32.mrb[41].mxu1 }
 0x2d9   : > { %v3411_v40 = vadd.f32 %v3050_v15, %v4594_v9  ;;  %v3053_v63 = vadd.f32 %v3052_v19, %v3051_v16  ;;  %v3112_v20 = vadd.f32 %v3111_v31, %v3110_v18  ;;  %v3113_v23 = vpop.f32.mrb[42].mxu1 }
 0x2da   : > { %v3114_v35 = vpop.f32.mrb[43].mxu1 }
 0x2db   : > { %v3417_v2 = vadd.f32 %v3053_v63, %v4596_v13  ;;  %v3115_v25 = vadd.f32 %v3114_v35, %v3113_v23  ;;  %v4616_v21 = vadd.f32 %v3384_v1, %v3112_v20 }
 0x2dd   : > { %v3054_v27 = vpop.f32.mrb[56].mxu0  ;;  %v4618_v0 = vadd.f32 %v3390_v29, %v3115_v25 }
 0x2de   : > { %v3055_v28 = vpop.f32.mrb[57].mxu0 }
 0x2df   : > { %v3056_v14 = vadd.f32 %v3055_v28, %v3054_v27  ;;  %v3057_v10 = vpop.f32.mrb[58].mxu0  ;;  %v3116_v7 = vpop.f32.mrb[44].mxu1 }
 0x2e0   : > { %v3058_v57 = vpop.f32.mrb[59].mxu0  ;;  %v3117_v8 = vpop.f32.mrb[45].mxu1 }
 0x2e1   : > { %v3408_v9 = vadd.f32 %v3056_v14, %v4598_v24  ;;  %v3059_v53 = vadd.f32 %v3058_v57, %v3057_v10  ;;  %v3118_v26 = vadd.f32 %v3117_v8, %v3116_v7  ;;  %v3119_v22 = vpop.f32.mrb[46].mxu1 }
 0x2e2   : > { %v3120_v30 = vpop.f32.mrb[47].mxu1 }
 0x2e3   : > { %v3414_v13 = vadd.f32 %v3059_v53, %v4600_v33  ;;  %v3121_v54 = vadd.f32 %v3120_v30, %v3119_v22  ;;  %v4622_v1 = vadd.f32 %v3399_v38, %v3118_v26 }
 0x2e5   : > { %v3060_v62 = vpop.f32.mrb[60].mxu0  ;;  %v4624_v29 = vadd.f32 %v3405_v45, %v3121_v54 }
 0x2e6   : > { %v3061_v32 = vpop.f32.mrb[61].mxu0 }
 0x2e7   : > { %v3062_v34 = vadd.f32 %v3061_v32, %v3060_v62  ;;  %v3063_v36 = vpop.f32.mrb[62].mxu0  ;;  %v3122_v37 = vpop.f32.mrb[48].mxu1 }
 0x2e8   : > { %v3064_v39 = vpop.f32.mrb[63].mxu0  ;;  %v3123_v42 = vpop.f32.mrb[49].mxu1 }
 0x2e9   : > { %v3423_v24 = vadd.f32 %v3062_v34, %v4602_v6  ;;  %v3065_v44 = vadd.f32 %v3064_v39, %v3063_v36  ;;  %v3124_v47 = vadd.f32 %v3123_v42, %v3122_v37  ;;  %v3125_v48 = vpop.f32.mrb[50].mxu1 }
 0x2ea   : > { %v3126_v43 = vpop.f32.mrb[51].mxu1 }
 0x2eb   : > { %v3429_v33 = vadd.f32 %v3065_v44, %v4604_v4  ;;  %v3127_v49 = vadd.f32 %v3126_v43, %v3125_v48  ;;  %v3397_v38 = vadd.f32 %v3396_v59, %v3124_v47 }
 0x2ed   : > { %v3066_v51 = vpop.f32.mrb[64].mxu0  ;;  %v4628_v52 = vadd.f32 %v3402_v56, %v3127_v49 }
 0x2ee   : > { %v3067_v45 = vpop.f32.mrb[65].mxu0 }
 0x2ef   : > { %v3068_v58 = vadd.f32 %v3067_v45, %v3066_v51  ;;  %v3069_v61 = vpop.f32.mrb[66].mxu0  ;;  %v3128_v17 = vpop.f32.mrb[52].mxu1 }
 0x2f0   : > { %v3070_v50 = vpop.f32.mrb[67].mxu0  ;;  %v3129_v55 = vpop.f32.mrb[53].mxu1 }
 0x2f1   : > { %v3420_v3 = vadd.f32 %v3068_v58, %v4606_v41  ;;  %v3071_v6 = vadd.f32 %v3070_v50, %v3069_v61  ;;  %v3130_v11 = vadd.f32 %v3129_v55, %v3128_v17  ;;  %v3131_v12 = vpop.f32.mrb[54].mxu1 }
 0x2f2   : > { %v3132_v15 = vpop.f32.mrb[55].mxu1 }
 0x2f3   : > { %v3426_v16 = vadd.f32 %v3071_v6, %v4608_v46  ;;  %v3133_v4 = vadd.f32 %v3132_v15, %v3131_v12  ;;  %v4632_v18 = vadd.f32 %v3411_v40, %v3130_v11 }
 0x2f5   : > { %v4634_v59 = vadd.f32 %v3417_v2, %v3133_v4 }
 0x2f7   : > { %v3134_v56 = vpop.f32.mrb[56].mxu1 }
 0x2f8   : > { %v3135_v19 = vpop.f32.mrb[57].mxu1 }
 0x2f9   : > { %v3136_v31 = vadd.f32 %v3135_v19, %v3134_v56  ;;  %v3137_v63 = vpop.f32.mrb[58].mxu1 }
 0x2fa   : > { %v3138_v20 = vpop.f32.mrb[59].mxu1 }
 0x2fb   : > { %v3139_v23 = vadd.f32 %v3138_v20, %v3137_v63  ;;  %v3409_v35 = vadd.f32 %v3408_v9, %v3136_v31 }
 0x2fd   : > { %v3415_v25 = vadd.f32 %v3414_v13, %v3139_v23  ;;  %v4645_v13 = vld [vmem:[%s4859_s4] ss:$0 sm:$0xff]  ;;  %s4864_s4 = sld [smem:[#allocation25_spill]] }
 0x2ff   : > { %v3140_v41 = vpop.f32.mrb[60].mxu1 }
 0x300   : > { %v3141_v27 = vpop.f32.mrb[61].mxu1 }
 0x301   : > { %v3142_v28 = vadd.f32 %v3141_v27, %v3140_v41  ;;  %v3143_v14 = vpop.f32.mrb[62].mxu1 }
 0x302   : > { %v3144_v10 = vpop.f32.mrb[63].mxu1 }
 0x303   : > { %v3145_v7 = vadd.f32 %v3144_v10, %v3143_v14  ;;  %v4636_v46 = vadd.f32 %v3423_v24, %v3142_v28  ;;  %s4736_s24 = scalar_lea.hbm %s4864_s4, %s2888_s30 }
 0x305   : > { %v4638_v40 = vadd.f32 %v3429_v33, %v3145_v7 }
 0x307   : > { %v3146_v2 = vpop.f32.mrb[64].mxu1 }
 0x308   : > { %v3147_v57 = vpop.f32.mrb[65].mxu1 }
 0x309   : > { %v3148_v8 = vadd.f32 %v3147_v57, %v3146_v2  ;;  %v3149_v53 = vpop.f32.mrb[66].mxu1 }
 0x30a   : > { %v3150_v26 = vpop.f32.mrb[67].mxu1 }
 0x30b   : > { %v3151_v22 = vadd.f32 %v3150_v26, %v3149_v53  ;;  %v3421_v30 = vadd.f32 %v3420_v3, %v3148_v8 }
 0x30d   : > { %v4640_v54 = vadd.f32 %v3426_v16, %v3151_v22 }
 0x315   : > { %v3338_v9 = vpop.f32.mrb[20].mxu0 }
 0x316   : > { %v3386_v62 = vadd.f32 %v4616_v21, %v3338_v9  ;;  %v2257_v32 = vpop.f32.mrb[21].mxu0 }
 0x317   : > { %v3389_v34 = vadd.f32 %v4610_v5, %v2257_v32  ;;  %v3339_v36 = vpop.f32.mrb[22].mxu0 }
 0x318   : > { %v2345_v37 = vadd.f32 %v3386_v62, %v4645_v13  ;;  %v3392_v39 = vadd.f32 %v4618_v0, %v3339_v36  ;;  %v2260_v42 = vpop.f32.mrb[23].mxu0 }
 0x319   : > { %v2343_v24 = vadd.f32 %v3389_v34, %v4645_v13  ;;  %v3395_v44 = vadd.f32 %v4612_v60, %v2260_v42 }
 0x31a   : > { %v2346_v47 = vadd.f32 %v3392_v39, %v4645_v13  ;;  %v2361_v43 = vmax.f32 %v2345_v37, 0.0 }
 0x31b   : > { %v2344_v48 = vadd.f32 %v3395_v44, %v4645_v13  ;;  %v2359_v21 = vmax.f32 %v2343_v24, 0.0 }
 0x31c   : > { %v2362_v33 = vmax.f32 %v2346_v47, 0.0 }
 0x31d   : > { %v2360_v49 = vmax.f32 %v2344_v48, 0.0  ;;  %v3342_v51 = vpop.f32.mrb[24].mxu0  ;;  %v2553_v48 = vld [vmem:[%s4282_s14 + $0x10] sm:$0xff] }
 0x31e   : > { %v2376_v5 = vpack.c.bf16 %v2362_v33, %v2361_v43  ;;  %v3398_v45 = vadd.f32 %v3397_v38, %v3342_v51  ;;  %v2273_v58 = vpop.f32.mrb[25].mxu0  ;;  %v2551_v33 = vld [vmem:[%s4282_s14] sm:$0xff]  ;;  %v2554_v51 = vld [vmem:[%s4282_s14 + $0x18] sm:$0xff] }
 0x31f   : > { %v3401_v61 = vadd.f32 %v4622_v1, %v2273_v58  ;;  %v3343_v0 = vpop.f32.mrb[26].mxu0  ;;  %v2375_v17 = vpack.c.bf16 %v2360_v49, %v2359_v21 }
 0x320   : > { %v2349_v50 = vadd.f32 %v3398_v45, %v4645_v13  ;;  %v3404_v60 = vadd.f32 %v4628_v52, %v3343_v0  ;;  %v2276_v55 = vpop.f32.mrb[27].mxu0 }
 0x321   : > { %v2347_v3 = vadd.f32 %v3401_v61, %v4645_v13  ;;  %v3407_v6 = vadd.f32 %v4624_v29, %v2276_v55  ;;  %3368 = vmatprep.mubr.bf16.mxu1 %v2375_v17  ;;  %v2552_v61 = vld [vmem:[%s4282_s14 + $0x8] sm:$0xff] }
 0x322   : > { %v2350_v11 = vadd.f32 %v3404_v60, %v4645_v13  ;;  %3369 = vmatmul.mubr.bf16.vlgmr.msra.gmra.mrb[68].mxu1 %v2376_v5  ;;  %v2365_v12 = vmax.f32 %v2349_v50, 0.0 }
 0x323   : > { %v2348_v38 = vadd.f32 %v3407_v6, %v4645_v13  ;;  %v2363_v1 = vmax.f32 %v2347_v3, 0.0 }
 0x324   : > { %v2366_v15 = vmax.f32 %v2350_v11, 0.0 }
 0x325   : > { %v2364_v16 = vmax.f32 %v2348_v38, 0.0  ;;  %v3346_v4 = vpop.f32.mrb[28].mxu0 }
 0x326   : > { %v3410_v56 = vadd.f32 %v3409_v35, %v3346_v4  ;;  %v2289_v19 = vpop.f32.mrb[29].mxu0  ;;  %v2378_v31 = vpack.c.bf16 %v2366_v15, %v2365_v12  ;;  %v2557_v12 = vld [vmem:[%s4282_s14 + $0x30] sm:$0xff] }
 0x327   : > { %v3413_v52 = vadd.f32 %v4632_v18, %v2289_v19  ;;  %v3347_v63 = vpop.f32.mrb[30].mxu0  ;;  %v2377_v20 = vpack.c.bf16 %v2364_v16, %v2363_v1  ;;  %v2555_v16 = vld [vmem:[%s4282_s14 + $0x20] sm:$0xff]  ;;  %v2558_v19 = vld [vmem:[%s4282_s14 + $0x38] sm:$0xff] }
 0x328   : > { %v2353_v29 = vadd.f32 %v3410_v56, %v4645_v13  ;;  %v3416_v23 = vadd.f32 %v3415_v25, %v3347_v63  ;;  %v2292_v41 = vpop.f32.mrb[31].mxu0 }
 0x329   : > { %v2351_v27 = vadd.f32 %v3413_v52, %v4645_v13  ;;  %v3419_v28 = vadd.f32 %v4634_v59, %v2292_v41  ;;  %3372 = vmatprep.mubr.bf16.mxu1 %v2377_v20  ;;  %v2556_v20 = vld [vmem:[%s4282_s14 + $0x28] sm:$0xff] }
 0x32a   : > { %v2354_v14 = vadd.f32 %v3416_v23, %v4645_v13  ;;  %3373 = vmatmul.mubr.bf16.gmra.mrb[72].mxu1 %v2378_v31  ;;  %v2369_v10 = vmax.f32 %v2353_v29, 0.0 }
 0x32b   : > { %v2352_v35 = vadd.f32 %v3419_v28, %v4645_v13  ;;  %v2367_v2 = vmax.f32 %v2351_v27, 0.0 }
 0x32c   : > { %v2370_v7 = vmax.f32 %v2354_v14, 0.0 }
 0x32d   : > { %v2368_v18 = vmax.f32 %v2352_v35, 0.0  ;;  %v3350_v57 = vpop.f32.mrb[32].mxu0 }
 0x32e   : > { %v3422_v8 = vadd.f32 %v3421_v30, %v3350_v57  ;;  %v2305_v53 = vpop.f32.mrb[33].mxu0  ;;  %v2380_v26 = vpack.c.bf16 %v2370_v7, %v2369_v10 }
 0x32f   : > { %v3425_v25 = vadd.f32 %v4636_v46, %v2305_v53  ;;  %v3351_v22 = vpop.f32.mrb[34].mxu0  ;;  %v2379_v9 = vpack.c.bf16 %v2368_v18, %v2367_v2  ;;  %v2561_v2 = vld [vmem:[%s4282_s14 + $0x50] sm:$0xff] }
 0x330   : > { %v2357_v59 = vadd.f32 %v3422_v8, %v4645_v13  ;;  %v3428_v62 = vadd.f32 %v4640_v54, %v3351_v22  ;;  %v2308_v32 = vpop.f32.mrb[35].mxu0  ;;  %v2559_v8 = vld [vmem:[%s4282_s14 + $0x40] sm:$0xff] }
 0x331   : > { %v2355_v34 = vadd.f32 %v3425_v25, %v4645_v13  ;;  %v3431_v36 = vadd.f32 %v4638_v40, %v2308_v32  ;;  %3376 = vmatprep.mubr.bf16.mxu1 %v2379_v9  ;;  %v4679_v40 = vld [vmem:[%s4861_s21] ss:$0 sm:$0xff]  ;;  %v2562_v25 = vld [vmem:[%s4282_s14 + $0x58] sm:$0xff]  ;;  %s3965_s21 = smov [#allocation11]  }
 0x332   : > { %v2358_v30 = vadd.f32 %v3428_v62, %v4645_v13  ;;  %3377 = vmatmul.mubr.bf16.gmra.mrb[76].mxu1 %v2380_v26  ;;  %v2373_v37 = vmax.f32 %v2357_v59, 0.0  ;;  %v2560_v62 = vld [vmem:[%s4282_s14 + $0x48] sm:$0xff]  ;;  %s3827_s27 = sshll.u32 %s3965_s21, 4  ;;  %s3828_s27 = int_to_ptr.vmem [resolvable:$false] %s3827_s27 }
 0x333   : > { %v2356_v46 = vadd.f32 %v3431_v36, %v4645_v13  ;;  %v2371_v42 = vmax.f32 %v2355_v34, 0.0  ;;  %s3829_s1 = scalar_lea.vmem %s3828_s27, 4096  ;;  %p3830_p4 = scmp.lt.s32.totalorder %s4738_s20, %s3828_s27 }
 0x334   : > { %v2374_v39 = vmax.f32 %v2358_v30, 0.0  ;;  %p3831_p7 = scmp.lt.s32.totalorder %s3829_s1, %s3823_s12 }
 0x335   : > { %v2372_v54 = vmax.f32 %v2356_v46, 0.0 }
 0x336   : > { %v2382_v24 = vpack.c.bf16 %v2374_v39, %v2373_v37  ;;  %p3832_p3 = por %p3831_p7, %p3830_p4 }
 0x337   : > { %v2381_v44 = vpack.c.bf16 %v2372_v54, %v2371_v42 }
 0x338   : > { %p3833_p0 = pnand %p3832_p3, %p3826_p12 }
 0x339   : > { %3380 = vmatprep.mubr.bf16.mxu1 %v2381_v44 }
 0x33a   : > { %3381 = vmatmul.mubr.bf16.gmra.mrb[80].mxu1 %v2382_v24  ;;  %v2565_v24 = vld [vmem:[%s4282_s14 + $0x70] sm:$0xff] }
 0x3f5   : > { %v3370_v47 = vpop.f32.mrb[68].mxu1 }
 0x3f6   : > { %v2497_v13 = vadd.f32 %v3370_v47, %v4679_v40  ;;  %v2488_v43 = vpop.f32.mrb[69].mxu1 }
 0x3f7   : > { %v2489_v21 = vadd.f32 %v4679_v40, %v2488_v43  ;;  %v3371_v49 = vpop.f32.mrb[70].mxu1 }
 0x3f8   : > { %v2569_v5 = vadd.f32 %v2553_v48, %v2497_v13  ;;  %v2500_v45 = vadd.f32 %v3371_v49, %v4679_v40  ;;  %v2491_v58 = vpop.f32.mrb[71].mxu1  ;;  %v2563_v48 = vld [vmem:[%s4282_s14 + $0x60] sm:$0xff] }
 0x3f9   : > { %v2567_v0 = vadd.f32 %v2551_v33, %v2489_v21  ;;  %v2492_v17 = vadd.f32 %v4679_v40, %v2491_v58  ;;  %v2566_v33 = vld [vmem:[%s4282_s14 + $0x78] sm:$0xff] }
 0x3fa   : > { %v2585_v50 = vmax.f32 %v2569_v5, 0.0  ;;  %v2570_v60 = vadd.f32 %v2554_v51, %v2500_v45  ;;  %v2564_v5 = vld [vmem:[%s4282_s14 + $0x68] sm:$0xff]  ;;  %s4745_s14 = scalar_lea.sflag [#allocation5], %s352_s25 }
 0x3fb   : > { %v2583_v55 = vmax.f32 %v2567_v0, 0.0  ;;  %v2568_v3 = vadd.f32 %v2552_v61, %v2492_v17 }
 0x3fc   : > { %2601 = vst [vmem:[%s4691_s8 + $0x10] sm:$0xff] %v2585_v50  ;;  %v2586_v6 = vmax.f32 %v2570_v60, 0.0 }
 0x3fd   : > { %2599 = vst [vmem:[%s4691_s8] sm:$0xff] %v2583_v55  ;;  %v2584_v11 = vmax.f32 %v2568_v3, 0.0  ;;  %v3374_v38 = vpop.f32.mrb[72].mxu1 }
 0x3fe   : > { %2602 = vst [vmem:[%s4691_s8 + $0x18] sm:$0xff] %v2586_v6  ;;  %v2513_v15 = vadd.f32 %v3374_v38, %v4679_v40  ;;  %v2504_v1 = vpop.f32.mrb[73].mxu1 }
 0x3ff   : > { %2600 = vst [vmem:[%s4691_s8 + $0x8] sm:$0xff] %v2584_v11  ;;  %v2505_v4 = vadd.f32 %v4679_v40, %v2504_v1  ;;  %v3375_v56 = vpop.f32.mrb[74].mxu1 }
 0x400   : > { %v2573_v31 = vadd.f32 %v2557_v12, %v2513_v15  ;;  %v2516_v52 = vadd.f32 %v3375_v56, %v4679_v40  ;;  %v2507_v63 = vpop.f32.mrb[75].mxu1 }
 0x401   : > { %v2571_v29 = vadd.f32 %v2555_v16, %v2505_v4  ;;  %v2508_v23 = vadd.f32 %v4679_v40, %v2507_v63 }
 0x402   : > { %v2589_v41 = vmax.f32 %v2573_v31, 0.0  ;;  %v2574_v27 = vadd.f32 %v2558_v19, %v2516_v52 }
 0x403   : > { %v2587_v28 = vmax.f32 %v2571_v29, 0.0  ;;  %v2572_v14 = vadd.f32 %v2556_v20, %v2508_v23 }
 0x404   : > { %2605 = vst [vmem:[%s4691_s8 + $0x30] sm:$0xff] %v2589_v41  ;;  %v2590_v35 = vmax.f32 %v2574_v27, 0.0 }
 0x405   : > { %2603 = vst [vmem:[%s4691_s8 + $0x20] sm:$0xff] %v2587_v28  ;;  %v2588_v10 = vmax.f32 %v2572_v14, 0.0  ;;  %v3378_v7 = vpop.f32.mrb[76].mxu1 }
 0x406   : > { %2606 = vst [vmem:[%s4691_s8 + $0x38] sm:$0xff] %v2590_v35  ;;  %v2529_v18 = vadd.f32 %v3378_v7, %v4679_v40  ;;  %v2520_v57 = vpop.f32.mrb[77].mxu1 }
 0x407   : > { %2604 = vst [vmem:[%s4691_s8 + $0x28] sm:$0xff] %v2588_v10  ;;  %v2521_v53 = vadd.f32 %v4679_v40, %v2520_v57  ;;  %v3379_v26 = vpop.f32.mrb[78].mxu1 }
 0x408   : > { %v2577_v22 = vadd.f32 %v2561_v2, %v2529_v18  ;;  %v2532_v9 = vadd.f32 %v3379_v26, %v4679_v40  ;;  %v2523_v59 = vpop.f32.mrb[79].mxu1 }
 0x409   : > { %v2575_v32 = vadd.f32 %v2559_v8, %v2521_v53  ;;  %v2524_v34 = vadd.f32 %v4679_v40, %v2523_v59 }
 0x40a   : > { %v2593_v36 = vmax.f32 %v2577_v22, 0.0  ;;  %v2578_v30 = vadd.f32 %v2562_v25, %v2532_v9 }
 0x40b   : > { %v2591_v46 = vmax.f32 %v2575_v32, 0.0  ;;  %v2576_v37 = vadd.f32 %v2560_v62, %v2524_v34 }
 0x40c   : > { %2609 = vst [vmem:[%s4691_s8 + $0x50] sm:$0xff] %v2593_v36  ;;  %v2594_v39 = vmax.f32 %v2578_v30, 0.0 }
 0x40d   : > { %2607 = vst [vmem:[%s4691_s8 + $0x40] sm:$0xff] %v2591_v46  ;;  %v2592_v42 = vmax.f32 %v2576_v37, 0.0  ;;  %v3382_v54 = vpop.f32.mrb[80].mxu1 }
 0x40e   : > { %2610 = vst [vmem:[%s4691_s8 + $0x58] sm:$0xff] %v2594_v39  ;;  %v2545_v44 = vadd.f32 %v3382_v54, %v4679_v40  ;;  %v2536_v47 = vpop.f32.mrb[81].mxu1 }
 0x40f   : > { %2608 = vst [vmem:[%s4691_s8 + $0x48] sm:$0xff] %v2592_v42  ;;  %v2537_v13 = vadd.f32 %v4679_v40, %v2536_v47  ;;  %v3383_v43 = vpop.f32.mrb[82].mxu1 }
 0x410   : > { %v2581_v21 = vadd.f32 %v2565_v24, %v2545_v44  ;;  %v2548_v49 = vadd.f32 %v3383_v43, %v4679_v40  ;;  %v2539_v51 = vpop.f32.mrb[83].mxu1 }
 0x411   : > { %v2579_v45 = vadd.f32 %v2563_v48, %v2537_v13  ;;  %v2540_v58 = vadd.f32 %v4679_v40, %v2539_v51 }
 0x412   : > { %v2597_v61 = vmax.f32 %v2581_v21, 0.0  ;;  %v2582_v0 = vadd.f32 %v2566_v33, %v2548_v49 }
 0x413   : > { %v2595_v17 = vmax.f32 %v2579_v45, 0.0  ;;  %v2580_v50 = vadd.f32 %v2564_v5, %v2540_v58 }
 0x414   : > { %2613 = vst [vmem:[%s4691_s8 + $0x70] sm:$0xff] %v2597_v61  ;;  %v2598_v60 = vmax.f32 %v2582_v0, 0.0 }
 0x415   : > { %2611 = vst [vmem:[%s4691_s8 + $0x60] sm:$0xff] %v2595_v17  ;;  %v2596_v40 = vmax.f32 %v2580_v50, 0.0 }
 0x416   : > { %2614 = vst [vmem:[%s4691_s8 + $0x78] sm:$0xff] %v2598_v60 }
 0x417   : > { %2612 = vst [vmem:[%s4691_s8 + $0x68] sm:$0xff] %v2596_v40 }
 0x418   : > { %3836 = shalt.err (!%p3833_p0)
}
 0x419   : > { %s3837_s6 = scalar_lea.hbm %s4736_s24, 2048  ;;  %s3841_s15 = scalar_lea.hbm %s4864_s4, 8192 }
 0x41a   : > { %p3838_p1 = scmp.ne.s32.totalorder %s4736_s24, %s3837_s6  ;;  %p3842_p2 = scmp.lt.u32.totalorder %s4736_s24, %s4864_s4 }
 0x41b   : > { %p3843_p9 = scmp.lt.u32.totalorder %s3841_s15, %s3837_s6  ;;  %p3845_p13 = scmp.lt.u32.totalorder %s3837_s6, %s4736_s24 }
 0x41c   : > { %p3839_p11 = pnand %p3838_p1, %p4865_p6 }
 0x41d   : > { %p3844_p5 = por %p3843_p9, %p3842_p2 }
 0x41e   : > { %p3840_p10 = pneg %p3839_p11 }
 0x41f   : > { %p3846_p8 = por %p3845_p13, %p3844_p5 }
 0x421   : > { %p3847_p12 = pnand %p3846_p8, %p3840_p10 }
 0x423   : > { %3850 = shalt.err (!%p3847_p12)
}
 0x424   : > { %s3966_s30 = smov 128   ;;  %s3967_s16 = smov 8  }
 0x425   : > { %3478 = dma.vmem_to_hbm [thread:$0]  (%p4865_p6), %s4738_s20, 2048, %s4736_s24, %s4745_s14, %s3966_s30, %s3966_s30, %s3967_s16  }
 0x426 PF: > { %s4866_s19 = sld [smem:[#allocation16_spill]]  ;;  %s4867_s12 = sld [smem:[#allocation20_spill]] }
 0x427   : > { %p3505_p4 = scmp.ge.s32.totalorder %s3953_s11, 2 }
 0x42c   : > { %s2647_s21 = sand.u32 1, %s4866_s19   ;;  %p4868_p7 = scmp.ne.s32.totalorder %s4867_s12, 0 }
 0x42d   : > { %s2648_s27 = scalar_lea.sflag [#allocation5], %s2647_s21 }
 0x42e   : > { %p3495_p3 = pnand %p3505_p4, %p4868_p7 }
 0x430   : > { %3908 = dma.done.wait (!%p3495_p3), %s2648_s27, 2048  }
 0x431   : > { %3910 = vsyncadd (!%p3495_p3), %s2648_s27, 4294965248  ;;  %s25_s11 = sadd.s32 1, %s3953_s11   ;;  %s4869_s24 = sld [smem:[#allocation17_spill]] }
 0x432   : > { %p22_p0 = scmp.ge.s32.totalorder %s25_s11, 6   ;;  %s4870_s25 = smov %s3921_s26 }
 0x433   : > { %s4871_s26 = smov %s4215_s7  ;;  %s4872_s27 = smov %s3929_s28 }
 0x434   : > { %s4873_s28 = smov %s3933_s29  ;;  %s4874_s29 = smov %s4210_s23 }
 0x435   : > { %s4875_s30 = smov %s3945_s9  ;;  %s4876_s8 = smov %s3949_s10 }
 0x436   : > { %s4877_s9 = smov %s4880_s17  ;;  %s4878_s10 = smov %s4884_s22 }
 0x437   :  { %24 = sbr.rel (!%p22_p0) target bundleno = 17 (0x11), region = 113 }
 0x43e   :  { %2653 = vsyncpa [#allocation4], 1 }
 0x43f   :  { %2655 = vsyncpa [#allocation4 + $0x1], 1 }
 0x440   :  { %2656 = vsyncpa [#allocation7], 1 }
 0x441   :  { %2657 = vsyncpa [#allocation10], 1 }
 0x442   :  { %2658 = vsyncpa [#allocation5], 1 }
 0x443   :  { %2660 = vsyncpa [#allocation5 + $0x1], 1 }

</bundles_post_ra>
